<compile_context>
chip_gen: v7x
topology: tpu7x:2x2x1
jax: 0.10.0
libtpu: 0.0.40
codegen_flags: <defaults>
</compile_context>

<pallas_src>
import functools

import jax
import jax.numpy as jnp
from jax.experimental import pallas as pl
from jax.experimental.pallas import tpu as pltpu

EPS = 1e-5
TAU = 2.0
V_TH = 1.0


def _cdiv(a, b):
    return -(-a // b)


def _round_up(a, b):
    return _cdiv(a, b) * b


# ----------------------------------------------------------------------------
# Fused GEMM Pallas kernels (bf16 MXU, f32 accumulate, fused BN epilogue)
# ----------------------------------------------------------------------------
def _gemm_bias_kernel(x_ref, w_ref, cb_ref, o_ref):
    a = x_ref[...].astype(jnp.bfloat16)
    z = jnp.dot(a, w_ref[...], preferred_element_type=jnp.float32)
    o_ref[...] = z + cb_ref[...]


def _gemm_bias_affine_kernel(x_ref, w_ref, cb_ref, rs_ref, rsh_ref, o_ref):
    a = x_ref[...].astype(jnp.bfloat16)
    z = jnp.dot(a, w_ref[...], preferred_element_type=jnp.float32)
    o_ref[...] = (z + cb_ref[...]) * rs_ref[...] + rsh_ref[...]


def fused_gemm(x, w, col_bias=None, row_scale=None, row_shift=None,
               *, tm=256, tn=512):
    """y = (x @ w + col_bias) [* row_scale + row_shift], tiled Pallas GEMM.

    x: [M, K] f32 (cast to bf16 inside the kernel); w: [K, N] f32 (BN folded
    in f32, cast to bf16 once here); col_bias: [N]; row_scale/row_shift: [M].
    """
    M, K = x.shape
    K2, N = w.shape
    assert K == K2
    x = x.astype(jnp.float32)
    wb = w.astype(jnp.bfloat16)          # fold done in f32 by callers
    if col_bias is None:
        col_bias = jnp.zeros((N,), jnp.float32)
    cb = col_bias.astype(jnp.float32).reshape(1, N)

    has_affine = row_scale is not None
    if has_affine:
        assert row_shift is not None

    # Sublane-align the row count (usually a no-op: M = T*B*spatial).
    M8 = _round_up(M, 8)
    if M8 != M:
        x = jnp.pad(x, ((0, M8 - M), (0, 0)))
    tm_eff = min(tm, M8)                 # multiple of 8 (or == M8)
    grid_m = _cdiv(M8, tm_eff)
    tn_eff = tn if N > tn else N         # tn multiple of 128, or full N
    grid_n = _cdiv(N, tn_eff)

    in_specs = [
        pl.BlockSpec((tm_eff, K), lambda i, j: (i, 0)),
        pl.BlockSpec((K, tn_eff), lambda i, j: (0, j)),
        pl.BlockSpec((1, tn_eff), lambda i, j: (0, j)),
    ]
    args = [x, wb, cb]
    kernel = _gemm_bias_kernel
    if has_affine:
        rs = row_scale.astype(jnp.float32)
        rsh = row_shift.astype(jnp.float32)
        if M8 != M:
            rs = jnp.pad(rs, (0, M8 - M), constant_values=1.0)
            rsh = jnp.pad(rsh, (0, M8 - M))
        in_specs += [pl.BlockSpec((tm_eff, 1), lambda i, j: (i, 0)),
                     pl.BlockSpec((tm_eff, 1), lambda i, j: (i, 0))]
        args += [rs.reshape(M8, 1), rsh.reshape(M8, 1)]
        kernel = _gemm_bias_affine_kernel

    out = pl.pallas_call(
        kernel,
        out_shape=jax.ShapeDtypeStruct((M8, N), jnp.float32),
        grid=(grid_m, grid_n),
        in_specs=in_specs,
        out_specs=pl.BlockSpec((tm_eff, tn_eff), lambda i, j: (i, j)),
        compiler_params=pltpu.CompilerParams(
            dimension_semantics=("parallel", "parallel"),
            vmem_limit_bytes=64 * 1024 * 1024),
    )(*args)
    return out[:M] if M8 != M else out


# ----------------------------------------------------------------------------
# LIF neuron (multi-step), lane/sublane-dense layout
# ----------------------------------------------------------------------------
def _lif_kernel(x_ref, o_ref, v_ref):
    @pl.when(pl.program_id(1) == 0)
    def _():
        v_ref[...] = jnp.zeros(v_ref.shape, jnp.float32)

    v_prev = v_ref[...]
    v = v_prev + (x_ref[...] - v_prev) * (1.0 / TAU)   # decay_input, v_reset=0
    spike = (v >= V_TH).astype(jnp.float32)
    o_ref[...] = spike
    v_ref[...] = v * (1.0 - spike)                     # hard reset to 0


def lif(x, *, tr=512):
    """Multi-step spikingjelly LIFNode forward (tau=2, v_th=1, hard reset, v0=0)."""
    T = x.shape[0]
    N = 1
    for d in x.shape[1:]:
        N *= d
    R = _cdiv(N, 128)
    Rp = _round_up(R, 8)                 # dense (sublane, lane) = (8k, 128) tiles
    Np = Rp * 128
    xf = x.reshape(T, N).astype(jnp.float32)
    if Np != N:
        xf = jnp.pad(xf, ((0, 0), (0, Np - N)))
    xf = xf.reshape(T, Rp, 128)
    tr_eff = min(tr, Rp)
    grid_r = _cdiv(Rp, tr_eff)

    out = pl.pallas_call(
        _lif_kernel,
        out_shape=jax.ShapeDtypeStruct((T, Rp, 128), jnp.float32),
        grid=(grid_r, T),                 # T innermost: membrane carried in scratch
        in_specs=[pl.BlockSpec((1, tr_eff, 128), lambda r, t: (t, r, 0))],
        out_specs=pl.BlockSpec((1, tr_eff, 128), lambda r, t: (t, r, 0)),
        scratch_shapes=[pltpu.VMEM((1, tr_eff, 128), jnp.float32)],
        compiler_params=pltpu.CompilerParams(
            dimension_semantics=("parallel", "arbitrary")),
    )(xf)
    out = out.reshape(T, Np)
    if Np != N:
        out = out[:, :N]
    return out.reshape(x.shape)


# ----------------------------------------------------------------------------
# BatchNorm folding + conv-as-GEMM glue (channels-last [T,B,H,W,C])
# ----------------------------------------------------------------------------
def bn_scale_shift(bn):
    scale = bn['gamma'] / jnp.sqrt(bn['var'] + EPS)
    shift = bn['beta'] - bn['mean'] * scale
    return scale, shift


def patch_embed_conv(x, w, bn, p):
    """Conv2d(Cin, Cout, k=p, stride=p, bias=False) + BN2d, via patchify + GEMM."""
    T, B, H, W, Cin = x.shape
    Cout = w.shape[0]
    nh, nw = H // p, W // p
    xr = x.reshape(T, B, nh, p, nw, p, Cin).transpose(0, 1, 2, 4, 3, 5, 6)
    xm = xr.reshape(T * B * nh * nw, p * p * Cin)
    scale, shift = bn_scale_shift(bn)
    wm = w.transpose(0, 2, 3, 1).reshape(Cout, p * p * Cin).T * scale[None, :]
    y = fused_gemm(xm, wm, col_bias=shift)
    return y.reshape(T, B, nh, nw, Cout)


def conv_bn_3x3(x, w, bn, stride):
    """Conv2d(k=3, padding=1, bias=False) + BN2d via im2col + Pallas GEMM."""
    T, B, H, W, Cin = x.shape
    Cout = w.shape[0]
    OH = (H + 2 - 3) // stride + 1
    OW = (W + 2 - 3) // stride + 1
    xp = jnp.pad(x, ((0, 0), (0, 0), (1, 1), (1, 1), (0, 0)))
    cols = []
    for kh in range(3):
        for kw in range(3):
            cols.append(xp[:, :,
                           kh:kh + (OH - 1) * stride + 1:stride,
                           kw:kw + (OW - 1) * stride + 1:stride, :])
    patches = jnp.stack(cols, axis=4)                    # [T,B,OH,OW,9,Cin]
    xm = patches.reshape(T * B * OH * OW, 9 * Cin)
    scale, shift = bn_scale_shift(bn)
    wm = w.transpose(0, 2, 3, 1).reshape(Cout, 9 * Cin).T * scale[None, :]
    y = fused_gemm(xm, wm, col_bias=shift)
    return y.reshape(T, B, OH, OW, Cout)


def conv1x1_bn(x, w, bn):
    """1x1 conv over the channel (last) axis, bias=False, + BN2d."""
    T, B, H, W, Cin = x.shape
    Cout = w.shape[0]
    xm = x.reshape(-1, Cin)
    scale, shift = bn_scale_shift(bn)
    wm = w.reshape(Cout, Cin).T * scale[None, :]
    y = fused_gemm(xm, wm, col_bias=shift)
    return y.reshape(T, B, H, W, Cout)


# ----------------------------------------------------------------------------
# Model blocks (channels-last)
# ----------------------------------------------------------------------------
def patch_cell(x, p):
    node1 = conv_bn_3x3(x, p['c2n0_w'], p['c2n0_bn'], stride=2)
    node2 = conv_bn_3x3(x, p['c2n1_w'], p['c2n1_bn'], stride=2)
    node3 = conv_bn_3x3(x, p['c2n2_w'], p['c2n2_bn'], stride=2)
    node2 = node2 + conv_bn_3x3(lif(node1), p['n12_w'], p['n12_bn'], stride=1)
    node3 = node3 + node1 + conv_bn_3x3(lif(node2), p['n23_w'], p['n23_bn'], stride=1)
    return jnp.concatenate([node1, node2, node3], axis=-1)


def smlp_block(x, p):
    T, B, H, W, C = x.shape
    # proj_h : mix along H (Conv2d(H,H,1x1) with bias + BN2d(H) + LIF)
    xm = x.transpose(0, 1, 3, 4, 2).reshape(T * B * W * C, H)
    sc, sh = bn_scale_shift(p['proj_h_bn'])
    wm = p['proj_h_w'].T * sc[None, :]
    cb = sh + p['proj_h_b'] * sc
    yh = fused_gemm(xm, wm, col_bias=cb).reshape(T, B, W, C, H)
    x_h = lif(yh).transpose(0, 1, 4, 2, 3)               # -> [T,B,H,W,C]
    # proj_w : mix along W
    xm = x.transpose(0, 1, 2, 4, 3).reshape(T * B * H * C, W)
    sc, sh = bn_scale_shift(p['proj_w_bn'])
    wm = p['proj_w_w'].T * sc[None, :]
    cb = sh + p['proj_w_b'] * sc
    yw = fused_gemm(xm, wm, col_bias=cb).reshape(T, B, H, C, W)
    x_w = lif(yw).transpose(0, 1, 2, 4, 3)               # -> [T,B,H,W,C]
    # fuse: 1x1 conv(3C -> C, bias=False) + BN2d(C)
    cat = jnp.concatenate([x, x_h, x_w], axis=-1)
    return conv1x1_bn(cat, p['fuse_w'], p['fuse_bn'])


def channel_mix(x, p):
    """(t b h w c) -> rows (t b hw), FeedForward with per-hw BN1d, back."""
    T, B, H, W, C = x.shape
    HW = H * W
    xm = x.reshape(T * B * HW, C)
    hidden = p['w1'].shape[1]
    sc1, sh1 = bn_scale_shift(p['bn1'])                  # per-position (hw) BN1d
    h1 = fused_gemm(xm, p['w1'], col_bias=p['b1'],
                    row_scale=jnp.tile(sc1, T * B), row_shift=jnp.tile(sh1, T * B))
    s1 = lif(h1.reshape(T, B * HW, hidden))
    sc2, sh2 = bn_scale_shift(p['bn2'])
    h2 = fused_gemm(s1.reshape(T * B * HW, hidden), p['w2'], col_bias=p['b2'],
                    row_scale=jnp.tile(sc2, T * B), row_shift=jnp.tile(sh2, T * B))
    return h2.reshape(T, B, H, W, C)


def smlpnet_forward(x, params, depths):
    # x arrives as [T, B, C, H, W] (PyTorch layout); go channels-last once.
    x = x.transpose(0, 1, 3, 4, 2)
    shift = 0
    for i in range(len(depths)):
        pe = params['patch_embed'][i]
        if i == 0:
            h = patch_embed_conv(x, pe['w'], pe['bn'], params['patch_size'])
        else:
            h = patch_cell(x, pe)
        x = lif(h)
        for j in range(depths[i]):
            idx = j + shift
            token_h = smlp_block(x, params['token_mix'][idx])
            x = lif(h + token_h)
            x = lif(h + token_h + channel_mix(x, params['channel_mix'][idx]))
        shift += depths[i]
    # Head: final BatchNorm2d + spatial mean + Linear, folded into one GEMM
    # (BN/mean commute; mean becomes an HW-replicated, 1/HW-scaled weight).
    T, B, H, W, C = x.shape
    HW = H * W
    sc, sh = bn_scale_shift(params['final_bn'])
    w_fold = sc[:, None] * params['head_w']
    b_fold = params['head_b'] + sh @ params['head_w']
    num_classes = w_fold.shape[1]
    we = jnp.broadcast_to(w_fold[None, :, :] / HW,
                          (HW, C, num_classes)).reshape(HW * C, num_classes)
    out = fused_gemm(x.reshape(T * B, HW * C), we, col_bias=b_fold)
    return out.reshape(T, B, num_classes)


# ----------------------------------------------------------------------------
# Deterministic parameter initialization (shapes follow sMLPNet.__init__)
# ----------------------------------------------------------------------------
def init_params(key, in_channels, dim, alpha, num_classes, patch_size,
                image_size, depths):
    keys = iter(jax.random.split(key, 1024))
    nk = lambda: next(keys)
    w_init = lambda shape: 0.2 * jax.random.normal(nk(), shape, jnp.float32)
    b_init = lambda n: 0.1 * jax.random.normal(nk(), (n,), jnp.float32)

    def bn_init(n):
        return dict(gamma=1.0 + 0.1 * jax.random.normal(nk(), (n,), jnp.float32),
                    beta=0.1 * jax.random.normal(nk(), (n,), jnp.float32),
                    mean=0.05 * jax.random.normal(nk(), (n,), jnp.float32),
                    var=1.0 + 0.1 * jax.random.uniform(nk(), (n,), jnp.float32))

    num_patch = image_size // patch_size
    params = dict(patch_size=patch_size, patch_embed=[], token_mix=[],
                  channel_mix=[])
    for i in range(len(depths)):
        ratio = 2 ** i
        if i == 0:
            params['patch_embed'].append(dict(
                w=w_init((dim, in_channels, patch_size, patch_size)),
                bn=bn_init(dim)))
        else:
            cin, cout = dim * ratio // 2, dim * ratio
            assert cout % 3 == 0
            nc = cout // 3
            pe = {}
            for k in range(3):
                pe[f'c2n{k}_w'] = w_init((nc, cin, 3, 3))
                pe[f'c2n{k}_bn'] = bn_init(nc)
            pe['n12_w'], pe['n12_bn'] = w_init((nc, nc, 3, 3)), bn_init(nc)
            pe['n23_w'], pe['n23_bn'] = w_init((nc, nc, 3, 3)), bn_init(nc)
            params['patch_embed'].append(pe)
        C = dim * ratio
        hidden = C * alpha
        hp = num_patch // ratio
        for _ in range(depths[i]):
            params['channel_mix'].append(dict(
                w1=w_init((C, hidden)), b1=b_init(hidden), bn1=bn_init(hp * hp),
                w2=w_init((hidden, C)), b2=b_init(C), bn2=bn_init(hp * hp)))
            params['token_mix'].append(dict(
                proj_h_w=w_init((hp, hp)), proj_h_b=b_init(hp), proj_h_bn=bn_init(hp),
                proj_w_w=w_init((hp, hp)), proj_w_b=b_init(hp), proj_w_bn=bn_init(hp),
                fuse_w=w_init((C, C * 3, 1, 1)), fuse_bn=bn_init(C)))
    Cf = dim * 2 ** (len(depths) - 1)
    params['final_bn'] = bn_init(Cf)
    params['head_w'] = w_init((Cf, num_classes))
    params['head_b'] = b_init(num_classes)
    return params


# ----------------------------------------------------------------------------
if __name__ == "__main__":
    # Small config consistent with the module: dim divisible by 3, depths=[1,1].
    T, B = 2, 2
    in_channels, dim, alpha = 3, 6, 3
    num_classes, patch_size, image_size = 10, 4, 16
    depths = (1, 1)

    key = jax.random.PRNGKey(0)
    pkey, xkey = jax.random.split(key)
    params = init_params(pkey, in_channels, dim, alpha, num_classes,
                         patch_size, image_size, depths)
    x = jax.random.normal(xkey, (T, B, in_channels, image_size, image_size),
                          jnp.float32)

    fwd = jax.jit(functools.partial(smlpnet_forward, params=params,
                                    depths=depths))
    out = jax.block_until_ready(fwd(x))
    assert out.shape == (T, B, num_classes)
    assert bool(jnp.all(jnp.isfinite(out)))
    print("KERNEL_OK")
</pallas_src>

<mosaic_0001>
module attributes {stable_mosaic.version = 11 : i64} {
  func.func @_gemm_bias_kernel(%arg0: i32, %arg1: i32, %arg2: memref<64x48xf32, #tpu.memory_space<vmem>>, %arg3: memref<48x6xbf16, #tpu.memory_space<vmem>>, %arg4: memref<1x6xf32, #tpu.memory_space<vmem>>, %arg5: memref<64x6xf32, #tpu.memory_space<vmem>>) attributes {dimension_semantics = [#tpu.dimension_semantics<parallel>, #tpu.dimension_semantics<parallel>], iteration_bounds = array<i64: 1, 1>, scalar_prefetch = 0 : i64, scratch_operands = 0 : i64, tpu.core_type = #tpu.core_type<tc>, window_params = [{transform_indices = @transform_0, window_bounds = array<i64: 64, 48>}, {transform_indices = @transform_1, window_bounds = array<i64: 48, 6>}, {transform_indices = @transform_2, window_bounds = array<i64: 1, 6>}, {transform_indices = @transform_3, window_bounds = array<i64: 64, 6>}]} {
    %c0 = arith.constant 0 : index
    %c0_0 = arith.constant 0 : index
    %0 = vector.load %arg2[%c0, %c0_0] : memref<64x48xf32, #tpu.memory_space<vmem>>, vector<64x48xf32>
    %1 = arith.truncf %0 : vector<64x48xf32> to vector<64x48xbf16>
    %c0_1 = arith.constant 0 : index
    %c0_2 = arith.constant 0 : index
    %2 = vector.load %arg3[%c0_1, %c0_2] : memref<48x6xbf16, #tpu.memory_space<vmem>>, vector<48x6xbf16>
    %cst = arith.constant dense<0.000000e+00> : vector<64x6xf32>
    %3 = tpu.matmul %1, %2, %cst {dimension_numbers = #tpu.dot_dimension_numbers<[1], [0], [0], [1], [0, 0, 1, 1], [], []>} : vector<64x48xbf16>, vector<48x6xbf16>, vector<64x6xf32> -> vector<64x6xf32>
    %c0_3 = arith.constant 0 : index
    %c0_4 = arith.constant 0 : index
    %4 = vector.load %arg4[%c0_3, %c0_4] : memref<1x6xf32, #tpu.memory_space<vmem>>, vector<1x6xf32>
    %5 = vector.broadcast %4 : vector<1x6xf32> to vector<64x6xf32>
    %6 = arith.addf %3, %5 : vector<64x6xf32>
    %c0_5 = arith.constant 0 : index
    %c0_6 = arith.constant 0 : index
    %7 = vector.load %arg5[%c0_5, %c0_6] : memref<64x6xf32, #tpu.memory_space<vmem>>, vector<64x6xf32>
    tpu.vector_store %arg5[%c0_5, %c0_6], %6 {strides = array<i32>} : memref<64x6xf32, #tpu.memory_space<vmem>>, vector<64x6xf32>,
    return
  }
  func.func @transform_0(%arg0: i32, %arg1: i32) -> (i32, i32) {
    %c0_i32 = arith.constant 0 : i32
    %c0_i32_0 = arith.constant 0 : i32
    return %arg0, %c0_i32 : i32, i32
  }
  func.func @transform_1(%arg0: i32, %arg1: i32) -> (i32, i32) {
    %c0_i32 = arith.constant 0 : i32
    %c0_i32_0 = arith.constant 0 : i32
    return %c0_i32, %arg1 : i32, i32
  }
  func.func @transform_2(%arg0: i32, %arg1: i32) -> (i32, i32) {
    %c0_i32 = arith.constant 0 : i32
    %c0_i32_0 = arith.constant 0 : i32
    return %c0_i32, %arg1 : i32, i32
  }
  func.func @transform_3(%arg0: i32, %arg1: i32) -> (i32, i32) {
    %c0_i32 = arith.constant 0 : i32
    return %arg0, %arg1 : i32, i32
  }
}

module attributes {stable_mosaic.version = 11 : i64} {
  func.func @_lif_kernel(%arg0: i32, %arg1: i32, %arg2: memref<1x8x128xf32, #tpu.memory_space<vmem>>, %arg3: memref<1x8x128xf32, #tpu.memory_space<vmem>>, %arg4: memref<1x8x128xf32, #tpu.memory_space<vmem>>) attributes {dimension_semantics = [#tpu.dimension_semantics<parallel>, #tpu.dimension_semantics<arbitrary>], iteration_bounds = array<i64: 1, 2>, scalar_prefetch = 0 : i64, scratch_operands = 1 : i64, tpu.core_type = #tpu.core_type<tc>, window_params = [{transform_indices = @transform_0, window_bounds = array<i64: 1, 8, 128>}, {transform_indices = @transform_1, window_bounds = array<i64: 1, 8, 128>}]} {
    %c0_i32 = arith.constant 0 : i32
    %0 = arith.cmpi eq, %arg1, %c0_i32 : i32
    %1 = arith.extui %0 : i1 to i32
    %c0_i32_0 = arith.constant 0 : i32
    %2 = arith.cmpi ne, %1, %c0_i32_0 : i32
    scf.if %2 {
      %cst_14 = arith.constant 0.000000e+00 : f32
      %18 = vector.broadcast %cst_14 : f32 to vector<1x8x128xf32>
      %c0_15 = arith.constant 0 : index
      %c0_16 = arith.constant 0 : index
      %c0_17 = arith.constant 0 : index
      %19 = vector.load %arg4[%c0_15, %c0_16, %c0_17] : memref<1x8x128xf32, #tpu.memory_space<vmem>>, vector<1x8x128xf32>
      tpu.vector_store %arg4[%c0_15, %c0_16, %c0_17], %18 {strides = array<i32>} : memref<1x8x128xf32, #tpu.memory_space<vmem>>, vector<1x8x128xf32>,
    } else {
    }
    %c0 = arith.constant 0 : index
    %c0_1 = arith.constant 0 : index
    %c0_2 = arith.constant 0 : index
    %3 = vector.load %arg4[%c0, %c0_1, %c0_2] : memref<1x8x128xf32, #tpu.memory_space<vmem>>, vector<1x8x128xf32>
    %c0_3 = arith.constant 0 : index
    %c0_4 = arith.constant 0 : index
    %c0_5 = arith.constant 0 : index
    %4 = vector.load %arg2[%c0_3, %c0_4, %c0_5] : memref<1x8x128xf32, #tpu.memory_space<vmem>>, vector<1x8x128xf32>
    %5 = arith.subf %4, %3 : vector<1x8x128xf32>
    %cst = arith.constant 5.000000e-01 : f32
    %6 = vector.broadcast %cst : f32 to vector<1x8x128xf32>
    %7 = arith.mulf %5, %6 : vector<1x8x128xf32>
    %8 = arith.addf %3, %7 : vector<1x8x128xf32>
    %cst_6 = arith.constant 1.000000e+00 : f32
    %9 = vector.broadcast %cst_6 : f32 to vector<1x8x128xf32>
    %10 = arith.cmpf oge, %8, %9 : vector<1x8x128xf32>
    %11 = arith.extui %10 : vector<1x8x128xi1> to vector<1x8x128xi32>
    %12 = arith.sitofp %11 : vector<1x8x128xi32> to vector<1x8x128xf32>
    %c0_7 = arith.constant 0 : index
    %c0_8 = arith.constant 0 : index
    %c0_9 = arith.constant 0 : index
    %13 = vector.load %arg3[%c0_7, %c0_8, %c0_9] : memref<1x8x128xf32, #tpu.memory_space<vmem>>, vector<1x8x128xf32>
    tpu.vector_store %arg3[%c0_7, %c0_8, %c0_9], %12 {strides = array<i32>} : memref<1x8x128xf32, #tpu.memory_space<vmem>>, vector<1x8x128xf32>,
    %cst_10 = arith.constant 1.000000e+00 : f32
    %14 = vector.broadcast %cst_10 : f32 to vector<1x8x128xf32>
    %15 = arith.subf %14, %12 : vector<1x8x128xf32>
    %16 = arith.mulf %8, %15 : vector<1x8x128xf32>
    %c0_11 = arith.constant 0 : index
    %c0_12 = arith.constant 0 : index
    %c0_13 = arith.constant 0 : index
    %17 = vector.load %arg4[%c0_11, %c0_12, %c0_13] : memref<1x8x128xf32, #tpu.memory_space<vmem>>, vector<1x8x128xf32>
    tpu.vector_store %arg4[%c0_11, %c0_12, %c0_13], %16 {strides = array<i32>} : memref<1x8x128xf32, #tpu.memory_space<vmem>>, vector<1x8x128xf32>,
    return
  }
  func.func @transform_0(%arg0: i32, %arg1: i32) -> (i32, i32, i32) {
    %c0_i32 = arith.constant 0 : i32
    %c0_i32_0 = arith.constant 0 : i32
    return %arg1, %arg0, %c0_i32 : i32, i32, i32
  }
  func.func @transform_1(%arg0: i32, %arg1: i32) -> (i32, i32, i32) {
    %c0_i32 = arith.constant 0 : i32
    %c0_i32_0 = arith.constant 0 : i32
    return %arg1, %arg0, %c0_i32 : i32, i32, i32
  }
}

module attributes {stable_mosaic.version = 11 : i64} {
  func.func @_gemm_bias_kernel(%arg0: i32, %arg1: i32, %arg2: memref<96x4xf32, #tpu.memory_space<vmem>>, %arg3: memref<4x4xbf16, #tpu.memory_space<vmem>>, %arg4: memref<1x4xf32, #tpu.memory_space<vmem>>, %arg5: memref<96x4xf32, #tpu.memory_space<vmem>>) attributes {dimension_semantics = [#tpu.dimension_semantics<parallel>, #tpu.dimension_semantics<parallel>], iteration_bounds = array<i64: 1, 1>, scalar_prefetch = 0 : i64, scratch_operands = 0 : i64, tpu.core_type = #tpu.core_type<tc>, window_params = [{transform_indices = @transform_0, window_bounds = array<i64: 96, 4>}, {transform_indices = @transform_1, window_bounds = array<i64: 4, 4>}, {transform_indices = @transform_2, window_bounds = array<i64: 1, 4>}, {transform_indices = @transform_3, window_bounds = array<i64: 96, 4>}]} {
    %c0 = arith.constant 0 : index
    %c0_0 = arith.constant 0 : index
    %0 = vector.load %arg2[%c0, %c0_0] : memref<96x4xf32, #tpu.memory_space<vmem>>, vector<96x4xf32>
    %1 = arith.truncf %0 : vector<96x4xf32> to vector<96x4xbf16>
    %c0_1 = arith.constant 0 : index
    %c0_2 = arith.constant 0 : index
    %2 = vector.load %arg3[%c0_1, %c0_2] : memref<4x4xbf16, #tpu.memory_space<vmem>>, vector<4x4xbf16>
    %cst = arith.constant dense<0.000000e+00> : vector<96x4xf32>
    %3 = tpu.matmul %1, %2, %cst {dimension_numbers = #tpu.dot_dimension_numbers<[1], [0], [0], [1], [0, 0, 1, 1], [], []>} : vector<96x4xbf16>, vector<4x4xbf16>, vector<96x4xf32> -> vector<96x4xf32>
    %c0_3 = arith.constant 0 : index
    %c0_4 = arith.constant 0 : index
    %4 = vector.load %arg4[%c0_3, %c0_4] : memref<1x4xf32, #tpu.memory_space<vmem>>, vector<1x4xf32>
    %5 = vector.broadcast %4 : vector<1x4xf32> to vector<96x4xf32>
    %6 = arith.addf %3, %5 : vector<96x4xf32>
    %c0_5 = arith.constant 0 : index
    %c0_6 = arith.constant 0 : index
    %7 = vector.load %arg5[%c0_5, %c0_6] : memref<96x4xf32, #tpu.memory_space<vmem>>, vector<96x4xf32>
    tpu.vector_store %arg5[%c0_5, %c0_6], %6 {strides = array<i32>} : memref<96x4xf32, #tpu.memory_space<vmem>>, vector<96x4xf32>,
    return
  }
  func.func @transform_0(%arg0: i32, %arg1: i32) -> (i32, i32) {
    %c0_i32 = arith.constant 0 : i32
    %c0_i32_0 = arith.constant 0 : i32
    return %arg0, %c0_i32 : i32, i32
  }
  func.func @transform_1(%arg0: i32, %arg1: i32) -> (i32, i32) {
    %c0_i32 = arith.constant 0 : i32
    %c0_i32_0 = arith.constant 0 : i32
    return %c0_i32, %arg1 : i32, i32
  }
  func.func @transform_2(%arg0: i32, %arg1: i32) -> (i32, i32) {
    %c0_i32 = arith.constant 0 : i32
    %c0_i32_0 = arith.constant 0 : i32
    return %c0_i32, %arg1 : i32, i32
  }
  func.func @transform_3(%arg0: i32, %arg1: i32) -> (i32, i32) {
    %c0_i32 = arith.constant 0 : i32
    return %arg0, %arg1 : i32, i32
  }
}

module attributes {stable_mosaic.version = 11 : i64} {
  func.func @_gemm_bias_kernel(%arg0: i32, %arg1: i32, %arg2: memref<64x18xf32, #tpu.memory_space<vmem>>, %arg3: memref<18x6xbf16, #tpu.memory_space<vmem>>, %arg4: memref<1x6xf32, #tpu.memory_space<vmem>>, %arg5: memref<64x6xf32, #tpu.memory_space<vmem>>) attributes {dimension_semantics = [#tpu.dimension_semantics<parallel>, #tpu.dimension_semantics<parallel>], iteration_bounds = array<i64: 1, 1>, scalar_prefetch = 0 : i64, scratch_operands = 0 : i64, tpu.core_type = #tpu.core_type<tc>, window_params = [{transform_indices = @transform_0, window_bounds = array<i64: 64, 18>}, {transform_indices = @transform_1, window_bounds = array<i64: 18, 6>}, {transform_indices = @transform_2, window_bounds = array<i64: 1, 6>}, {transform_indices = @transform_3, window_bounds = array<i64: 64, 6>}]} {
    %c0 = arith.constant 0 : index
    %c0_0 = arith.constant 0 : index
    %0 = vector.load %arg2[%c0, %c0_0] : memref<64x18xf32, #tpu.memory_space<vmem>>, vector<64x18xf32>
    %1 = arith.truncf %0 : vector<64x18xf32> to vector<64x18xbf16>
    %c0_1 = arith.constant 0 : index
    %c0_2 = arith.constant 0 : index
    %2 = vector.load %arg3[%c0_1, %c0_2] : memref<18x6xbf16, #tpu.memory_space<vmem>>, vector<18x6xbf16>
    %cst = arith.constant dense<0.000000e+00> : vector<64x6xf32>
    %3 = tpu.matmul %1, %2, %cst {dimension_numbers = #tpu.dot_dimension_numbers<[1], [0], [0], [1], [0, 0, 1, 1], [], []>} : vector<64x18xbf16>, vector<18x6xbf16>, vector<64x6xf32> -> vector<64x6xf32>
    %c0_3 = arith.constant 0 : index
    %c0_4 = arith.constant 0 : index
    %4 = vector.load %arg4[%c0_3, %c0_4] : memref<1x6xf32, #tpu.memory_space<vmem>>, vector<1x6xf32>
    %5 = vector.broadcast %4 : vector<1x6xf32> to vector<64x6xf32>
    %6 = arith.addf %3, %5 : vector<64x6xf32>
    %c0_5 = arith.constant 0 : index
    %c0_6 = arith.constant 0 : index
    %7 = vector.load %arg5[%c0_5, %c0_6] : memref<64x6xf32, #tpu.memory_space<vmem>>, vector<64x6xf32>
    tpu.vector_store %arg5[%c0_5, %c0_6], %6 {strides = array<i32>} : memref<64x6xf32, #tpu.memory_space<vmem>>, vector<64x6xf32>,
    return
  }
  func.func @transform_0(%arg0: i32, %arg1: i32) -> (i32, i32) {
    %c0_i32 = arith.constant 0 : i32
    %c0_i32_0 = arith.constant 0 : i32
    return %arg0, %c0_i32 : i32, i32
  }
  func.func @transform_1(%arg0: i32, %arg1: i32) -> (i32, i32) {
    %c0_i32 = arith.constant 0 : i32
    %c0_i32_0 = arith.constant 0 : i32
    return %c0_i32, %arg1 : i32, i32
  }
  func.func @transform_2(%arg0: i32, %arg1: i32) -> (i32, i32) {
    %c0_i32 = arith.constant 0 : i32
    %c0_i32_0 = arith.constant 0 : i32
    return %c0_i32, %arg1 : i32, i32
  }
  func.func @transform_3(%arg0: i32, %arg1: i32) -> (i32, i32) {
    %c0_i32 = arith.constant 0 : i32
    return %arg0, %arg1 : i32, i32
  }
}

module attributes {stable_mosaic.version = 11 : i64} {
  func.func @_gemm_bias_affine_kernel(%arg0: i32, %arg1: i32, %arg2: memref<64x6xf32, #tpu.memory_space<vmem>>, %arg3: memref<6x18xbf16, #tpu.memory_space<vmem>>, %arg4: memref<1x18xf32, #tpu.memory_space<vmem>>, %arg5: memref<64x1xf32, #tpu.memory_space<vmem>>, %arg6: memref<64x1xf32, #tpu.memory_space<vmem>>, %arg7: memref<64x18xf32, #tpu.memory_space<vmem>>) attributes {dimension_semantics = [#tpu.dimension_semantics<parallel>, #tpu.dimension_semantics<parallel>], iteration_bounds = array<i64: 1, 1>, scalar_prefetch = 0 : i64, scratch_operands = 0 : i64, tpu.core_type = #tpu.core_type<tc>, window_params = [{transform_indices = @transform_0, window_bounds = array<i64: 64, 6>}, {transform_indices = @transform_1, window_bounds = array<i64: 6, 18>}, {transform_indices = @transform_2, window_bounds = array<i64: 1, 18>}, {transform_indices = @transform_3, window_bounds = array<i64: 64, 1>}, {transform_indices = @transform_4, window_bounds = array<i64: 64, 1>}, {transform_indices = @transform_5, window_bounds = array<i64: 64, 18>}]} {
    %c0 = arith.constant 0 : index
    %c0_0 = arith.constant 0 : index
    %0 = vector.load %arg2[%c0, %c0_0] : memref<64x6xf32, #tpu.memory_space<vmem>>, vector<64x6xf32>
    %1 = arith.truncf %0 : vector<64x6xf32> to vector<64x6xbf16>
    %c0_1 = arith.constant 0 : index
    %c0_2 = arith.constant 0 : index
    %2 = vector.load %arg3[%c0_1, %c0_2] : memref<6x18xbf16, #tpu.memory_space<vmem>>, vector<6x18xbf16>
    %cst = arith.constant dense<0.000000e+00> : vector<64x18xf32>
    %3 = tpu.matmul %1, %2, %cst {dimension_numbers = #tpu.dot_dimension_numbers<[1], [0], [0], [1], [0, 0, 1, 1], [], []>} : vector<64x6xbf16>, vector<6x18xbf16>, vector<64x18xf32> -> vector<64x18xf32>
    %c0_3 = arith.constant 0 : index
    %c0_4 = arith.constant 0 : index
    %4 = vector.load %arg4[%c0_3, %c0_4] : memref<1x18xf32, #tpu.memory_space<vmem>>, vector<1x18xf32>
    %5 = vector.broadcast %4 : vector<1x18xf32> to vector<64x18xf32>
    %6 = arith.addf %3, %5 : vector<64x18xf32>
    %c0_5 = arith.constant 0 : index
    %c0_6 = arith.constant 0 : index
    %7 = vector.load %arg5[%c0_5, %c0_6] : memref<64x1xf32, #tpu.memory_space<vmem>>, vector<64x1xf32>
    %8 = vector.broadcast %7 : vector<64x1xf32> to vector<64x18xf32>
    %9 = arith.mulf %6, %8 : vector<64x18xf32>
    %c0_7 = arith.constant 0 : index
    %c0_8 = arith.constant 0 : index
    %10 = vector.load %arg6[%c0_7, %c0_8] : memref<64x1xf32, #tpu.memory_space<vmem>>, vector<64x1xf32>
    %11 = vector.broadcast %10 : vector<64x1xf32> to vector<64x18xf32>
    %12 = arith.addf %9, %11 : vector<64x18xf32>
    %c0_9 = arith.constant 0 : index
    %c0_10 = arith.constant 0 : index
    %13 = vector.load %arg7[%c0_9, %c0_10] : memref<64x18xf32, #tpu.memory_space<vmem>>, vector<64x18xf32>
    tpu.vector_store %arg7[%c0_9, %c0_10], %12 {strides = array<i32>} : memref<64x18xf32, #tpu.memory_space<vmem>>, vector<64x18xf32>,
    return
  }
  func.func @transform_0(%arg0: i32, %arg1: i32) -> (i32, i32) {
    %c0_i32 = arith.constant 0 : i32
    %c0_i32_0 = arith.constant 0 : i32
    return %arg0, %c0_i32 : i32, i32
  }
  func.func @transform_1(%arg0: i32, %arg1: i32) -> (i32, i32) {
    %c0_i32 = arith.constant 0 : i32
    %c0_i32_0 = arith.constant 0 : i32
    return %c0_i32, %arg1 : i32, i32
  }
  func.func @transform_2(%arg0: i32, %arg1: i32) -> (i32, i32) {
    %c0_i32 = arith.constant 0 : i32
    %c0_i32_0 = arith.constant 0 : i32
    return %c0_i32, %arg1 : i32, i32
  }
  func.func @transform_3(%arg0: i32, %arg1: i32) -> (i32, i32) {
    %c0_i32 = arith.constant 0 : i32
    %c0_i32_0 = arith.constant 0 : i32
    return %arg0, %c0_i32 : i32, i32
  }
  func.func @transform_4(%arg0: i32, %arg1: i32) -> (i32, i32) {
    %c0_i32 = arith.constant 0 : i32
    %c0_i32_0 = arith.constant 0 : i32
    return %arg0, %c0_i32 : i32, i32
  }
  func.func @transform_5(%arg0: i32, %arg1: i32) -> (i32, i32) {
    %c0_i32 = arith.constant 0 : i32
    return %arg0, %arg1 : i32, i32
  }
}

module attributes {stable_mosaic.version = 11 : i64} {
  func.func @_gemm_bias_affine_kernel(%arg0: i32, %arg1: i32, %arg2: memref<64x18xf32, #tpu.memory_space<vmem>>, %arg3: memref<18x6xbf16, #tpu.memory_space<vmem>>, %arg4: memref<1x6xf32, #tpu.memory_space<vmem>>, %arg5: memref<64x1xf32, #tpu.memory_space<vmem>>, %arg6: memref<64x1xf32, #tpu.memory_space<vmem>>, %arg7: memref<64x6xf32, #tpu.memory_space<vmem>>) attributes {dimension_semantics = [#tpu.dimension_semantics<parallel>, #tpu.dimension_semantics<parallel>], iteration_bounds = array<i64: 1, 1>, scalar_prefetch = 0 : i64, scratch_operands = 0 : i64, tpu.core_type = #tpu.core_type<tc>, window_params = [{transform_indices = @transform_0, window_bounds = array<i64: 64, 18>}, {transform_indices = @transform_1, window_bounds = array<i64: 18, 6>}, {transform_indices = @transform_2, window_bounds = array<i64: 1, 6>}, {transform_indices = @transform_3, window_bounds = array<i64: 64, 1>}, {transform_indices = @transform_4, window_bounds = array<i64: 64, 1>}, {transform_indices = @transform_5, window_bounds = array<i64: 64, 6>}]} {
    %c0 = arith.constant 0 : index
    %c0_0 = arith.constant 0 : index
    %0 = vector.load %arg2[%c0, %c0_0] : memref<64x18xf32, #tpu.memory_space<vmem>>, vector<64x18xf32>
    %1 = arith.truncf %0 : vector<64x18xf32> to vector<64x18xbf16>
    %c0_1 = arith.constant 0 : index
    %c0_2 = arith.constant 0 : index
    %2 = vector.load %arg3[%c0_1, %c0_2] : memref<18x6xbf16, #tpu.memory_space<vmem>>, vector<18x6xbf16>
    %cst = arith.constant dense<0.000000e+00> : vector<64x6xf32>
    %3 = tpu.matmul %1, %2, %cst {dimension_numbers = #tpu.dot_dimension_numbers<[1], [0], [0], [1], [0, 0, 1, 1], [], []>} : vector<64x18xbf16>, vector<18x6xbf16>, vector<64x6xf32> -> vector<64x6xf32>
    %c0_3 = arith.constant 0 : index
    %c0_4 = arith.constant 0 : index
    %4 = vector.load %arg4[%c0_3, %c0_4] : memref<1x6xf32, #tpu.memory_space<vmem>>, vector<1x6xf32>
    %5 = vector.broadcast %4 : vector<1x6xf32> to vector<64x6xf32>
    %6 = arith.addf %3, %5 : vector<64x6xf32>
    %c0_5 = arith.constant 0 : index
    %c0_6 = arith.constant 0 : index
    %7 = vector.load %arg5[%c0_5, %c0_6] : memref<64x1xf32, #tpu.memory_space<vmem>>, vector<64x1xf32>
    %8 = vector.broadcast %7 : vector<64x1xf32> to vector<64x6xf32>
    %9 = arith.mulf %6, %8 : vector<64x6xf32>
    %c0_7 = arith.constant 0 : index
    %c0_8 = arith.constant 0 : index
    %10 = vector.load %arg6[%c0_7, %c0_8] : memref<64x1xf32, #tpu.memory_space<vmem>>, vector<64x1xf32>
    %11 = vector.broadcast %10 : vector<64x1xf32> to vector<64x6xf32>
    %12 = arith.addf %9, %11 : vector<64x6xf32>
    %c0_9 = arith.constant 0 : index
    %c0_10 = arith.constant 0 : index
    %13 = vector.load %arg7[%c0_9, %c0_10] : memref<64x6xf32, #tpu.memory_space<vmem>>, vector<64x6xf32>
    tpu.vector_store %arg7[%c0_9, %c0_10], %12 {strides = array<i32>} : memref<64x6xf32, #tpu.memory_space<vmem>>, vector<64x6xf32>,
    return
  }
  func.func @transform_0(%arg0: i32, %arg1: i32) -> (i32, i32) {
    %c0_i32 = arith.constant 0 : i32
    %c0_i32_0 = arith.constant 0 : i32
    return %arg0, %c0_i32 : i32, i32
  }
  func.func @transform_1(%arg0: i32, %arg1: i32) -> (i32, i32) {
    %c0_i32 = arith.constant 0 : i32
    %c0_i32_0 = arith.constant 0 : i32
    return %c0_i32, %arg1 : i32, i32
  }
  func.func @transform_2(%arg0: i32, %arg1: i32) -> (i32, i32) {
    %c0_i32 = arith.constant 0 : i32
    %c0_i32_0 = arith.constant 0 : i32
    return %c0_i32, %arg1 : i32, i32
  }
  func.func @transform_3(%arg0: i32, %arg1: i32) -> (i32, i32) {
    %c0_i32 = arith.constant 0 : i32
    %c0_i32_0 = arith.constant 0 : i32
    return %arg0, %c0_i32 : i32, i32
  }
  func.func @transform_4(%arg0: i32, %arg1: i32) -> (i32, i32) {
    %c0_i32 = arith.constant 0 : i32
    %c0_i32_0 = arith.constant 0 : i32
    return %arg0, %c0_i32 : i32, i32
  }
  func.func @transform_5(%arg0: i32, %arg1: i32) -> (i32, i32) {
    %c0_i32 = arith.constant 0 : i32
    return %arg0, %arg1 : i32, i32
  }
}

module attributes {stable_mosaic.version = 11 : i64} {
  func.func @_gemm_bias_kernel(%arg0: i32, %arg1: i32, %arg2: memref<16x54xf32, #tpu.memory_space<vmem>>, %arg3: memref<54x4xbf16, #tpu.memory_space<vmem>>, %arg4: memref<1x4xf32, #tpu.memory_space<vmem>>, %arg5: memref<16x4xf32, #tpu.memory_space<vmem>>) attributes {dimension_semantics = [#tpu.dimension_semantics<parallel>, #tpu.dimension_semantics<parallel>], iteration_bounds = array<i64: 1, 1>, scalar_prefetch = 0 : i64, scratch_operands = 0 : i64, tpu.core_type = #tpu.core_type<tc>, window_params = [{transform_indices = @transform_0, window_bounds = array<i64: 16, 54>}, {transform_indices = @transform_1, window_bounds = array<i64: 54, 4>}, {transform_indices = @transform_2, window_bounds = array<i64: 1, 4>}, {transform_indices = @transform_3, window_bounds = array<i64: 16, 4>}]} {
    %c0 = arith.constant 0 : index
    %c0_0 = arith.constant 0 : index
    %0 = vector.load %arg2[%c0, %c0_0] : memref<16x54xf32, #tpu.memory_space<vmem>>, vector<16x54xf32>
    %1 = arith.truncf %0 : vector<16x54xf32> to vector<16x54xbf16>
    %c0_1 = arith.constant 0 : index
    %c0_2 = arith.constant 0 : index
    %2 = vector.load %arg3[%c0_1, %c0_2] : memref<54x4xbf16, #tpu.memory_space<vmem>>, vector<54x4xbf16>
    %cst = arith.constant dense<0.000000e+00> : vector<16x4xf32>
    %3 = tpu.matmul %1, %2, %cst {dimension_numbers = #tpu.dot_dimension_numbers<[1], [0], [0], [1], [0, 0, 1, 1], [], []>} : vector<16x54xbf16>, vector<54x4xbf16>, vector<16x4xf32> -> vector<16x4xf32>
    %c0_3 = arith.constant 0 : index
    %c0_4 = arith.constant 0 : index
    %4 = vector.load %arg4[%c0_3, %c0_4] : memref<1x4xf32, #tpu.memory_space<vmem>>, vector<1x4xf32>
    %5 = vector.broadcast %4 : vector<1x4xf32> to vector<16x4xf32>
    %6 = arith.addf %3, %5 : vector<16x4xf32>
    %c0_5 = arith.constant 0 : index
    %c0_6 = arith.constant 0 : index
    %7 = vector.load %arg5[%c0_5, %c0_6] : memref<16x4xf32, #tpu.memory_space<vmem>>, vector<16x4xf32>
    tpu.vector_store %arg5[%c0_5, %c0_6], %6 {strides = array<i32>} : memref<16x4xf32, #tpu.memory_space<vmem>>, vector<16x4xf32>,
    return
  }
  func.func @transform_0(%arg0: i32, %arg1: i32) -> (i32, i32) {
    %c0_i32 = arith.constant 0 : i32
    %c0_i32_0 = arith.constant 0 : i32
    return %arg0, %c0_i32 : i32, i32
  }
  func.func @transform_1(%arg0: i32, %arg1: i32) -> (i32, i32) {
    %c0_i32 = arith.constant 0 : i32
    %c0_i32_0 = arith.constant 0 : i32
    return %c0_i32, %arg1 : i32, i32
  }
  func.func @transform_2(%arg0: i32, %arg1: i32) -> (i32, i32) {
    %c0_i32 = arith.constant 0 : i32
    %c0_i32_0 = arith.constant 0 : i32
    return %c0_i32, %arg1 : i32, i32
  }
  func.func @transform_3(%arg0: i32, %arg1: i32) -> (i32, i32) {
    %c0_i32 = arith.constant 0 : i32
    return %arg0, %arg1 : i32, i32
  }
}

module attributes {stable_mosaic.version = 11 : i64} {
  func.func @_gemm_bias_kernel(%arg0: i32, %arg1: i32, %arg2: memref<16x36xf32, #tpu.memory_space<vmem>>, %arg3: memref<36x4xbf16, #tpu.memory_space<vmem>>, %arg4: memref<1x4xf32, #tpu.memory_space<vmem>>, %arg5: memref<16x4xf32, #tpu.memory_space<vmem>>) attributes {dimension_semantics = [#tpu.dimension_semantics<parallel>, #tpu.dimension_semantics<parallel>], iteration_bounds = array<i64: 1, 1>, scalar_prefetch = 0 : i64, scratch_operands = 0 : i64, tpu.core_type = #tpu.core_type<tc>, window_params = [{transform_indices = @transform_0, window_bounds = array<i64: 16, 36>}, {transform_indices = @transform_1, window_bounds = array<i64: 36, 4>}, {transform_indices = @transform_2, window_bounds = array<i64: 1, 4>}, {transform_indices = @transform_3, window_bounds = array<i64: 16, 4>}]} {
    %c0 = arith.constant 0 : index
    %c0_0 = arith.constant 0 : index
    %0 = vector.load %arg2[%c0, %c0_0] : memref<16x36xf32, #tpu.memory_space<vmem>>, vector<16x36xf32>
    %1 = arith.truncf %0 : vector<16x36xf32> to vector<16x36xbf16>
    %c0_1 = arith.constant 0 : index
    %c0_2 = arith.constant 0 : index
    %2 = vector.load %arg3[%c0_1, %c0_2] : memref<36x4xbf16, #tpu.memory_space<vmem>>, vector<36x4xbf16>
    %cst = arith.constant dense<0.000000e+00> : vector<16x4xf32>
    %3 = tpu.matmul %1, %2, %cst {dimension_numbers = #tpu.dot_dimension_numbers<[1], [0], [0], [1], [0, 0, 1, 1], [], []>} : vector<16x36xbf16>, vector<36x4xbf16>, vector<16x4xf32> -> vector<16x4xf32>
    %c0_3 = arith.constant 0 : index
    %c0_4 = arith.constant 0 : index
    %4 = vector.load %arg4[%c0_3, %c0_4] : memref<1x4xf32, #tpu.memory_space<vmem>>, vector<1x4xf32>
    %5 = vector.broadcast %4 : vector<1x4xf32> to vector<16x4xf32>
    %6 = arith.addf %3, %5 : vector<16x4xf32>
    %c0_5 = arith.constant 0 : index
    %c0_6 = arith.constant 0 : index
    %7 = vector.load %arg5[%c0_5, %c0_6] : memref<16x4xf32, #tpu.memory_space<vmem>>, vector<16x4xf32>
    tpu.vector_store %arg5[%c0_5, %c0_6], %6 {strides = array<i32>} : memref<16x4xf32, #tpu.memory_space<vmem>>, vector<16x4xf32>,
    return
  }
  func.func @transform_0(%arg0: i32, %arg1: i32) -> (i32, i32) {
    %c0_i32 = arith.constant 0 : i32
    %c0_i32_0 = arith.constant 0 : i32
    return %arg0, %c0_i32 : i32, i32
  }
  func.func @transform_1(%arg0: i32, %arg1: i32) -> (i32, i32) {
    %c0_i32 = arith.constant 0 : i32
    %c0_i32_0 = arith.constant 0 : i32
    return %c0_i32, %arg1 : i32, i32
  }
  func.func @transform_2(%arg0: i32, %arg1: i32) -> (i32, i32) {
    %c0_i32 = arith.constant 0 : i32
    %c0_i32_0 = arith.constant 0 : i32
    return %c0_i32, %arg1 : i32, i32
  }
  func.func @transform_3(%arg0: i32, %arg1: i32) -> (i32, i32) {
    %c0_i32 = arith.constant 0 : i32
    return %arg0, %arg1 : i32, i32
  }
}

module attributes {stable_mosaic.version = 11 : i64} {
  func.func @_gemm_bias_kernel(%arg0: i32, %arg1: i32, %arg2: memref<96x2xf32, #tpu.memory_space<vmem>>, %arg3: memref<2x2xbf16, #tpu.memory_space<vmem>>, %arg4: memref<1x2xf32, #tpu.memory_space<vmem>>, %arg5: memref<96x2xf32, #tpu.memory_space<vmem>>) attributes {dimension_semantics = [#tpu.dimension_semantics<parallel>, #tpu.dimension_semantics<parallel>], iteration_bounds = array<i64: 1, 1>, scalar_prefetch = 0 : i64, scratch_operands = 0 : i64, tpu.core_type = #tpu.core_type<tc>, window_params = [{transform_indices = @transform_0, window_bounds = array<i64: 96, 2>}, {transform_indices = @transform_1, window_bounds = array<i64: 2, 2>}, {transform_indices = @transform_2, window_bounds = array<i64: 1, 2>}, {transform_indices = @transform_3, window_bounds = array<i64: 96, 2>}]} {
    %c0 = arith.constant 0 : index
    %c0_0 = arith.constant 0 : index
    %0 = vector.load %arg2[%c0, %c0_0] : memref<96x2xf32, #tpu.memory_space<vmem>>, vector<96x2xf32>
    %1 = arith.truncf %0 : vector<96x2xf32> to vector<96x2xbf16>
    %c0_1 = arith.constant 0 : index
    %c0_2 = arith.constant 0 : index
    %2 = vector.load %arg3[%c0_1, %c0_2] : memref<2x2xbf16, #tpu.memory_space<vmem>>, vector<2x2xbf16>
    %cst = arith.constant dense<0.000000e+00> : vector<96x2xf32>
    %3 = tpu.matmul %1, %2, %cst {dimension_numbers = #tpu.dot_dimension_numbers<[1], [0], [0], [1], [0, 0, 1, 1], [], []>} : vector<96x2xbf16>, vector<2x2xbf16>, vector<96x2xf32> -> vector<96x2xf32>
    %c0_3 = arith.constant 0 : index
    %c0_4 = arith.constant 0 : index
    %4 = vector.load %arg4[%c0_3, %c0_4] : memref<1x2xf32, #tpu.memory_space<vmem>>, vector<1x2xf32>
    %5 = vector.broadcast %4 : vector<1x2xf32> to vector<96x2xf32>
    %6 = arith.addf %3, %5 : vector<96x2xf32>
    %c0_5 = arith.constant 0 : index
    %c0_6 = arith.constant 0 : index
    %7 = vector.load %arg5[%c0_5, %c0_6] : memref<96x2xf32, #tpu.memory_space<vmem>>, vector<96x2xf32>
    tpu.vector_store %arg5[%c0_5, %c0_6], %6 {strides = array<i32>} : memref<96x2xf32, #tpu.memory_space<vmem>>, vector<96x2xf32>,
    return
  }
  func.func @transform_0(%arg0: i32, %arg1: i32) -> (i32, i32) {
    %c0_i32 = arith.constant 0 : i32
    %c0_i32_0 = arith.constant 0 : i32
    return %arg0, %c0_i32 : i32, i32
  }
  func.func @transform_1(%arg0: i32, %arg1: i32) -> (i32, i32) {
    %c0_i32 = arith.constant 0 : i32
    %c0_i32_0 = arith.constant 0 : i32
    return %c0_i32, %arg1 : i32, i32
  }
  func.func @transform_2(%arg0: i32, %arg1: i32) -> (i32, i32) {
    %c0_i32 = arith.constant 0 : i32
    %c0_i32_0 = arith.constant 0 : i32
    return %c0_i32, %arg1 : i32, i32
  }
  func.func @transform_3(%arg0: i32, %arg1: i32) -> (i32, i32) {
    %c0_i32 = arith.constant 0 : i32
    return %arg0, %arg1 : i32, i32
  }
}

module attributes {stable_mosaic.version = 11 : i64} {
  func.func @_gemm_bias_affine_kernel(%arg0: i32, %arg1: i32, %arg2: memref<16x12xf32, #tpu.memory_space<vmem>>, %arg3: memref<12x36xbf16, #tpu.memory_space<vmem>>, %arg4: memref<1x36xf32, #tpu.memory_space<vmem>>, %arg5: memref<16x1xf32, #tpu.memory_space<vmem>>, %arg6: memref<16x1xf32, #tpu.memory_space<vmem>>, %arg7: memref<16x36xf32, #tpu.memory_space<vmem>>) attributes {dimension_semantics = [#tpu.dimension_semantics<parallel>, #tpu.dimension_semantics<parallel>], iteration_bounds = array<i64: 1, 1>, scalar_prefetch = 0 : i64, scratch_operands = 0 : i64, tpu.core_type = #tpu.core_type<tc>, window_params = [{transform_indices = @transform_0, window_bounds = array<i64: 16, 12>}, {transform_indices = @transform_1, window_bounds = array<i64: 12, 36>}, {transform_indices = @transform_2, window_bounds = array<i64: 1, 36>}, {transform_indices = @transform_3, window_bounds = array<i64: 16, 1>}, {transform_indices = @transform_4, window_bounds = array<i64: 16, 1>}, {transform_indices = @transform_5, window_bounds = array<i64: 16, 36>}]} {
    %c0 = arith.constant 0 : index
    %c0_0 = arith.constant 0 : index
    %0 = vector.load %arg2[%c0, %c0_0] : memref<16x12xf32, #tpu.memory_space<vmem>>, vector<16x12xf32>
    %1 = arith.truncf %0 : vector<16x12xf32> to vector<16x12xbf16>
    %c0_1 = arith.constant 0 : index
    %c0_2 = arith.constant 0 : index
    %2 = vector.load %arg3[%c0_1, %c0_2] : memref<12x36xbf16, #tpu.memory_space<vmem>>, vector<12x36xbf16>
    %cst = arith.constant dense<0.000000e+00> : vector<16x36xf32>
    %3 = tpu.matmul %1, %2, %cst {dimension_numbers = #tpu.dot_dimension_numbers<[1], [0], [0], [1], [0, 0, 1, 1], [], []>} : vector<16x12xbf16>, vector<12x36xbf16>, vector<16x36xf32> -> vector<16x36xf32>
    %c0_3 = arith.constant 0 : index
    %c0_4 = arith.constant 0 : index
    %4 = vector.load %arg4[%c0_3, %c0_4] : memref<1x36xf32, #tpu.memory_space<vmem>>, vector<1x36xf32>
    %5 = vector.broadcast %4 : vector<1x36xf32> to vector<16x36xf32>
    %6 = arith.addf %3, %5 : vector<16x36xf32>
    %c0_5 = arith.constant 0 : index
    %c0_6 = arith.constant 0 : index
    %7 = vector.load %arg5[%c0_5, %c0_6] : memref<16x1xf32, #tpu.memory_space<vmem>>, vector<16x1xf32>
    %8 = vector.broadcast %7 : vector<16x1xf32> to vector<16x36xf32>
    %9 = arith.mulf %6, %8 : vector<16x36xf32>
    %c0_7 = arith.constant 0 : index
    %c0_8 = arith.constant 0 : index
    %10 = vector.load %arg6[%c0_7, %c0_8] : memref<16x1xf32, #tpu.memory_space<vmem>>, vector<16x1xf32>
    %11 = vector.broadcast %10 : vector<16x1xf32> to vector<16x36xf32>
    %12 = arith.addf %9, %11 : vector<16x36xf32>
    %c0_9 = arith.constant 0 : index
    %c0_10 = arith.constant 0 : index
    %13 = vector.load %arg7[%c0_9, %c0_10] : memref<16x36xf32, #tpu.memory_space<vmem>>, vector<16x36xf32>
    tpu.vector_store %arg7[%c0_9, %c0_10], %12 {strides = array<i32>} : memref<16x36xf32, #tpu.memory_space<vmem>>, vector<16x36xf32>,
    return
  }
  func.func @transform_0(%arg0: i32, %arg1: i32) -> (i32, i32) {
    %c0_i32 = arith.constant 0 : i32
    %c0_i32_0 = arith.constant 0 : i32
    return %arg0, %c0_i32 : i32, i32
  }
  func.func @transform_1(%arg0: i32, %arg1: i32) -> (i32, i32) {
    %c0_i32 = arith.constant 0 : i32
    %c0_i32_0 = arith.constant 0 : i32
    return %c0_i32, %arg1 : i32, i32
  }
  func.func @transform_2(%arg0: i32, %arg1: i32) -> (i32, i32) {
    %c0_i32 = arith.constant 0 : i32
    %c0_i32_0 = arith.constant 0 : i32
    return %c0_i32, %arg1 : i32, i32
  }
  func.func @transform_3(%arg0: i32, %arg1: i32) -> (i32, i32) {
    %c0_i32 = arith.constant 0 : i32
    %c0_i32_0 = arith.constant 0 : i32
    return %arg0, %c0_i32 : i32, i32
  }
  func.func @transform_4(%arg0: i32, %arg1: i32) -> (i32, i32) {
    %c0_i32 = arith.constant 0 : i32
    %c0_i32_0 = arith.constant 0 : i32
    return %arg0, %c0_i32 : i32, i32
  }
  func.func @transform_5(%arg0: i32, %arg1: i32) -> (i32, i32) {
    %c0_i32 = arith.constant 0 : i32
    return %arg0, %arg1 : i32, i32
  }
}

module attributes {stable_mosaic.version = 11 : i64} {
  func.func @_gemm_bias_kernel(%arg0: i32, %arg1: i32, %arg2: memref<16x36xf32, #tpu.memory_space<vmem>>, %arg3: memref<36x12xbf16, #tpu.memory_space<vmem>>, %arg4: memref<1x12xf32, #tpu.memory_space<vmem>>, %arg5: memref<16x12xf32, #tpu.memory_space<vmem>>) attributes {dimension_semantics = [#tpu.dimension_semantics<parallel>, #tpu.dimension_semantics<parallel>], iteration_bounds = array<i64: 1, 1>, scalar_prefetch = 0 : i64, scratch_operands = 0 : i64, tpu.core_type = #tpu.core_type<tc>, window_params = [{transform_indices = @transform_0, window_bounds = array<i64: 16, 36>}, {transform_indices = @transform_1, window_bounds = array<i64: 36, 12>}, {transform_indices = @transform_2, window_bounds = array<i64: 1, 12>}, {transform_indices = @transform_3, window_bounds = array<i64: 16, 12>}]} {
    %c0 = arith.constant 0 : index
    %c0_0 = arith.constant 0 : index
    %0 = vector.load %arg2[%c0, %c0_0] : memref<16x36xf32, #tpu.memory_space<vmem>>, vector<16x36xf32>
    %1 = arith.truncf %0 : vector<16x36xf32> to vector<16x36xbf16>
    %c0_1 = arith.constant 0 : index
    %c0_2 = arith.constant 0 : index
    %2 = vector.load %arg3[%c0_1, %c0_2] : memref<36x12xbf16, #tpu.memory_space<vmem>>, vector<36x12xbf16>
    %cst = arith.constant dense<0.000000e+00> : vector<16x12xf32>
    %3 = tpu.matmul %1, %2, %cst {dimension_numbers = #tpu.dot_dimension_numbers<[1], [0], [0], [1], [0, 0, 1, 1], [], []>} : vector<16x36xbf16>, vector<36x12xbf16>, vector<16x12xf32> -> vector<16x12xf32>
    %c0_3 = arith.constant 0 : index
    %c0_4 = arith.constant 0 : index
    %4 = vector.load %arg4[%c0_3, %c0_4] : memref<1x12xf32, #tpu.memory_space<vmem>>, vector<1x12xf32>
    %5 = vector.broadcast %4 : vector<1x12xf32> to vector<16x12xf32>
    %6 = arith.addf %3, %5 : vector<16x12xf32>
    %c0_5 = arith.constant 0 : index
    %c0_6 = arith.constant 0 : index
    %7 = vector.load %arg5[%c0_5, %c0_6] : memref<16x12xf32, #tpu.memory_space<vmem>>, vector<16x12xf32>
    tpu.vector_store %arg5[%c0_5, %c0_6], %6 {strides = array<i32>} : memref<16x12xf32, #tpu.memory_space<vmem>>, vector<16x12xf32>,
    return
  }
  func.func @transform_0(%arg0: i32, %arg1: i32) -> (i32, i32) {
    %c0_i32 = arith.constant 0 : i32
    %c0_i32_0 = arith.constant 0 : i32
    return %arg0, %c0_i32 : i32, i32
  }
  func.func @transform_1(%arg0: i32, %arg1: i32) -> (i32, i32) {
    %c0_i32 = arith.constant 0 : i32
    %c0_i32_0 = arith.constant 0 : i32
    return %c0_i32, %arg1 : i32, i32
  }
  func.func @transform_2(%arg0: i32, %arg1: i32) -> (i32, i32) {
    %c0_i32 = arith.constant 0 : i32
    %c0_i32_0 = arith.constant 0 : i32
    return %c0_i32, %arg1 : i32, i32
  }
  func.func @transform_3(%arg0: i32, %arg1: i32) -> (i32, i32) {
    %c0_i32 = arith.constant 0 : i32
    return %arg0, %arg1 : i32, i32
  }
}

module attributes {stable_mosaic.version = 11 : i64} {
  func.func @_gemm_bias_affine_kernel(%arg0: i32, %arg1: i32, %arg2: memref<16x36xf32, #tpu.memory_space<vmem>>, %arg3: memref<36x12xbf16, #tpu.memory_space<vmem>>, %arg4: memref<1x12xf32, #tpu.memory_space<vmem>>, %arg5: memref<16x1xf32, #tpu.memory_space<vmem>>, %arg6: memref<16x1xf32, #tpu.memory_space<vmem>>, %arg7: memref<16x12xf32, #tpu.memory_space<vmem>>) attributes {dimension_semantics = [#tpu.dimension_semantics<parallel>, #tpu.dimension_semantics<parallel>], iteration_bounds = array<i64: 1, 1>, scalar_prefetch = 0 : i64, scratch_operands = 0 : i64, tpu.core_type = #tpu.core_type<tc>, window_params = [{transform_indices = @transform_0, window_bounds = array<i64: 16, 36>}, {transform_indices = @transform_1, window_bounds = array<i64: 36, 12>}, {transform_indices = @transform_2, window_bounds = array<i64: 1, 12>}, {transform_indices = @transform_3, window_bounds = array<i64: 16, 1>}, {transform_indices = @transform_4, window_bounds = array<i64: 16, 1>}, {transform_indices = @transform_5, window_bounds = array<i64: 16, 12>}]} {
    %c0 = arith.constant 0 : index
    %c0_0 = arith.constant 0 : index
    %0 = vector.load %arg2[%c0, %c0_0] : memref<16x36xf32, #tpu.memory_space<vmem>>, vector<16x36xf32>
    %1 = arith.truncf %0 : vector<16x36xf32> to vector<16x36xbf16>
    %c0_1 = arith.constant 0 : index
    %c0_2 = arith.constant 0 : index
    %2 = vector.load %arg3[%c0_1, %c0_2] : memref<36x12xbf16, #tpu.memory_space<vmem>>, vector<36x12xbf16>
    %cst = arith.constant dense<0.000000e+00> : vector<16x12xf32>
    %3 = tpu.matmul %1, %2, %cst {dimension_numbers = #tpu.dot_dimension_numbers<[1], [0], [0], [1], [0, 0, 1, 1], [], []>} : vector<16x36xbf16>, vector<36x12xbf16>, vector<16x12xf32> -> vector<16x12xf32>
    %c0_3 = arith.constant 0 : index
    %c0_4 = arith.constant 0 : index
    %4 = vector.load %arg4[%c0_3, %c0_4] : memref<1x12xf32, #tpu.memory_space<vmem>>, vector<1x12xf32>
    %5 = vector.broadcast %4 : vector<1x12xf32> to vector<16x12xf32>
    %6 = arith.addf %3, %5 : vector<16x12xf32>
    %c0_5 = arith.constant 0 : index
    %c0_6 = arith.constant 0 : index
    %7 = vector.load %arg5[%c0_5, %c0_6] : memref<16x1xf32, #tpu.memory_space<vmem>>, vector<16x1xf32>
    %8 = vector.broadcast %7 : vector<16x1xf32> to vector<16x12xf32>
    %9 = arith.mulf %6, %8 : vector<16x12xf32>
    %c0_7 = arith.constant 0 : index
    %c0_8 = arith.constant 0 : index
    %10 = vector.load %arg6[%c0_7, %c0_8] : memref<16x1xf32, #tpu.memory_space<vmem>>, vector<16x1xf32>
    %11 = vector.broadcast %10 : vector<16x1xf32> to vector<16x12xf32>
    %12 = arith.addf %9, %11 : vector<16x12xf32>
    %c0_9 = arith.constant 0 : index
    %c0_10 = arith.constant 0 : index
    %13 = vector.load %arg7[%c0_9, %c0_10] : memref<16x12xf32, #tpu.memory_space<vmem>>, vector<16x12xf32>
    tpu.vector_store %arg7[%c0_9, %c0_10], %12 {strides = array<i32>} : memref<16x12xf32, #tpu.memory_space<vmem>>, vector<16x12xf32>,
    return
  }
  func.func @transform_0(%arg0: i32, %arg1: i32) -> (i32, i32) {
    %c0_i32 = arith.constant 0 : i32
    %c0_i32_0 = arith.constant 0 : i32
    return %arg0, %c0_i32 : i32, i32
  }
  func.func @transform_1(%arg0: i32, %arg1: i32) -> (i32, i32) {
    %c0_i32 = arith.constant 0 : i32
    %c0_i32_0 = arith.constant 0 : i32
    return %c0_i32, %arg1 : i32, i32
  }
  func.func @transform_2(%arg0: i32, %arg1: i32) -> (i32, i32) {
    %c0_i32 = arith.constant 0 : i32
    %c0_i32_0 = arith.constant 0 : i32
    return %c0_i32, %arg1 : i32, i32
  }
  func.func @transform_3(%arg0: i32, %arg1: i32) -> (i32, i32) {
    %c0_i32 = arith.constant 0 : i32
    %c0_i32_0 = arith.constant 0 : i32
    return %arg0, %c0_i32 : i32, i32
  }
  func.func @transform_4(%arg0: i32, %arg1: i32) -> (i32, i32) {
    %c0_i32 = arith.constant 0 : i32
    %c0_i32_0 = arith.constant 0 : i32
    return %arg0, %c0_i32 : i32, i32
  }
  func.func @transform_5(%arg0: i32, %arg1: i32) -> (i32, i32) {
    %c0_i32 = arith.constant 0 : i32
    return %arg0, %arg1 : i32, i32
  }
}

module attributes {stable_mosaic.version = 11 : i64} {
  func.func @_gemm_bias_kernel(%arg0: i32, %arg1: i32, %arg2: memref<8x48xf32, #tpu.memory_space<vmem>>, %arg3: memref<48x10xbf16, #tpu.memory_space<vmem>>, %arg4: memref<1x10xf32, #tpu.memory_space<vmem>>, %arg5: memref<8x10xf32, #tpu.memory_space<vmem>>) attributes {dimension_semantics = [#tpu.dimension_semantics<parallel>, #tpu.dimension_semantics<parallel>], iteration_bounds = array<i64: 1, 1>, scalar_prefetch = 0 : i64, scratch_operands = 0 : i64, tpu.core_type = #tpu.core_type<tc>, window_params = [{transform_indices = @transform_0, window_bounds = array<i64: 8, 48>}, {transform_indices = @transform_1, window_bounds = array<i64: 48, 10>}, {transform_indices = @transform_2, window_bounds = array<i64: 1, 10>}, {transform_indices = @transform_3, window_bounds = array<i64: 8, 10>}]} {
    %c0 = arith.constant 0 : index
    %c0_0 = arith.constant 0 : index
    %0 = vector.load %arg2[%c0, %c0_0] : memref<8x48xf32, #tpu.memory_space<vmem>>, vector<8x48xf32>
    %1 = arith.truncf %0 : vector<8x48xf32> to vector<8x48xbf16>
    %c0_1 = arith.constant 0 : index
    %c0_2 = arith.constant 0 : index
    %2 = vector.load %arg3[%c0_1, %c0_2] : memref<48x10xbf16, #tpu.memory_space<vmem>>, vector<48x10xbf16>
    %cst = arith.constant dense<0.000000e+00> : vector<8x10xf32>
    %3 = tpu.matmul %1, %2, %cst {dimension_numbers = #tpu.dot_dimension_numbers<[1], [0], [0], [1], [0, 0, 1, 1], [], []>} : vector<8x48xbf16>, vector<48x10xbf16>, vector<8x10xf32> -> vector<8x10xf32>
    %c0_3 = arith.constant 0 : index
    %c0_4 = arith.constant 0 : index
    %4 = vector.load %arg4[%c0_3, %c0_4] : memref<1x10xf32, #tpu.memory_space<vmem>>, vector<1x10xf32>
    %5 = vector.broadcast %4 : vector<1x10xf32> to vector<8x10xf32>
    %6 = arith.addf %3, %5 : vector<8x10xf32>
    %c0_5 = arith.constant 0 : index
    %c0_6 = arith.constant 0 : index
    %7 = vector.load %arg5[%c0_5, %c0_6] : memref<8x10xf32, #tpu.memory_space<vmem>>, vector<8x10xf32>
    tpu.vector_store %arg5[%c0_5, %c0_6], %6 {strides = array<i32>} : memref<8x10xf32, #tpu.memory_space<vmem>>, vector<8x10xf32>,
    return
  }
  func.func @transform_0(%arg0: i32, %arg1: i32) -> (i32, i32) {
    %c0_i32 = arith.constant 0 : i32
    %c0_i32_0 = arith.constant 0 : i32
    return %arg0, %c0_i32 : i32, i32
  }
  func.func @transform_1(%arg0: i32, %arg1: i32) -> (i32, i32) {
    %c0_i32 = arith.constant 0 : i32
    %c0_i32_0 = arith.constant 0 : i32
    return %c0_i32, %arg1 : i32, i32
  }
  func.func @transform_2(%arg0: i32, %arg1: i32) -> (i32, i32) {
    %c0_i32 = arith.constant 0 : i32
    %c0_i32_0 = arith.constant 0 : i32
    return %c0_i32, %arg1 : i32, i32
  }
  func.func @transform_3(%arg0: i32, %arg1: i32) -> (i32, i32) {
    %c0_i32 = arith.constant 0 : i32
    return %arg0, %arg1 : i32, i32
  }
}

</mosaic_0001>

<bundles_post_ra>
// kernel: smlpnet_forward.31
= control target key start
LH: loop header
LB: loop body
LE: loop exit
PB: predicated region body
PF: predicated region fallthrough
CT: control target
= control target key end

     0   :  { %8 = vsyncpa [#allocation3], 0  ;;  %s437_s0 = inlined_call_operand.hbm [shape: f32[64,48], index: 0, kind: input, shape index: {}]   ;;  %s438_s1 = inlined_call_operand.hbm [shape: bf16[48,6], index: 1, kind: input, shape index: {}]   ;;  %s439_s2 = inlined_call_operand.hbm [shape: f32[1,6], index: 2, kind: input, shape index: {}]   ;;  %s440_s3 = inlined_call_operand.hbm [shape: f32[64,6], index: 3, kind: output, shape index: {}]  }
   0x1   :  { %9 = vsyncpa [#allocation6], 0 }
   0x2   :  { %10 = vsyncpa [#allocation4], 0  ;;  %s343_s12 = smov [#allocation5]   ;;  %s249_s16 = scalar_lea.hbm %s438_s1, 384 }
   0x3   :  { %s28_s13 = sshll.u32 %s343_s12, 4  ;;  %p250_p0 = scmp.ne.s32.totalorder %s438_s1, %s249_s16  ;;  %s29_s13 = int_to_ptr.vmem [resolvable:$true] %s28_s13 }
   0x4   :  { %p253_p1 = scmp.lt.u32.totalorder %s249_s16, %s438_s1 }
   0x6   :  { %p255_p2 = pnand %p253_p1, %p250_p0 }
   0x8   :  { %258 = shalt.err (!%p255_p2)
}
   0x9   :  { %s259_s21 = scalar_lea.vmem %s29_s13, 384  ;;  %p264_p4 = scmp.lt.s32.totalorder %s29_s13, %s29_s13 }
   0xa   :  { %p260_p3 = scmp.ne.s32.totalorder %s29_s13, %s259_s21  ;;  %p265_p5 = scmp.lt.s32.totalorder %s259_s21, %s259_s21 }
   0xc   :  { %p266_p6 = por %p265_p5, %p264_p4 }
   0xe   :  { %p267_p7 = pnand %p266_p6, %p260_p3 }
  0x10   :  { %270 = shalt.err (!%p267_p7)
}
  0x11   :  { %s344_s22 = smov 64   ;;  %s345_s23 = smov 4  }
  0x12   :  { %34 = dma.hbm_to_vmem [thread:$0]  %s438_s1, 384, %s29_s13, [#allocation6], %s344_s22, %s344_s22, %s345_s23  }
  0x13   :  { %s346_s26 = smov [#allocation2]   ;;  %s271_s30 = scalar_lea.hbm %s437_s0, 1024 }
  0x14   :  { %s16_s27 = sshll.u32 %s346_s26, 4  ;;  %p272_p8 = scmp.ne.s32.totalorder %s437_s0, %s271_s30  ;;  %s17_s27 = int_to_ptr.vmem [resolvable:$true] %s16_s27 }
  0x15   :  { %p275_p9 = scmp.lt.u32.totalorder %s271_s30, %s437_s0 }
  0x17   :  { %p277_p10 = pnand %p275_p9, %p272_p8 }
  0x19   :  { %280 = shalt.err (!%p277_p10)
}
  0x1a   :  { %s281_s8 = scalar_lea.vmem %s17_s27, 1024  ;;  %p286_p12 = scmp.lt.s32.totalorder %s17_s27, %s17_s27 }
  0x1b   :  { %p282_p11 = scmp.ne.s32.totalorder %s17_s27, %s281_s8  ;;  %p287_p13 = scmp.lt.s32.totalorder %s281_s8, %s281_s8 }
  0x1d   :  { %p288_p0 = por %p287_p13, %p286_p12 }
  0x1f   :  { %p289_p1 = pnand %p288_p0, %p282_p11 }
  0x21   :  { %292 = shalt.err (!%p289_p1)
}
  0x22   :  { %s347_s1 = smov 128   ;;  %s348_s9 = smov 8  }
  0x23   :  { %22 = dma.hbm_to_vmem [thread:$0]  %s437_s0, 1024, %s17_s27, [#allocation3], %s347_s1, %s347_s1, %s348_s9  }
  0x24   :  { %s349_s12 = smov [#allocation7]   ;;  %s293_s16 = scalar_lea.hbm %s439_s2, 16 }
  0x25   :  { %s41_s13 = sshll.u32 %s349_s12, 4  ;;  %p294_p2 = scmp.ne.s32.totalorder %s439_s2, %s293_s16  ;;  %s42_s13 = int_to_ptr.vmem [resolvable:$true] %s41_s13 }
  0x26   :  { %p297_p3 = scmp.lt.u32.totalorder %s293_s16, %s439_s2 }
  0x28   :  { %p299_p4 = pnand %p297_p3, %p294_p2 }
  0x2a   :  { %302 = shalt.err (!%p299_p4)
}
  0x2b   :  { %s303_s21 = scalar_lea.vmem %s42_s13, 16  ;;  %s307_s0 = scalar_lea.vmem %s42_s13, 32 }
  0x2c   :  { %p304_p5 = scmp.ne.s32.totalorder %s42_s13, %s303_s21  ;;  %p308_p6 = scmp.lt.s32.totalorder %s42_s13, %s42_s13 }
  0x2d   :  { %p309_p7 = scmp.lt.s32.totalorder %s307_s0, %s303_s21 }
  0x2f   :  { %p310_p8 = por %p309_p7, %p308_p6 }
  0x31   :  { %p311_p9 = pnand %p310_p8, %p304_p5 }
  0x33   :  { %314 = shalt.err (!%p311_p9)
}
  0x34   :  { %44 = dma.hbm_to_vmem [thread:$0]  %s439_s2, 16, %s42_s13, [#allocation6]  }
  0x35   :  { %337 = dma.done.wait [#allocation3], 1024  }
  0x36   :  { %338 = vsyncadd [#allocation3], 4294966272 }
  0x37   :  { %339 = dma.done.wait [#allocation6], 400  }
  0x38   :  { %340 = vsyncadd [#allocation6], 4294966896  ;;  %v246_v0 = vld [vmem:[#allocation5] sm:$0xff]   ;;  %v247_v1 = vld [vmem:[#allocation5 + $0x8] sm:$0xff]   ;;  %vm98_vm0 = vcmask 392192   ;;  %vm176_vm1 = vcmask 48128  }
  0x39   :  { %218 = vmatprep.subr.bf16.mxu0 %v246_v0  ;;  %232 = vmatprep.subr.bf16.mxu1 %v246_v0  ;;  %v55_v2 = vld [vmem:[#allocation2] sm:$0xff]  ;;  %v56_v3 = vld [vmem:[#allocation2 + $0x8] sm:$0xff]  ;;  %v248_v5 = vld [vmem:[#allocation5 + $0x10] sm:$0xff]   ;;  %s350_s2 = smov [#allocation8]  }
  0x3a   :  { %219 = vmatpush3.bf16.msra.mxu0 %v246_v0  ;;  %235 = vmatpush3.bf16.msra.mxu1 %v246_v0  ;;  %v59_v4 = vld [vmem:[#allocation2 + $0x20] sm:$0xff]  ;;  %v63_v6 = vpack.c.bf16 %v56_v3, %v55_v2  ;;  %v60_v7 = vld [vmem:[#allocation2 + $0x28] sm:$0xff]  ;;  %v57_v9 = vld [vmem:[#allocation2 + $0x10] sm:$0xff]  ;;  %s190_s24 = sshll.u32 %s350_s2, 4  ;;  %s191_s24 = int_to_ptr.vmem [resolvable:$true] %s190_s24 }
  0x3b   :  { %220 = vmatprep.subr.bf16.mxu0 %v247_v1  ;;  %233 = vmatprep.subr.bf16.mxu1 %v247_v1  ;;  %v65_v8 = vpack.c.bf16 %v60_v7, %v59_v4  ;;  %v58_v10 = vld [vmem:[#allocation2 + $0x18] sm:$0xff]  ;;  %v61_v11 = vld [vmem:[#allocation2 + $0x30] sm:$0xff]  ;;  %s315_s25 = scalar_lea.vmem %s191_s24, 1024  ;;  %p320_p11 = scmp.lt.s32.totalorder %s191_s24, %s191_s24 }
  0x3c   :  { %224 = vmatprep.mubr.msk.bf16.mxu0 %vm98_vm0, %v63_v6  ;;  %v62_v12 = vld [vmem:[#allocation2 + $0x38] sm:$0xff]  ;;  %v64_v13 = vpack.c.bf16 %v58_v10, %v57_v9  ;;  %p316_p10 = scmp.ne.s32.totalorder %s191_s24, %s315_s25  ;;  %p321_p12 = scmp.lt.s32.totalorder %s315_s25, %s315_s25 }
  0x3d   :  { %228 = vmatprep.mubr.msk.bf16.mxu1 %vm98_vm0, %v65_v8  ;;  %v66_v14 = vpack.c.bf16 %v62_v12, %v61_v11  ;;  %v203_v15 = vld [vmem:[#allocation7] ss:$0 sm:$0xff] }
  0x3e   :  { %221 = vmatpush3.bf16.msra.mxu0 %v247_v1  ;;  %236 = vmatpush3.bf16.msra.mxu1 %v247_v1  ;;  %p322_p13 = por %p321_p12, %p320_p11 }
  0x3f   :  { %222 = vmatprep.subr.bf16.mxu0 %v248_v5  ;;  %234 = vmatprep.subr.bf16.mxu1 %v248_v5 }
  0x40   :  { %p323_p0 = pnand %p322_p13, %p316_p10 }
  0x42   :  { %223 = vmatpush3.bf16.msra.mxu0 %v248_v5  ;;  %237 = vmatpush3.bf16.msra.mxu1 %v248_v5 }
  0x45   :  { %225 = vmatmul.mubr.msk.bf16.vlgmr.msra.gmra.mrb[0].mxu0 %vm98_vm0, %v64_v13  ;;  %229 = vmatmul.mubr.msk.bf16.vlgmr.msra.gmra.mrb[0].mxu1 %vm98_vm0, %v66_v14 }
 0x118   :  { %v226_v16 = vpop.f32.mrb[0].mxu0  ;;  %v230_v17 = vpop.f32.mrb[0].mxu1 }
 0x119   :  { %v154_v18 = vadd.f32 %v226_v16, %v203_v15  ;;  %v170_v19 = vadd.f32 %v230_v17, %v203_v15  ;;  %v145_v20 = vpop.f32.mrb[1].mxu0  ;;  %v161_v21 = vpop.f32.mrb[1].mxu1 }
 0x11a   :  { %v146_v22 = vadd.f32 %v203_v15, %v145_v20  ;;  %v162_v23 = vadd.f32 %v203_v15, %v161_v21  ;;  %v227_v24 = vpop.f32.mrb[2].mxu0  ;;  %v231_v25 = vpop.f32.mrb[2].mxu1 }
 0x11b   :  { %179 = vst.msk [vmem:[#allocation8 + $0x10] sm:$0xff] %vm176_vm1, %v154_v18  ;;  %183 = vst.msk [vmem:[#allocation8 + $0x30] sm:$0xff] %vm176_vm1, %v170_v19  ;;  %v157_v26 = vadd.f32 %v227_v24, %v203_v15  ;;  %v173_v27 = vadd.f32 %v231_v25, %v203_v15  ;;  %v148_v28 = vpop.f32.mrb[3].mxu0  ;;  %v164_v29 = vpop.f32.mrb[3].mxu1 }
 0x11c   :  { %177 = vst.msk [vmem:[#allocation8] sm:$0xff] %vm176_vm1, %v146_v22  ;;  %181 = vst.msk [vmem:[#allocation8 + $0x20] sm:$0xff] %vm176_vm1, %v162_v23  ;;  %v149_v30 = vadd.f32 %v203_v15, %v148_v28  ;;  %v165_v31 = vadd.f32 %v203_v15, %v164_v29 }
 0x11d   :  { %180 = vst.msk [vmem:[#allocation8 + $0x18] sm:$0xff] %vm176_vm1, %v157_v26  ;;  %184 = vst.msk [vmem:[#allocation8 + $0x38] sm:$0xff] %vm176_vm1, %v173_v27 }
 0x11e   :  { %178 = vst.msk [vmem:[#allocation8 + $0x8] sm:$0xff] %vm176_vm1, %v149_v30  ;;  %182 = vst.msk [vmem:[#allocation8 + $0x28] sm:$0xff] %vm176_vm1, %v165_v31 }
 0x11f   :  { %326 = shalt.err (!%p323_p0)
}
 0x120   :  { %s327_s28 = scalar_lea.hbm %s440_s3, 1024 }
 0x121   :  { %p328_p1 = scmp.ne.s32.totalorder %s440_s3, %s327_s28  ;;  %p331_p2 = scmp.lt.u32.totalorder %s327_s28, %s440_s3 }
 0x123   :  { %p333_p3 = pnand %p331_p2, %p328_p1 }
 0x125   :  { %336 = shalt.err (!%p333_p3)
}
 0x126   :  { %196 = dma.vmem_to_hbm [thread:$0]  %s191_s24, 1024, %s440_s3, [#allocation4], %s347_s1, %s347_s1, %s348_s9  }
 0x127   :  { %341 = dma.done.wait [#allocation4], 1024  }
 0x128   :  { %342 = vsyncadd [#allocation4], 4294966272 }
 0x129   :  { %200 = vsyncpa [#allocation3], 1 }
 0x12a   :  { %201 = vsyncpa [#allocation6], 1 }
 0x12b   :  { %202 = vsyncpa [#allocation4], 1 }

// kernel: smlpnet_forward.32
= control target key start
LH: loop header
LB: loop body
LE: loop exit
PB: predicated region body
PF: predicated region fallthrough
CT: control target
= control target key end

     0   :  { %s307_s6 = smov 0   ;;  %s309_s7 = smov 0   ;;  %s337_s0 = inlined_call_operand.vmem [shape: f32[2,8,128], index: 0, kind: input, shape index: {}]   ;;  %s338_s1 = inlined_call_operand.vmem [shape: f32[2,8,128], index: 1, kind: output, shape index: {}]  }
   0x1   :  { %s311_s8 = smov 0  }
   0x2 LB: > { %s20_s9 = sadd.s32 1, %s289_s7  ;;  %p238_p0 = scmp.ge.s32.totalorder %s293_s8, 1  ;;  %s293_s8 = sphi %s311_s8, %s11_s8   ;;  %s289_s7 = sphi %s309_s7, %s340_s7   ;;  %s285_s6 = sphi %s307_s6, %s339_s6  }
   0x3   : > { %p21_p1 = scmp.ge.s32.totalorder %s20_s9, 2  ;;  %p105_p2 = scmp.lt.s32.totalorder %s293_s8, 3 }
   0x5   : > { %s342_s9 = smov (%p21_p1, %s20_s9), 0  ;;  %p106_p3 = pnand %p238_p0, %p105_p2 }
   0x6   : > { %p129_p4 = scmp.lt.s32.totalorder (!%p106_p3), %s285_s6, 1  ;;  %p241_p5 = scmp.ne.s32.totalorder (!%p106_p3), %s285_s6, 0 }
   0x7   : > { %109 = sbr.rel (%p106_p3) target bundleno = 37 (0x25), region = 24 }
   0xe   : > { %s130_s10 = scalar_select %p129_p4, %s285_s6, 1 }
   0xf   : > { %146 = sbr.rel (%p241_p5) target bundleno = 22 (0x16), region = 28  ;;  %v295_v0 = vmov (!%p241_p5), 0.0  }
  0x10   : > { %s239_s11 = sshll.u32 %s130_s10, 3  ;;  %147 = vst [vmem:[#allocation2] sm:$0xff] (!%p241_p5), %v295_v0 }
  0x11   : > { %s135_s14 = scalar_lea.vmem %s337_s0, %s239_s11  ;;  %s142_s17 = scalar_lea.vmem %s338_s1, %s239_s11 }
  0x16 PF: > { %v149_v2 = vld [vmem:[%s135_s14] sm:$0xff]  ;;  %v296_v6 = vmov 0.0  }
  0x17   : > { %v148_v1 = vld [vmem:[#allocation2] sm:$0xff] }
  0x18   : > { %v150_v3 = vsub.f32 %v149_v2, %v148_v1 }
  0x1a   : > { %v151_v4 = vmul.f32 0.5, %v150_v3 }
  0x1c   : > { %v152_v5 = vadd.f32 %v151_v4, %v148_v1 }
  0x1e   : > { %vm153_vm0 = vcmp.ge.f32.partialorder %v152_v5, 1.0 }
  0x1f   : > { %v242_v7 = vsel %vm153_vm0, 1.0, %v296_v6 }
  0x20   : > { %156 = vst [vmem:[%s142_s17] sm:$0xff] %v242_v7  ;;  %v157_v8 = vsub.f32 1.0, %v242_v7 }
  0x22   : > { %v158_v9 = vmul.f32 %v157_v8, %v152_v5 }
  0x24   : > { %159 = vst [vmem:[#allocation2] sm:$0xff] %v158_v9 }
  0x25 PF: > { %s11_s8 = sadd.s32 1, %s293_s8   ;;  %s339_s6 = smov %s289_s7 }
  0x26   : > { %p8_p6 = scmp.ge.s32.totalorder %s11_s8, 4   ;;  %s340_s7 = smov %s342_s9 }
  0x28   :  { %10 = sbr.rel (!%p8_p6) target bundleno = 2 (0x2), region = 58 }

// kernel: smlpnet_forward.33
= control target key start
LH: loop header
LB: loop body
LE: loop exit
PB: predicated region body
PF: predicated region fallthrough
CT: control target
= control target key end

     0   :  { %8 = vsyncpa [#allocation3], 0  ;;  %s450_s0 = inlined_call_operand.hbm [shape: f32[96,4], index: 0, kind: input, shape index: {}]   ;;  %s451_s1 = inlined_call_operand.hbm [shape: bf16[4,4], index: 1, kind: input, shape index: {}]   ;;  %s452_s2 = inlined_call_operand.hbm [shape: f32[1,4], index: 2, kind: input, shape index: {}]   ;;  %s453_s3 = inlined_call_operand.hbm [shape: f32[96,4], index: 3, kind: output, shape index: {}]  }
   0x1   :  { %9 = vsyncpa [#allocation6], 0 }
   0x2   :  { %10 = vsyncpa [#allocation4], 0  ;;  %s345_s12 = smov [#allocation5]   ;;  %s346_s14 = smov [#allocation2]  }
   0x3   :  { %s29_s13 = sshll.u32 %s345_s12, 4  ;;  %s16_s15 = sshll.u32 %s346_s14, 4  ;;  %s30_s13 = int_to_ptr.vmem [resolvable:$true] %s29_s13  ;;  %s371_s15 = int_to_ptr.vmem [resolvable:$true] %s16_s15 }
   0x4   :  { %s251_s18 = scalar_lea.hbm %s451_s1, 32 }
   0x5   :  { %p252_p0 = scmp.ne.s32.totalorder %s451_s1, %s251_s18  ;;  %p255_p1 = scmp.lt.u32.totalorder %s251_s18, %s451_s1 }
   0x7   :  { %p257_p2 = pnand %p255_p1, %p252_p0 }
   0x9   :  { %260 = shalt.err (!%p257_p2)
}
   0xa   :  { %s261_s23 = scalar_lea.vmem %s30_s13, 32  ;;  %p266_p4 = scmp.lt.s32.totalorder %s30_s13, %s30_s13 }
   0xb   :  { %p262_p3 = scmp.ne.s32.totalorder %s30_s13, %s261_s23  ;;  %p267_p5 = scmp.lt.s32.totalorder %s261_s23, %s261_s23 }
   0xd   :  { %p268_p6 = por %p267_p5, %p266_p4 }
   0xf   :  { %p269_p7 = pnand %p268_p6, %p262_p3 }
  0x11   :  { %272 = shalt.err (!%p269_p7)
}
  0x12   :  { %32 = dma.hbm_to_vmem [thread:$0]  %s451_s1, 32, %s30_s13, [#allocation6]  }
  0x13   :  { %s273_s28 = scalar_lea.hbm %s450_s0, 1536 }
  0x14   :  { %p274_p8 = scmp.ne.s32.totalorder %s450_s0, %s273_s28  ;;  %p277_p9 = scmp.lt.u32.totalorder %s273_s28, %s450_s0 }
  0x16   :  { %p279_p10 = pnand %p277_p9, %p274_p8 }
  0x18   :  { %282 = shalt.err (!%p279_p10)
}
  0x19   :  { %s283_s6 = scalar_lea.vmem %s371_s15, 1536  ;;  %p288_p12 = scmp.lt.s32.totalorder %s371_s15, %s371_s15 }
  0x1a   :  { %p284_p11 = scmp.ne.s32.totalorder %s371_s15, %s283_s6  ;;  %p289_p13 = scmp.lt.s32.totalorder %s283_s6, %s283_s6 }
  0x1c   :  { %p290_p0 = por %p289_p13, %p288_p12 }
  0x1e   :  { %p291_p1 = pnand %p290_p0, %p284_p11 }
  0x20   :  { %294 = shalt.err (!%p291_p1)
}
  0x21   :  { %s347_s1 = smov 128   ;;  %s348_s7 = smov 8  }
  0x22   :  { %22 = dma.hbm_to_vmem [thread:$0]  %s450_s0, 1536, %s371_s15, [#allocation3], %s347_s1, %s347_s1, %s348_s7  }
  0x23   :  { %s349_s10 = smov [#allocation7]   ;;  %s295_s14 = scalar_lea.hbm %s452_s2, 16 }
  0x24   :  { %s39_s11 = sshll.u32 %s349_s10, 4  ;;  %p296_p2 = scmp.ne.s32.totalorder %s452_s2, %s295_s14  ;;  %s40_s11 = int_to_ptr.vmem [resolvable:$true] %s39_s11 }
  0x25   :  { %p299_p3 = scmp.lt.u32.totalorder %s295_s14, %s452_s2 }
  0x27   :  { %p301_p4 = pnand %p299_p3, %p296_p2 }
  0x29   :  { %304 = shalt.err (!%p301_p4)
}
  0x2a   :  { %s305_s20 = scalar_lea.vmem %s40_s11, 16  ;;  %s309_s0 = scalar_lea.vmem %s40_s11, 32 }
  0x2b   :  { %p306_p5 = scmp.ne.s32.totalorder %s40_s11, %s305_s20  ;;  %p310_p6 = scmp.lt.s32.totalorder %s40_s11, %s40_s11 }
  0x2c   :  { %p311_p7 = scmp.lt.s32.totalorder %s309_s0, %s305_s20 }
  0x2e   :  { %p312_p8 = por %p311_p7, %p310_p6 }
  0x30   :  { %p313_p9 = pnand %p312_p8, %p306_p5 }
  0x32   :  { %316 = shalt.err (!%p313_p9)
}
  0x33   :  { %42 = dma.hbm_to_vmem [thread:$0]  %s452_s2, 16, %s40_s11, [#allocation6]  }
  0x34   :  { %339 = dma.done.wait [#allocation3], 1536  }
  0x35   :  { %340 = vsyncadd [#allocation3], 4294965760 }
  0x36   :  { %341 = dma.done.wait [#allocation6], 48  }
  0x37   :  { %342 = vsyncadd [#allocation6], 4294967248  ;;  %vm98_vm0 = vcmask 1041408   ;;  %v71_v0 = vld [vmem:[#allocation5] sm:$0x3]  ;;  %v58_v2 = vld [vmem:[#allocation2 + $0x28] sm:$0xff] }
  0x38   :  { %v57_v1 = vld [vmem:[#allocation2 + $0x20] sm:$0xff]  ;;  %vm79_vm1 = vcmask 31744   ;;  %244 = vmatprep.subr.msk.bf16.mxu1 %vm98_vm0, %v71_v0  ;;  %v100_v3 = vsel %vm98_vm0, %v71_v0, 0  ;;  %v59_v5 = vld [vmem:[#allocation2 + $0x30] sm:$0xff]  ;;  %v60_v6 = vld [vmem:[#allocation2 + $0x38] sm:$0xff]  ;;  %243 = vmatprep.subr.msk.bf16.mxu0 %vm98_vm0, %v71_v0  ;;  %s350_s2 = smov [#allocation8]  }
  0x39   :  { %v67_v4 = vpack.c.bf16 %v58_v2, %v57_v1  ;;  %v53_v7 = vld [vmem:[#allocation2] sm:$0xff]  ;;  %242 = vmatpush3.bf16.msra.mxu1 %v100_v3  ;;  %v68_v8 = vpack.c.bf16 %v60_v6, %v59_v5  ;;  %228 = vmatpush3.bf16.msra.mxu0 %v100_v3  ;;  %v54_v9 = vld [vmem:[#allocation2 + $0x8] sm:$0xff]  ;;  %v55_v10 = vld [vmem:[#allocation2 + $0x10] sm:$0xff]  ;;  %s200_s22 = sshll.u32 %s350_s2, 4  ;;  %s201_s22 = int_to_ptr.vmem [resolvable:$true] %s200_s22 }
  0x3a   :  { %v56_v11 = vld [vmem:[#allocation2 + $0x18] sm:$0xff]  ;;  %v65_v12 = vpack.c.bf16 %v54_v9, %v53_v7  ;;  %v61_v14 = vld [vmem:[#allocation2 + $0x40] sm:$0xff]  ;;  %v62_v15 = vld [vmem:[#allocation2 + $0x48] sm:$0xff]  ;;  %s317_s23 = scalar_lea.vmem %s201_s22, 1536  ;;  %p322_p11 = scmp.lt.s32.totalorder %s201_s22, %s201_s22 }
  0x3b   :  { %233 = vmatprep.mubr.msk.bf16.mxu1 %vm79_vm1, %v67_v4  ;;  %v66_v13 = vpack.c.bf16 %v56_v11, %v55_v10  ;;  %v69_v16 = vpack.c.bf16 %v62_v15, %v61_v14  ;;  %v63_v17 = vld [vmem:[#allocation2 + $0x50] sm:$0xff]  ;;  %v64_v18 = vld [vmem:[#allocation2 + $0x58] sm:$0xff]  ;;  %v213_v20 = vld [vmem:[#allocation7] ss:$0 sm:$0xff]  ;;  %p318_p10 = scmp.ne.s32.totalorder %s201_s22, %s317_s23  ;;  %p323_p12 = scmp.lt.s32.totalorder %s317_s23, %s317_s23 }
  0x3c   :  { %234 = vmatmul.mubr.msk.bf16.vlgmr.msra.gmra.mrb[0].mxu1 %vm79_vm1, %v68_v8  ;;  %229 = vmatprep.mubr.msk.bf16.mxu0 %vm79_vm1, %v65_v12  ;;  %v70_v19 = vpack.c.bf16 %v64_v18, %v63_v17 }
  0x3d   :  { %230 = vmatmul.mubr.msk.bf16.vlgmr.msra.gmra.mrb[0].mxu0 %vm79_vm1, %v66_v13  ;;  %237 = vmatprep.mubr.msk.bf16.mxu1 %vm79_vm1, %v69_v16  ;;  %p324_p13 = por %p323_p12, %p322_p11 }
  0x3f   :  { %p325_p0 = pnand %p324_p13, %p318_p10 }
  0x44   :  { %238 = vmatmul.mubr.msk.bf16.gmra.mrb[4].mxu1 %vm79_vm1, %v70_v19 }
 0x10f   :  { %v235_v21 = vpop.f32.mrb[0].mxu1 }
 0x110   :  { %v161_v22 = vadd.f32 %v235_v21, %v213_v20  ;;  %v152_v23 = vpop.f32.mrb[1].mxu1  ;;  %v231_v24 = vpop.f32.mrb[0].mxu0 }
 0x111   :  { %v153_v25 = vadd.f32 %v213_v20, %v152_v23  ;;  %v236_v26 = vpop.f32.mrb[2].mxu1  ;;  %v145_v27 = vadd.f32 %v231_v24, %v213_v20  ;;  %v136_v28 = vpop.f32.mrb[1].mxu0 }
 0x112   :  { %189 = vst.msk [vmem:[#allocation8 + $0x30] sm:$0xff] %vm79_vm1, %v161_v22  ;;  %v164_v29 = vadd.f32 %v236_v26, %v213_v20  ;;  %v155_v30 = vpop.f32.mrb[3].mxu1  ;;  %v137_v31 = vadd.f32 %v213_v20, %v136_v28  ;;  %v232_v32 = vpop.f32.mrb[2].mxu0 }
 0x113   :  { %187 = vst.msk [vmem:[#allocation8 + $0x20] sm:$0xff] %vm79_vm1, %v153_v25  ;;  %v156_v33 = vadd.f32 %v213_v20, %v155_v30  ;;  %185 = vst.msk [vmem:[#allocation8 + $0x10] sm:$0xff] %vm79_vm1, %v145_v27  ;;  %v148_v34 = vadd.f32 %v232_v32, %v213_v20  ;;  %v139_v35 = vpop.f32.mrb[3].mxu0 }
 0x114   :  { %190 = vst.msk [vmem:[#allocation8 + $0x38] sm:$0xff] %vm79_vm1, %v164_v29  ;;  %183 = vst.msk [vmem:[#allocation8] sm:$0xff] %vm79_vm1, %v137_v31  ;;  %v140_v36 = vadd.f32 %v213_v20, %v139_v35 }
 0x115   :  { %188 = vst.msk [vmem:[#allocation8 + $0x28] sm:$0xff] %vm79_vm1, %v156_v33  ;;  %186 = vst.msk [vmem:[#allocation8 + $0x18] sm:$0xff] %vm79_vm1, %v148_v34 }
 0x116   :  { %184 = vst.msk [vmem:[#allocation8 + $0x8] sm:$0xff] %vm79_vm1, %v140_v36 }
 0x117   :  { %v239_v37 = vpop.f32.mrb[4].mxu1 }
 0x118   :  { %v177_v38 = vadd.f32 %v239_v37, %v213_v20  ;;  %v168_v39 = vpop.f32.mrb[5].mxu1 }
 0x119   :  { %v169_v40 = vadd.f32 %v213_v20, %v168_v39  ;;  %v240_v41 = vpop.f32.mrb[6].mxu1 }
 0x11a   :  { %193 = vst.msk [vmem:[#allocation8 + $0x50] sm:$0xff] %vm79_vm1, %v177_v38  ;;  %v180_v42 = vadd.f32 %v240_v41, %v213_v20  ;;  %v171_v43 = vpop.f32.mrb[7].mxu1 }
 0x11b   :  { %191 = vst.msk [vmem:[#allocation8 + $0x40] sm:$0xff] %vm79_vm1, %v169_v40  ;;  %v172_v44 = vadd.f32 %v213_v20, %v171_v43 }
 0x11c   :  { %194 = vst.msk [vmem:[#allocation8 + $0x58] sm:$0xff] %vm79_vm1, %v180_v42 }
 0x11d   :  { %192 = vst.msk [vmem:[#allocation8 + $0x48] sm:$0xff] %vm79_vm1, %v172_v44 }
 0x11e   :  { %328 = shalt.err (!%p325_p0)
}
 0x11f   :  { %s329_s26 = scalar_lea.hbm %s453_s3, 1536 }
 0x120   :  { %p330_p1 = scmp.ne.s32.totalorder %s453_s3, %s329_s26  ;;  %p333_p2 = scmp.lt.u32.totalorder %s329_s26, %s453_s3 }
 0x122   :  { %p335_p3 = pnand %p333_p2, %p330_p1 }
 0x124   :  { %338 = shalt.err (!%p335_p3)
}
 0x125   :  { %206 = dma.vmem_to_hbm [thread:$0]  %s201_s22, 1536, %s453_s3, [#allocation4], %s347_s1, %s347_s1, %s348_s7  }
 0x126   :  { %343 = dma.done.wait [#allocation4], 1536  }
 0x127   :  { %344 = vsyncadd [#allocation4], 4294965760 }
 0x128   :  { %210 = vsyncpa [#allocation3], 1 }
 0x129   :  { %211 = vsyncpa [#allocation6], 1 }
 0x12a   :  { %212 = vsyncpa [#allocation4], 1 }

// kernel: tile.34
= control target key start
LH: loop header
LB: loop body
LE: loop exit
PB: predicated region body
PF: predicated region fallthrough
CT: control target
= control target key end

     0   :  { %s22_s0 = inlined_call_operand.vmem [shape: f32[16], index: 0, kind: input, shape index: {}]   ;;  %s23_s1 = inlined_call_operand.vmem [shape: f32[4,16], index: 1, kind: output, shape index: {}]  }
   0x1   :  { %v4_v0 = vld [vmem:[%s22_s0] ss:$0 sm:$0xff] }
   0x2   :  { %5 = vst [vmem:[%s23_s1] sm:$0xf] %v4_v0 }

// kernel: tile.0
= control target key start
LH: loop header
LB: loop body
LE: loop exit
PB: predicated region body
PF: predicated region fallthrough
CT: control target
= control target key end

     0   :  { %s254_s0 = inlined_call_operand.vmem [shape: f32[4,16], index: 0, kind: input, shape index: {}]   ;;  %s255_s1 = inlined_call_operand.hbm [shape: f32[64,1], index: 1, kind: output, shape index: {}]  }
   0x1   :  { %v5_v0 = vld [vmem:[%s254_s0] sm:$0xf] }
   0x2   :  { %6 = vst [vmem:[#allocation2] sm:$0xf] %v5_v0 }
   0x3   :  { %2 = vsyncpa [#allocation1], 0  ;;  %s181_s0 = smov 127   ;;  %s182_s8 = smov 125   ;;  %vm8_vm0 = vcmask 7168  }
   0x4   :  { %s183_s9 = smov 126   ;;  %s184_s10 = smov 124  }
   0x5   :  { %s185_s11 = smov 123   ;;  %s186_s12 = smov 122  }
   0x6   :  { %s187_s13 = smov 121   ;;  %s188_s14 = smov 120  }
   0x7   :  { %s189_s15 = smov 119   ;;  %s190_s16 = smov 118  }
   0x8   :  { %s191_s17 = smov 117   ;;  %s192_s18 = smov 116  }
   0x9   :  { %v11_v1 = vld [vmem:[#allocation2] sm:$0xf]   ;;  %s193_s19 = smov 115   ;;  %s194_s20 = smov 114  }
   0xa   :  { %v27_v2 = vld [vmem:[#allocation2] sm:$0xf]   ;;  %12 = vrot.lane.b32.xlu0 %v11_v1, %s181_s0  ;;  %s195_s21 = smov 113   ;;  %s196_s22 = smov [#allocation0]  }
   0xb   :  { %28 = vrot.lane.b32.xlu1 %v27_v2, %s182_s8  ;;  %v19_v3 = vld [vmem:[#allocation2] sm:$0xf]   ;;  %s135_s23 = sshll.u32 %s196_s22, 4  ;;  %s136_s23 = int_to_ptr.vmem [resolvable:$true] %s135_s23 }
   0xc   :  { %v35_v4 = vld [vmem:[#allocation2] sm:$0xf]   ;;  %s157_s24 = scalar_lea.vmem %s136_s23, 1024  ;;  %p162_p1 = scmp.lt.s32.totalorder %s136_s23, %s136_s23 }
   0xd   :  { %v43_v5 = vld [vmem:[#allocation2] sm:$0xf]   ;;  %p158_p0 = scmp.ne.s32.totalorder %s136_s23, %s157_s24  ;;  %p163_p2 = scmp.lt.s32.totalorder %s157_s24, %s157_s24 }
   0xe   :  { %20 = vrot.lane.b32.xlu0 %v19_v3, %s183_s9  ;;  %v51_v6 = vld [vmem:[#allocation2] sm:$0xf]  }
   0xf   :  { %36 = vrot.lane.b32.xlu1 %v35_v4, %s184_s10  ;;  %v59_v7 = vld [vmem:[#allocation2] sm:$0xf]   ;;  %p164_p3 = por %p163_p2, %p162_p1 }
  0x10   :  { %v67_v8 = vld [vmem:[#allocation2] sm:$0xf]  }
  0x11   :  { %v75_v9 = vld [vmem:[#allocation2] sm:$0xf]   ;;  %p165_p4 = pnand %p164_p3, %p158_p0 }
  0x12   :  { %44 = vrot.lane.b32.xlu0 %v43_v5, %s185_s11  ;;  %v83_v10 = vld [vmem:[#allocation2] sm:$0xf]  }
  0x13   :  { %52 = vrot.lane.b32.xlu1 %v51_v6, %s186_s12  ;;  %v7_v11 = vld [vmem:[#allocation2] sm:$0xf]  }
  0x14   :  { %9 = vst.msk [vmem:[#allocation0] ss:$16 sm:$0x3] %vm8_vm0, %v7_v11   ;;  %10 = vst.msk [vmem:[#allocation0] ss:$16 sm:$0xc] %vm8_vm0, %v7_v11  }
  0x15   :  { %v91_v12 = vld [vmem:[#allocation2] sm:$0xf]  }
  0x16   :  { %60 = vrot.lane.b32.xlu0 %v59_v7, %s187_s13  ;;  %v99_v13 = vld [vmem:[#allocation2] sm:$0xf]  }
  0x17   :  { %68 = vrot.lane.b32.xlu1 %v67_v8, %s188_s14  ;;  %v107_v14 = vld [vmem:[#allocation2] sm:$0xf]  }
  0x18   :  { %v115_v15 = vld [vmem:[#allocation2] sm:$0xf]  }
  0x19   :  { %v123_v16 = vld [vmem:[#allocation2] sm:$0xf]  }
  0x1a   :  { %76 = vrot.lane.b32.xlu0 %v75_v9, %s189_s15 }
  0x1b   :  { %84 = vrot.lane.b32.xlu1 %v83_v10, %s190_s16 }
  0x1e   :  { %92 = vrot.lane.b32.xlu0 %v91_v12, %s191_s17 }
  0x1f   :  { %100 = vrot.lane.b32.xlu1 %v99_v13, %s192_s18 }
  0x22   :  { %108 = vrot.lane.b32.xlu0 %v107_v14, %s193_s19 }
  0x23   :  { %116 = vrot.lane.b32.xlu1 %v115_v15, %s194_s20 }
  0x26   :  { %124 = vrot.lane.b32.xlu0 %v123_v16, %s195_s21 }
  0x7c   :  { %v13_v17 = vpop.permute.xlu0 %12  }
  0x7d   :  { %v29_v18 = vpop.permute.xlu1 %28   ;;  %16 = vst.msk [vmem:[#allocation0 + $0x1] ss:$16 sm:$0x3] %vm8_vm0, %v13_v17   ;;  %18 = vst.msk [vmem:[#allocation0 + $0x1] ss:$16 sm:$0xc] %vm8_vm0, %v13_v17  }
  0x7e   :  { %32 = vst.msk [vmem:[#allocation0 + $0x3] ss:$16 sm:$0x3] %vm8_vm0, %v29_v18   ;;  %34 = vst.msk [vmem:[#allocation0 + $0x3] ss:$16 sm:$0xc] %vm8_vm0, %v29_v18  }
  0x80   :  { %v21_v19 = vpop.permute.xlu0 %20  }
  0x81   :  { %v37_v20 = vpop.permute.xlu1 %36   ;;  %24 = vst.msk [vmem:[#allocation0 + $0x2] ss:$16 sm:$0x3] %vm8_vm0, %v21_v19   ;;  %26 = vst.msk [vmem:[#allocation0 + $0x2] ss:$16 sm:$0xc] %vm8_vm0, %v21_v19  }
  0x82   :  { %40 = vst.msk [vmem:[#allocation0 + $0x4] ss:$16 sm:$0x3] %vm8_vm0, %v37_v20   ;;  %42 = vst.msk [vmem:[#allocation0 + $0x4] ss:$16 sm:$0xc] %vm8_vm0, %v37_v20  }
  0x84   :  { %v45_v21 = vpop.permute.xlu0 %44  }
  0x85   :  { %v53_v22 = vpop.permute.xlu1 %52   ;;  %48 = vst.msk [vmem:[#allocation0 + $0x5] ss:$16 sm:$0x3] %vm8_vm0, %v45_v21   ;;  %50 = vst.msk [vmem:[#allocation0 + $0x5] ss:$16 sm:$0xc] %vm8_vm0, %v45_v21  }
  0x86   :  { %56 = vst.msk [vmem:[#allocation0 + $0x6] ss:$16 sm:$0x3] %vm8_vm0, %v53_v22   ;;  %58 = vst.msk [vmem:[#allocation0 + $0x6] ss:$16 sm:$0xc] %vm8_vm0, %v53_v22  }
  0x88   :  { %v61_v23 = vpop.permute.xlu0 %60  }
  0x89   :  { %v69_v24 = vpop.permute.xlu1 %68   ;;  %64 = vst.msk [vmem:[#allocation0 + $0x7] ss:$16 sm:$0x3] %vm8_vm0, %v61_v23   ;;  %66 = vst.msk [vmem:[#allocation0 + $0x7] ss:$16 sm:$0xc] %vm8_vm0, %v61_v23  }
  0x8a   :  { %72 = vst.msk [vmem:[#allocation0 + $0x8] ss:$16 sm:$0x3] %vm8_vm0, %v69_v24   ;;  %74 = vst.msk [vmem:[#allocation0 + $0x8] ss:$16 sm:$0xc] %vm8_vm0, %v69_v24  }
  0x8c   :  { %v77_v25 = vpop.permute.xlu0 %76  }
  0x8d   :  { %v85_v26 = vpop.permute.xlu1 %84   ;;  %80 = vst.msk [vmem:[#allocation0 + $0x9] ss:$16 sm:$0x3] %vm8_vm0, %v77_v25   ;;  %82 = vst.msk [vmem:[#allocation0 + $0x9] ss:$16 sm:$0xc] %vm8_vm0, %v77_v25  }
  0x8e   :  { %88 = vst.msk [vmem:[#allocation0 + $0xa] ss:$16 sm:$0x3] %vm8_vm0, %v85_v26   ;;  %90 = vst.msk [vmem:[#allocation0 + $0xa] ss:$16 sm:$0xc] %vm8_vm0, %v85_v26  }
  0x90   :  { %v93_v27 = vpop.permute.xlu0 %92  }
  0x91   :  { %v101_v28 = vpop.permute.xlu1 %100   ;;  %96 = vst.msk [vmem:[#allocation0 + $0xb] ss:$16 sm:$0x3] %vm8_vm0, %v93_v27   ;;  %98 = vst.msk [vmem:[#allocation0 + $0xb] ss:$16 sm:$0xc] %vm8_vm0, %v93_v27  }
  0x92   :  { %104 = vst.msk [vmem:[#allocation0 + $0xc] ss:$16 sm:$0x3] %vm8_vm0, %v101_v28   ;;  %106 = vst.msk [vmem:[#allocation0 + $0xc] ss:$16 sm:$0xc] %vm8_vm0, %v101_v28  }
  0x94   :  { %v109_v29 = vpop.permute.xlu0 %108  }
  0x95   :  { %v117_v30 = vpop.permute.xlu1 %116   ;;  %112 = vst.msk [vmem:[#allocation0 + $0xd] ss:$16 sm:$0x3] %vm8_vm0, %v109_v29   ;;  %114 = vst.msk [vmem:[#allocation0 + $0xd] ss:$16 sm:$0xc] %vm8_vm0, %v109_v29  }
  0x96   :  { %120 = vst.msk [vmem:[#allocation0 + $0xe] ss:$16 sm:$0x3] %vm8_vm0, %v117_v30   ;;  %122 = vst.msk [vmem:[#allocation0 + $0xe] ss:$16 sm:$0xc] %vm8_vm0, %v117_v30  }
  0x98   :  { %v125_v31 = vpop.permute.xlu0 %124  }
  0x99   :  { %128 = vst.msk [vmem:[#allocation0 + $0xf] ss:$16 sm:$0x3] %vm8_vm0, %v125_v31   ;;  %130 = vst.msk [vmem:[#allocation0 + $0xf] ss:$16 sm:$0xc] %vm8_vm0, %v125_v31  }
  0x9a   :  { %168 = shalt.err (!%p165_p4)
}
  0x9b   :  { %s169_s27 = scalar_lea.hbm %s255_s1, 1024 }
  0x9c   :  { %p170_p5 = scmp.ne.s32.totalorder %s255_s1, %s169_s27  ;;  %p173_p6 = scmp.lt.u32.totalorder %s169_s27, %s255_s1 }
  0x9e   :  { %p175_p7 = pnand %p173_p6, %p170_p5 }
  0xa0   :  { %178 = shalt.err (!%p175_p7)
}
  0xa1   :  { %138 = dma.vmem_to_hbm [thread:$0]  %s136_s23, 1024, %s255_s1, [#allocation1]  }
  0xa2   :  { %179 = dma.done.wait [#allocation1], 1024  }
  0xa3   :  { %180 = vsyncadd [#allocation1], 4294966272 }
  0xa4   :  { %140 = vsyncpa [#allocation1], 1 }

// kernel: smlpnet_forward.37
= control target key start
LH: loop header
LB: loop body
LE: loop exit
PB: predicated region body
PF: predicated region fallthrough
CT: control target
= control target key end

     0   :  { %8 = vsyncpa [#allocation3], 0  ;;  %s427_s0 = inlined_call_operand.hbm [shape: f32[64,18], index: 0, kind: input, shape index: {}]   ;;  %s428_s1 = inlined_call_operand.hbm [shape: bf16[18,6], index: 1, kind: input, shape index: {}]   ;;  %s429_s2 = inlined_call_operand.hbm [shape: f32[1,6], index: 2, kind: input, shape index: {}]   ;;  %s430_s3 = inlined_call_operand.hbm [shape: f32[64,6], index: 3, kind: output, shape index: {}]  }
   0x1   :  { %9 = vsyncpa [#allocation6], 0 }
   0x2   :  { %10 = vsyncpa [#allocation4], 0  ;;  %s330_s12 = smov [#allocation5]   ;;  %s236_s16 = scalar_lea.hbm %s428_s1, 192 }
   0x3   :  { %s28_s13 = sshll.u32 %s330_s12, 4  ;;  %p237_p0 = scmp.ne.s32.totalorder %s428_s1, %s236_s16  ;;  %s29_s13 = int_to_ptr.vmem [resolvable:$true] %s28_s13 }
   0x4   :  { %p240_p1 = scmp.lt.u32.totalorder %s236_s16, %s428_s1 }
   0x6   :  { %p242_p2 = pnand %p240_p1, %p237_p0 }
   0x8   :  { %245 = shalt.err (!%p242_p2)
}
   0x9   :  { %s246_s21 = scalar_lea.vmem %s29_s13, 192  ;;  %p251_p4 = scmp.lt.s32.totalorder %s29_s13, %s29_s13 }
   0xa   :  { %p247_p3 = scmp.ne.s32.totalorder %s29_s13, %s246_s21  ;;  %p252_p5 = scmp.lt.s32.totalorder %s246_s21, %s246_s21 }
   0xc   :  { %p253_p6 = por %p252_p5, %p251_p4 }
   0xe   :  { %p254_p7 = pnand %p253_p6, %p247_p3 }
  0x10   :  { %257 = shalt.err (!%p254_p7)
}
  0x11   :  { %s331_s22 = smov 64   ;;  %s332_s23 = smov 4  }
  0x12   :  { %34 = dma.hbm_to_vmem [thread:$0]  %s428_s1, 192, %s29_s13, [#allocation6], %s331_s22, %s331_s22, %s332_s23  }
  0x13   :  { %s333_s26 = smov [#allocation2]   ;;  %s258_s30 = scalar_lea.hbm %s427_s0, 1024 }
  0x14   :  { %s16_s27 = sshll.u32 %s333_s26, 4  ;;  %p259_p8 = scmp.ne.s32.totalorder %s427_s0, %s258_s30  ;;  %s17_s27 = int_to_ptr.vmem [resolvable:$true] %s16_s27 }
  0x15   :  { %p262_p9 = scmp.lt.u32.totalorder %s258_s30, %s427_s0 }
  0x17   :  { %p264_p10 = pnand %p262_p9, %p259_p8 }
  0x19   :  { %267 = shalt.err (!%p264_p10)
}
  0x1a   :  { %s268_s8 = scalar_lea.vmem %s17_s27, 1024  ;;  %p273_p12 = scmp.lt.s32.totalorder %s17_s27, %s17_s27 }
  0x1b   :  { %p269_p11 = scmp.ne.s32.totalorder %s17_s27, %s268_s8  ;;  %p274_p13 = scmp.lt.s32.totalorder %s268_s8, %s268_s8 }
  0x1d   :  { %p275_p0 = por %p274_p13, %p273_p12 }
  0x1f   :  { %p276_p1 = pnand %p275_p0, %p269_p11 }
  0x21   :  { %279 = shalt.err (!%p276_p1)
}
  0x22   :  { %s334_s1 = smov 128   ;;  %s335_s9 = smov 8  }
  0x23   :  { %22 = dma.hbm_to_vmem [thread:$0]  %s427_s0, 1024, %s17_s27, [#allocation3], %s334_s1, %s334_s1, %s335_s9  }
  0x24   :  { %s336_s12 = smov [#allocation7]   ;;  %s280_s16 = scalar_lea.hbm %s429_s2, 16 }
  0x25   :  { %s41_s13 = sshll.u32 %s336_s12, 4  ;;  %p281_p2 = scmp.ne.s32.totalorder %s429_s2, %s280_s16  ;;  %s42_s13 = int_to_ptr.vmem [resolvable:$true] %s41_s13 }
  0x26   :  { %p284_p3 = scmp.lt.u32.totalorder %s280_s16, %s429_s2 }
  0x28   :  { %p286_p4 = pnand %p284_p3, %p281_p2 }
  0x2a   :  { %289 = shalt.err (!%p286_p4)
}
  0x2b   :  { %s290_s21 = scalar_lea.vmem %s42_s13, 16  ;;  %s294_s0 = scalar_lea.vmem %s42_s13, 32 }
  0x2c   :  { %p291_p5 = scmp.ne.s32.totalorder %s42_s13, %s290_s21  ;;  %p295_p6 = scmp.lt.s32.totalorder %s42_s13, %s42_s13 }
  0x2d   :  { %p296_p7 = scmp.lt.s32.totalorder %s294_s0, %s290_s21 }
  0x2f   :  { %p297_p8 = por %p296_p7, %p295_p6 }
  0x31   :  { %p298_p9 = pnand %p297_p8, %p291_p5 }
  0x33   :  { %301 = shalt.err (!%p298_p9)
}
  0x34   :  { %44 = dma.hbm_to_vmem [thread:$0]  %s429_s2, 16, %s42_s13, [#allocation6]  }
  0x35   :  { %324 = dma.done.wait [#allocation3], 1024  }
  0x36   :  { %325 = vsyncadd [#allocation3], 4294966272 }
  0x37   :  { %326 = dma.done.wait [#allocation6], 208  }
  0x38   :  { %327 = vsyncadd [#allocation6], 4294967088  ;;  %v234_v0 = vld [vmem:[#allocation5] sm:$0xff]   ;;  %vm99_vm0 = vcmask 1040384   ;;  %v56_v3 = vld [vmem:[#allocation2 + $0x8] sm:$0xff]  ;;  %vm86_vm1 = vcmask 146432  }
  0x39   :  { %v235_v1 = vld [vmem:[#allocation5 + $0x8] ss:$0 sps:$4 sm:$0x11]   ;;  %v55_v2 = vld [vmem:[#allocation2] sm:$0xff]  ;;  %208 = vmatprep.subr.bf16.mxu0 %v234_v0  ;;  %220 = vmatprep.subr.bf16.mxu1 %v234_v0  ;;  %v57_v8 = vld [vmem:[#allocation2 + $0x10] sm:$0xff]  ;;  %vm168_vm2 = vcmask 48128  }
  0x3a   :  { %v59_v4 = vld [vmem:[#allocation2 + $0x20] sm:$0xff]  ;;  %v60_v5 = vld [vmem:[#allocation2 + $0x28] sm:$0xff]  ;;  %209 = vmatpush3.bf16.msra.mxu0 %v234_v0  ;;  %222 = vmatpush3.bf16.msra.mxu1 %v234_v0  ;;  %v63_v6 = vpack.c.bf16 %v56_v3, %v55_v2  ;;  %v58_v9 = vld [vmem:[#allocation2 + $0x18] sm:$0xff]  ;;  %v101_v11 = vsel %vm99_vm0, %v235_v1, 0  ;;  %s337_s2 = smov [#allocation8]  }
  0x3b   :  { %v65_v7 = vpack.c.bf16 %v60_v5, %v59_v4  ;;  %v61_v10 = vld [vmem:[#allocation2 + $0x30] sm:$0xff]  ;;  %224 = vmatprep.subr.msk.bf16.mxu0 %vm99_vm0, %v235_v1  ;;  %225 = vmatprep.subr.msk.bf16.mxu1 %vm99_vm0, %v235_v1  ;;  %v62_v12 = vld [vmem:[#allocation2 + $0x38] sm:$0xff]  ;;  %v64_v13 = vpack.c.bf16 %v58_v9, %v57_v8  ;;  %v195_v15 = vld [vmem:[#allocation7] ss:$0 sm:$0xff]  ;;  %s182_s24 = sshll.u32 %s337_s2, 4  ;;  %s183_s24 = int_to_ptr.vmem [resolvable:$true] %s182_s24 }
  0x3c   :  { %212 = vmatprep.mubr.msk.bf16.mxu0 %vm86_vm1, %v63_v6  ;;  %v66_v14 = vpack.c.bf16 %v62_v12, %v61_v10  ;;  %s302_s25 = scalar_lea.vmem %s183_s24, 1024  ;;  %p307_p11 = scmp.lt.s32.totalorder %s183_s24, %s183_s24 }
  0x3d   :  { %216 = vmatprep.mubr.msk.bf16.mxu1 %vm86_vm1, %v65_v7  ;;  %p303_p10 = scmp.ne.s32.totalorder %s183_s24, %s302_s25  ;;  %p308_p12 = scmp.lt.s32.totalorder %s302_s25, %s302_s25 }
  0x3e   :  { %211 = vmatpush3.bf16.msra.mxu0 %v101_v11  ;;  %223 = vmatpush3.bf16.msra.mxu1 %v101_v11 }
  0x3f   :  { %p309_p13 = por %p308_p12, %p307_p11 }
  0x41   :  { %213 = vmatmul.mubr.msk.bf16.vlgmr.msra.gmra.mrb[0].mxu0 %vm86_vm1, %v64_v13  ;;  %217 = vmatmul.mubr.msk.bf16.vlgmr.msra.gmra.mrb[0].mxu1 %vm86_vm1, %v66_v14  ;;  %p310_p0 = pnand %p309_p13, %p303_p10 }
 0x114   :  { %v214_v16 = vpop.f32.mrb[0].mxu0  ;;  %v218_v17 = vpop.f32.mrb[0].mxu1 }
 0x115   :  { %v146_v18 = vadd.f32 %v214_v16, %v195_v15  ;;  %v162_v19 = vadd.f32 %v218_v17, %v195_v15  ;;  %v137_v20 = vpop.f32.mrb[1].mxu0  ;;  %v153_v21 = vpop.f32.mrb[1].mxu1 }
 0x116   :  { %v138_v22 = vadd.f32 %v195_v15, %v137_v20  ;;  %v154_v23 = vadd.f32 %v195_v15, %v153_v21  ;;  %v215_v24 = vpop.f32.mrb[2].mxu0  ;;  %v219_v25 = vpop.f32.mrb[2].mxu1 }
 0x117   :  { %171 = vst.msk [vmem:[#allocation8 + $0x10] sm:$0xff] %vm168_vm2, %v146_v18  ;;  %175 = vst.msk [vmem:[#allocation8 + $0x30] sm:$0xff] %vm168_vm2, %v162_v19  ;;  %v149_v26 = vadd.f32 %v215_v24, %v195_v15  ;;  %v165_v27 = vadd.f32 %v219_v25, %v195_v15  ;;  %v140_v28 = vpop.f32.mrb[3].mxu0  ;;  %v156_v29 = vpop.f32.mrb[3].mxu1 }
 0x118   :  { %169 = vst.msk [vmem:[#allocation8] sm:$0xff] %vm168_vm2, %v138_v22  ;;  %173 = vst.msk [vmem:[#allocation8 + $0x20] sm:$0xff] %vm168_vm2, %v154_v23  ;;  %v141_v30 = vadd.f32 %v195_v15, %v140_v28  ;;  %v157_v31 = vadd.f32 %v195_v15, %v156_v29 }
 0x119   :  { %172 = vst.msk [vmem:[#allocation8 + $0x18] sm:$0xff] %vm168_vm2, %v149_v26  ;;  %176 = vst.msk [vmem:[#allocation8 + $0x38] sm:$0xff] %vm168_vm2, %v165_v27 }
 0x11a   :  { %170 = vst.msk [vmem:[#allocation8 + $0x8] sm:$0xff] %vm168_vm2, %v141_v30  ;;  %174 = vst.msk [vmem:[#allocation8 + $0x28] sm:$0xff] %vm168_vm2, %v157_v31 }
 0x11b   :  { %313 = shalt.err (!%p310_p0)
}
 0x11c   :  { %s314_s28 = scalar_lea.hbm %s430_s3, 1024 }
 0x11d   :  { %p315_p1 = scmp.ne.s32.totalorder %s430_s3, %s314_s28  ;;  %p318_p2 = scmp.lt.u32.totalorder %s314_s28, %s430_s3 }
 0x11f   :  { %p320_p3 = pnand %p318_p2, %p315_p1 }
 0x121   :  { %323 = shalt.err (!%p320_p3)
}
 0x122   :  { %188 = dma.vmem_to_hbm [thread:$0]  %s183_s24, 1024, %s430_s3, [#allocation4], %s334_s1, %s334_s1, %s335_s9  }
 0x123   :  { %328 = dma.done.wait [#allocation4], 1024  }
 0x124   :  { %329 = vsyncadd [#allocation4], 4294966272 }
 0x125   :  { %192 = vsyncpa [#allocation3], 1 }
 0x126   :  { %193 = vsyncpa [#allocation6], 1 }
 0x127   :  { %194 = vsyncpa [#allocation4], 1 }

// kernel: smlpnet_forward.39
= control target key start
LH: loop header
LB: loop body
LE: loop exit
PB: predicated region body
PF: predicated region fallthrough
CT: control target
= control target key end

     0   :  { %10 = vsyncpa [#allocation3], 0  ;;  %s638_s0 = inlined_call_operand.hbm [shape: f32[64,6], index: 0, kind: input, shape index: {}]   ;;  %s639_s1 = inlined_call_operand.hbm [shape: bf16[6,18], index: 1, kind: input, shape index: {}]   ;;  %s640_s2 = inlined_call_operand.hbm [shape: f32[1,18], index: 2, kind: input, shape index: {}]   ;;  %s641_s3 = inlined_call_operand.hbm [shape: f32[64,1], index: 3, kind: input, shape index: {}]   ;;  %s642_s4 = inlined_call_operand.hbm [shape: f32[64,1], index: 4, kind: input, shape index: {}]   ;;  %s643_s5 = inlined_call_operand.hbm [shape: f32[64,18], index: 5, kind: output, shape index: {}]  }
   0x1   :  { %11 = vsyncpa [#allocation6], 0 }
   0x2   :  { %12 = vsyncpa [#allocation9], 0 }
   0x3   :  { %13 = vsyncpa [#allocation4], 0  ;;  %s503_s18 = smov [#allocation5]   ;;  %s363_s22 = scalar_lea.hbm %s639_s1, 64 }
   0x4   :  { %s32_s19 = sshll.u32 %s503_s18, 4  ;;  %p364_p0 = scmp.ne.s32.totalorder %s639_s1, %s363_s22  ;;  %s33_s19 = int_to_ptr.vmem [resolvable:$true] %s32_s19 }
   0x5   :  { %p367_p1 = scmp.lt.u32.totalorder %s363_s22, %s639_s1 }
   0x7   :  { %p369_p2 = pnand %p367_p1, %p364_p0 }
   0x9   :  { %372 = shalt.err (!%p369_p2)
}
   0xa   :  { %s373_s27 = scalar_lea.vmem %s33_s19, 64  ;;  %p378_p4 = scmp.lt.s32.totalorder %s33_s19, %s33_s19 }
   0xb   :  { %p374_p3 = scmp.ne.s32.totalorder %s33_s19, %s373_s27  ;;  %p379_p5 = scmp.lt.s32.totalorder %s373_s27, %s373_s27 }
   0xd   :  { %p380_p6 = por %p379_p5, %p378_p4 }
   0xf   :  { %p381_p7 = pnand %p380_p6, %p374_p3 }
  0x11   :  { %384 = shalt.err (!%p381_p7)
}
  0x12   :  { %35 = dma.hbm_to_vmem [thread:$0]  %s639_s1, 64, %s33_s19, [#allocation6]  }
  0x13   :  { %s504_s30 = smov [#allocation8]   ;;  %s505_s7 = smov [#allocation2]  }
  0x14   :  { %s51_s6 = sshll.u32 %s504_s30, 4  ;;  %s19_s8 = sshll.u32 %s505_s7, 4  ;;  %s52_s6 = int_to_ptr.vmem [resolvable:$true] %s51_s6  ;;  %s20_s8 = int_to_ptr.vmem [resolvable:$true] %s19_s8 }
  0x15   :  { %s385_s11 = scalar_lea.hbm %s641_s3, 1024 }
  0x16   :  { %p386_p8 = scmp.ne.s32.totalorder %s641_s3, %s385_s11  ;;  %p389_p9 = scmp.lt.u32.totalorder %s385_s11, %s641_s3 }
  0x18   :  { %p391_p10 = pnand %p389_p9, %p386_p8 }
  0x1a   :  { %394 = shalt.err (!%p391_p10)
}
  0x1b   :  { %s395_s1 = scalar_lea.vmem %s52_s6, 1024  ;;  %p400_p12 = scmp.lt.s32.totalorder %s52_s6, %s52_s6 }
  0x1c   :  { %p396_p11 = scmp.ne.s32.totalorder %s52_s6, %s395_s1  ;;  %p401_p13 = scmp.lt.s32.totalorder %s395_s1, %s395_s1 }
  0x1e   :  { %p402_p0 = por %p401_p13, %p400_p12 }
  0x20   :  { %p403_p1 = pnand %p402_p0, %p396_p11 }
  0x22   :  { %406 = shalt.err (!%p403_p1)
}
  0x23   :  { %s506_s16 = smov 128   ;;  %s507_s17 = smov 8  }
  0x24   :  { %57 = dma.hbm_to_vmem [thread:$0]  %s641_s3, 1024, %s52_s6, [#allocation9], %s506_s16, %s506_s16, %s507_s17  }
  0x25   :  { %s407_s22 = scalar_lea.hbm %s638_s0, 1024 }
  0x26   :  { %p408_p2 = scmp.ne.s32.totalorder %s638_s0, %s407_s22  ;;  %p411_p3 = scmp.lt.u32.totalorder %s407_s22, %s638_s0 }
  0x28   :  { %p413_p4 = pnand %p411_p3, %p408_p2 }
  0x2a   :  { %416 = shalt.err (!%p413_p4)
}
  0x2b   :  { %s417_s27 = scalar_lea.vmem %s20_s8, 1024  ;;  %p422_p6 = scmp.lt.s32.totalorder %s20_s8, %s20_s8 }
  0x2c   :  { %p418_p5 = scmp.ne.s32.totalorder %s20_s8, %s417_s27  ;;  %p423_p7 = scmp.lt.s32.totalorder %s417_s27, %s417_s27 }
  0x2e   :  { %p424_p8 = por %p423_p7, %p422_p6 }
  0x30   :  { %p425_p9 = pnand %p424_p8, %p418_p5 }
  0x32   :  { %428 = shalt.err (!%p425_p9)
}
  0x33   :  { %25 = dma.hbm_to_vmem [thread:$0]  %s638_s0, 1024, %s20_s8, [#allocation3], %s506_s16, %s506_s16, %s507_s17  }
  0x34   :  { %s508_s29 = smov [#allocation7]   ;;  %s509_s6 = smov [#allocation10]  }
  0x35   :  { %s42_s30 = sshll.u32 %s508_s29, 4  ;;  %s63_s7 = sshll.u32 %s509_s6, 4  ;;  %s43_s30 = int_to_ptr.vmem [resolvable:$true] %s42_s30  ;;  %s64_s7 = int_to_ptr.vmem [resolvable:$true] %s63_s7 }
  0x36   :  { %s429_s11 = scalar_lea.hbm %s640_s2, 16 }
  0x37   :  { %p430_p10 = scmp.ne.s32.totalorder %s640_s2, %s429_s11  ;;  %p433_p11 = scmp.lt.u32.totalorder %s429_s11, %s640_s2 }
  0x39   :  { %p435_p12 = pnand %p433_p11, %p430_p10 }
  0x3b   :  { %438 = shalt.err (!%p435_p12)
}
  0x3c   :  { %s439_s0 = scalar_lea.vmem %s43_s30, 16  ;;  %s443_s8 = scalar_lea.vmem %s43_s30, 32 }
  0x3d   :  { %p440_p13 = scmp.ne.s32.totalorder %s43_s30, %s439_s0  ;;  %p444_p0 = scmp.lt.s32.totalorder %s43_s30, %s43_s30 }
  0x3e   :  { %p445_p1 = scmp.lt.s32.totalorder %s443_s8, %s439_s0 }
  0x40   :  { %p446_p2 = por %p445_p1, %p444_p0 }
  0x42   :  { %p447_p3 = pnand %p446_p2, %p440_p13 }
  0x44   :  { %450 = shalt.err (!%p447_p3)
}
  0x45   :  { %45 = dma.hbm_to_vmem [thread:$0]  %s640_s2, 16, %s43_s30, [#allocation6]  }
  0x46   :  { %s451_s21 = scalar_lea.hbm %s642_s4, 1024 }
  0x47   :  { %p452_p4 = scmp.ne.s32.totalorder %s642_s4, %s451_s21  ;;  %p455_p5 = scmp.lt.u32.totalorder %s451_s21, %s642_s4 }
  0x49   :  { %p457_p6 = pnand %p455_p5, %p452_p4 }
  0x4b   :  { %460 = shalt.err (!%p457_p6)
}
  0x4c   :  { %s461_s26 = scalar_lea.vmem %s64_s7, 1024  ;;  %p466_p8 = scmp.lt.s32.totalorder %s64_s7, %s64_s7 }
  0x4d   :  { %p462_p7 = scmp.ne.s32.totalorder %s64_s7, %s461_s26  ;;  %p467_p9 = scmp.lt.s32.totalorder %s461_s26, %s461_s26 }
  0x4f   :  { %p468_p10 = por %p467_p9, %p466_p8 }
  0x51   :  { %p469_p11 = pnand %p468_p10, %p462_p7 }
  0x53   :  { %472 = shalt.err (!%p469_p11)
}
  0x54   :  { %69 = dma.hbm_to_vmem [thread:$0]  %s642_s4, 1024, %s64_s7, [#allocation9], %s506_s16, %s506_s16, %s507_s17  }
  0x55   :  { %495 = dma.done.wait [#allocation3], 1024  }
  0x56   :  { %496 = vsyncadd [#allocation3], 4294966272 }
  0x57   :  { %497 = dma.done.wait [#allocation6], 80  }
  0x58   :  { %498 = vsyncadd [#allocation6], 4294967216 }
  0x59   :  { %499 = dma.done.wait [#allocation9], 2048  }
  0x5a   :  { %500 = vsyncadd [#allocation9], 4294965248  ;;  %v510_v0 = vmov 0   ;;  %vm119_vm0 = vcmask 1042432   ;;  %v98_v1 = vld [vmem:[#allocation5] sm:$0x7] }
  0x5b   :  { %362 = vset.pattern.permute.xlu1 %v510_v0  ;;  %361 = vset.pattern.permute.xlu0 %v510_v0  ;;  %v86_v2 = vld [vmem:[#allocation2] sm:$0xff]  ;;  %v87_v3 = vld [vmem:[#allocation2 + $0x8] sm:$0xff]  ;;  %vm106_vm1 = vcmask 48128   ;;  %v121_v4 = vsel %vm119_vm0, %v98_v1, 0  ;;  %v88_v8 = vld [vmem:[#allocation2 + $0x10] sm:$0xff]  ;;  %vm300_vm2 = vcmask 146432  }
  0x5c   :  { %350 = vmatprep.subr.msk.bf16.mxu0 %vm119_vm0, %v98_v1  ;;  %351 = vmatprep.subr.msk.bf16.mxu1 %vm119_vm0, %v98_v1  ;;  %v94_v5 = vpack.c.bf16 %v87_v3, %v86_v2  ;;  %v90_v6 = vld [vmem:[#allocation2 + $0x20] sm:$0xff]  ;;  %v91_v7 = vld [vmem:[#allocation2 + $0x28] sm:$0xff]  ;;  %v89_v10 = vld [vmem:[#allocation2 + $0x18] sm:$0xff]  ;;  %s511_s4 = smov [#allocation11]  }
  0x5d   :  { %339 = vmatpush3.bf16.msra.mxu0 %v121_v4  ;;  %349 = vmatpush3.bf16.msra.mxu1 %v121_v4  ;;  %v96_v9 = vpack.c.bf16 %v91_v7, %v90_v6  ;;  %v92_v11 = vld [vmem:[#allocation2 + $0x30] sm:$0xff]  ;;  %v93_v12 = vld [vmem:[#allocation2 + $0x38] sm:$0xff]  ;;  %v95_v13 = vpack.c.bf16 %v89_v10, %v88_v8  ;;  %v188_v16 = vld [vmem:[#allocation8] sm:$0xff]  ;;  %s314_s3 = sshll.u32 %s511_s4, 4  ;;  %s315_s3 = int_to_ptr.vmem [resolvable:$true] %s314_s3 }
  0x5e   :  { %340 = vmatprep.mubr.msk.bf16.mxu0 %vm106_vm1, %v94_v5  ;;  %v97_v14 = vpack.c.bf16 %v93_v12, %v92_v11  ;;  %v190_v15 = vld [vmem:[#allocation8 + $0x10] sm:$0xff]  ;;  %v191_v17 = vld [vmem:[#allocation8 + $0x18] sm:$0xff]  ;;  %198 = vperm.xlu0 %361, %v188_v16   ;;  %v189_v18 = vld [vmem:[#allocation8 + $0x8] sm:$0xff]  ;;  %s473_s28 = scalar_lea.vmem %s315_s3, 1024  ;;  %p478_p13 = scmp.lt.s32.totalorder %s315_s3, %s315_s3 }
  0x5f   :  { %344 = vmatprep.mubr.msk.bf16.mxu1 %vm106_vm1, %v96_v9  ;;  %208 = vperm.xlu1 %362, %v190_v15   ;;  %v193_v19 = vld [vmem:[#allocation8 + $0x28] sm:$0xff]  ;;  %v192_v20 = vld [vmem:[#allocation8 + $0x20] sm:$0xff]  ;;  %v195_v21 = vld [vmem:[#allocation8 + $0x38] sm:$0xff]  ;;  %p474_p12 = scmp.ne.s32.totalorder %s315_s3, %s473_s28  ;;  %p479_p0 = scmp.lt.s32.totalorder %s473_s28, %s473_s28 }
  0x60   :  { %341 = vmatmul.mubr.msk.bf16.vlgmr.msra.gmra.mrb[0].mxu0 %vm106_vm1, %v95_v13  ;;  %345 = vmatmul.mubr.msk.bf16.vlgmr.msra.gmra.mrb[0].mxu1 %vm106_vm1, %v97_v14  ;;  %v194_v22 = vld [vmem:[#allocation8 + $0x30] sm:$0xff]  ;;  %v245_v23 = vld [vmem:[#allocation10 + $0x8] sm:$0xff]  ;;  %v244_v24 = vld [vmem:[#allocation10] sm:$0xff] }
  0x61   :  { %v247_v25 = vld [vmem:[#allocation10 + $0x18] sm:$0xff]  ;;  %v246_v26 = vld [vmem:[#allocation10 + $0x10] sm:$0xff]  ;;  %v249_v27 = vld [vmem:[#allocation10 + $0x28] sm:$0xff]  ;;  %p480_p1 = por %p479_p0, %p478_p13 }
  0x62   :  { %203 = vperm.xlu0 %361, %v189_v18   ;;  %v248_v28 = vld [vmem:[#allocation10 + $0x20] sm:$0xff]  ;;  %v251_v29 = vld [vmem:[#allocation10 + $0x38] sm:$0xff]  ;;  %v250_v30 = vld [vmem:[#allocation10 + $0x30] sm:$0xff] }
  0x63   :  { %213 = vperm.xlu1 %362, %v191_v17   ;;  %v328_v44 = vld [vmem:[#allocation7] ss:$0 sm:$0xff]  ;;  %p481_p2 = pnand %p480_p1, %p474_p12 }
  0x66   :  { %218 = vperm.xlu0 %361, %v192_v20  }
  0x67   :  { %223 = vperm.xlu1 %362, %v193_v19  }
  0x6a   :  { %228 = vperm.xlu0 %361, %v194_v22  }
  0x6b   :  { %233 = vperm.xlu1 %362, %v195_v21  }
  0x6e   :  { %254 = vperm.xlu0 %361, %v244_v24  }
  0x6f   :  { %259 = vperm.xlu1 %362, %v245_v23  }
  0x72   :  { %264 = vperm.xlu0 %361, %v246_v26  }
  0x73   :  { %269 = vperm.xlu1 %362, %v247_v25  }
  0x76   :  { %274 = vperm.xlu0 %361, %v248_v28  }
  0x77   :  { %279 = vperm.xlu1 %362, %v249_v27  }
  0x7a   :  { %284 = vperm.xlu0 %361, %v250_v30  }
  0x7b   :  { %289 = vperm.xlu1 %362, %v251_v29  }
  0xdd   :  { %v199_v31 = vpop.permute.xlu0 %198 }
  0xde   :  { %v209_v32 = vpop.permute.xlu1 %208 }
  0xe1   :  { %v204_v33 = vpop.permute.xlu0 %203 }
  0xe2   :  { %v214_v34 = vpop.permute.xlu1 %213 }
  0xe5   :  { %v219_v35 = vpop.permute.xlu0 %218 }
  0xe6   :  { %v224_v36 = vpop.permute.xlu1 %223 }
  0xe9   :  { %v229_v37 = vpop.permute.xlu0 %228 }
  0xea   :  { %v234_v38 = vpop.permute.xlu1 %233 }
  0xed   :  { %v255_v39 = vpop.permute.xlu0 %254 }
  0xee   :  { %v260_v40 = vpop.permute.xlu1 %259 }
  0xf1   :  { %v265_v41 = vpop.permute.xlu0 %264 }
  0xf2   :  { %v270_v42 = vpop.permute.xlu1 %269 }
  0xf5   :  { %v275_v43 = vpop.permute.xlu0 %274 }
  0xf6   :  { %v280_v45 = vpop.permute.xlu1 %279 }
  0xf9   :  { %v285_v62 = vpop.permute.xlu0 %284 }
  0xfa   :  { %v290_v7 = vpop.permute.xlu1 %289 }
 0x133   :  { %v342_v46 = vpop.f32.mrb[0].mxu0  ;;  %v346_v47 = vpop.f32.mrb[0].mxu1 }
 0x134   :  { %v166_v48 = vadd.f32 %v342_v46, %v328_v44  ;;  %v182_v49 = vadd.f32 %v346_v47, %v328_v44  ;;  %v157_v50 = vpop.f32.mrb[1].mxu0  ;;  %v173_v51 = vpop.f32.mrb[1].mxu1 }
 0x135   :  { %v158_v52 = vadd.f32 %v328_v44, %v157_v50  ;;  %v174_v53 = vadd.f32 %v328_v44, %v173_v51  ;;  %v343_v54 = vpop.f32.mrb[2].mxu0  ;;  %v347_v55 = vpop.f32.mrb[2].mxu1 }
 0x136   :  { %v238_v56 = vmul.f32 %v209_v32, %v166_v48  ;;  %v242_v57 = vmul.f32 %v229_v37, %v182_v49  ;;  %v169_v58 = vadd.f32 %v343_v54, %v328_v44  ;;  %v185_v59 = vadd.f32 %v347_v55, %v328_v44  ;;  %v160_v60 = vpop.f32.mrb[3].mxu0  ;;  %v176_v61 = vpop.f32.mrb[3].mxu1 }
 0x137   :  { %v236_v63 = vmul.f32 %v199_v31, %v158_v52  ;;  %v240_v0 = vmul.f32 %v219_v35, %v174_v53  ;;  %v161_v1 = vadd.f32 %v328_v44, %v160_v60  ;;  %v177_v2 = vadd.f32 %v328_v44, %v176_v61 }
 0x138   :  { %v294_v3 = vadd.f32 %v265_v41, %v238_v56  ;;  %v298_v4 = vadd.f32 %v285_v62, %v242_v57  ;;  %v239_v5 = vmul.f32 %v214_v34, %v169_v58  ;;  %v243_v6 = vmul.f32 %v234_v38, %v185_v59 }
 0x139   :  { %v292_v8 = vadd.f32 %v255_v39, %v236_v63  ;;  %v296_v9 = vadd.f32 %v275_v43, %v240_v0  ;;  %v237_v10 = vmul.f32 %v204_v33, %v161_v1  ;;  %v241_v11 = vmul.f32 %v224_v36, %v177_v2 }
 0x13a   :  { %303 = vst.msk [vmem:[#allocation11 + $0x10] sm:$0xff] %vm300_vm2, %v294_v3  ;;  %307 = vst.msk [vmem:[#allocation11 + $0x30] sm:$0xff] %vm300_vm2, %v298_v4  ;;  %v295_v12 = vadd.f32 %v270_v42, %v239_v5  ;;  %v299_v13 = vadd.f32 %v290_v7, %v243_v6 }
 0x13b   :  { %301 = vst.msk [vmem:[#allocation11] sm:$0xff] %vm300_vm2, %v292_v8  ;;  %305 = vst.msk [vmem:[#allocation11 + $0x20] sm:$0xff] %vm300_vm2, %v296_v9  ;;  %v293_v14 = vadd.f32 %v260_v40, %v237_v10  ;;  %v297_v15 = vadd.f32 %v280_v45, %v241_v11 }
 0x13c   :  { %304 = vst.msk [vmem:[#allocation11 + $0x18] sm:$0xff] %vm300_vm2, %v295_v12  ;;  %308 = vst.msk [vmem:[#allocation11 + $0x38] sm:$0xff] %vm300_vm2, %v299_v13 }
 0x13d   :  { %302 = vst.msk [vmem:[#allocation11 + $0x8] sm:$0xff] %vm300_vm2, %v293_v14  ;;  %306 = vst.msk [vmem:[#allocation11 + $0x28] sm:$0xff] %vm300_vm2, %v297_v15 }
 0x13e   :  { %484 = shalt.err (!%p481_p2)
}
 0x13f   :  { %s485_s6 = scalar_lea.hbm %s643_s5, 1024 }
 0x140   :  { %p486_p3 = scmp.ne.s32.totalorder %s643_s5, %s485_s6  ;;  %p489_p4 = scmp.lt.u32.totalorder %s485_s6, %s643_s5 }
 0x142   :  { %p491_p5 = pnand %p489_p4, %p486_p3 }
 0x144   :  { %494 = shalt.err (!%p491_p5)
}
 0x145   :  { %320 = dma.vmem_to_hbm [thread:$0]  %s315_s3, 1024, %s643_s5, [#allocation4], %s506_s16, %s506_s16, %s507_s17  }
 0x146   :  { %501 = dma.done.wait [#allocation4], 1024  }
 0x147   :  { %502 = vsyncadd [#allocation4], 4294966272 }
 0x148   :  { %324 = vsyncpa [#allocation3], 1 }
 0x149   :  { %325 = vsyncpa [#allocation6], 1 }
 0x14a   :  { %326 = vsyncpa [#allocation9], 1 }
 0x14b   :  { %327 = vsyncpa [#allocation4], 1 }

// kernel: smlpnet_forward.41
= control target key start
LH: loop header
LB: loop body
LE: loop exit
PB: predicated region body
PF: predicated region fallthrough
CT: control target
= control target key end

     0   :  { %10 = vsyncpa [#allocation3], 0  ;;  %s667_s0 = inlined_call_operand.hbm [shape: f32[64,18], index: 0, kind: input, shape index: {}]   ;;  %s668_s1 = inlined_call_operand.hbm [shape: bf16[18,6], index: 1, kind: input, shape index: {}]   ;;  %s669_s2 = inlined_call_operand.hbm [shape: f32[1,6], index: 2, kind: input, shape index: {}]   ;;  %s670_s3 = inlined_call_operand.hbm [shape: f32[64,1], index: 3, kind: input, shape index: {}]   ;;  %s671_s4 = inlined_call_operand.hbm [shape: f32[64,1], index: 4, kind: input, shape index: {}]   ;;  %s672_s5 = inlined_call_operand.hbm [shape: f32[64,6], index: 5, kind: output, shape index: {}]  }
   0x1   :  { %11 = vsyncpa [#allocation6], 0 }
   0x2   :  { %12 = vsyncpa [#allocation9], 0 }
   0x3   :  { %13 = vsyncpa [#allocation4], 0  ;;  %s527_s18 = smov [#allocation5]   ;;  %s387_s22 = scalar_lea.hbm %s668_s1, 192 }
   0x4   :  { %s31_s19 = sshll.u32 %s527_s18, 4  ;;  %p388_p0 = scmp.ne.s32.totalorder %s668_s1, %s387_s22  ;;  %s32_s19 = int_to_ptr.vmem [resolvable:$true] %s31_s19 }
   0x5   :  { %p391_p1 = scmp.lt.u32.totalorder %s387_s22, %s668_s1 }
   0x7   :  { %p393_p2 = pnand %p391_p1, %p388_p0 }
   0x9   :  { %396 = shalt.err (!%p393_p2)
}
   0xa   :  { %s397_s27 = scalar_lea.vmem %s32_s19, 192  ;;  %p402_p4 = scmp.lt.s32.totalorder %s32_s19, %s32_s19 }
   0xb   :  { %p398_p3 = scmp.ne.s32.totalorder %s32_s19, %s397_s27  ;;  %p403_p5 = scmp.lt.s32.totalorder %s397_s27, %s397_s27 }
   0xd   :  { %p404_p6 = por %p403_p5, %p402_p4 }
   0xf   :  { %p405_p7 = pnand %p404_p6, %p398_p3 }
  0x11   :  { %408 = shalt.err (!%p405_p7)
}
  0x12   :  { %s528_s28 = smov 64   ;;  %s529_s29 = smov 4  }
  0x13   :  { %37 = dma.hbm_to_vmem [thread:$0]  %s668_s1, 192, %s32_s19, [#allocation6], %s528_s28, %s528_s28, %s529_s29  }
  0x14   :  { %s530_s7 = smov [#allocation8]   ;;  %s531_s9 = smov [#allocation2]  }
  0x15   :  { %s53_s8 = sshll.u32 %s530_s7, 4  ;;  %s19_s10 = sshll.u32 %s531_s9, 4  ;;  %s54_s8 = int_to_ptr.vmem [resolvable:$true] %s53_s8  ;;  %s20_s10 = int_to_ptr.vmem [resolvable:$true] %s19_s10 }
  0x16   :  { %s409_s13 = scalar_lea.hbm %s670_s3, 1024 }
  0x17   :  { %p410_p8 = scmp.ne.s32.totalorder %s670_s3, %s409_s13  ;;  %p413_p9 = scmp.lt.u32.totalorder %s409_s13, %s670_s3 }
  0x19   :  { %p415_p10 = pnand %p413_p9, %p410_p8 }
  0x1b   :  { %418 = shalt.err (!%p415_p10)
}
  0x1c   :  { %s419_s1 = scalar_lea.vmem %s54_s8, 1024  ;;  %p424_p12 = scmp.lt.s32.totalorder %s54_s8, %s54_s8 }
  0x1d   :  { %p420_p11 = scmp.ne.s32.totalorder %s54_s8, %s419_s1  ;;  %p425_p13 = scmp.lt.s32.totalorder %s419_s1, %s419_s1 }
  0x1f   :  { %p426_p0 = por %p425_p13, %p424_p12 }
  0x21   :  { %p427_p1 = pnand %p426_p0, %p420_p11 }
  0x23   :  { %430 = shalt.err (!%p427_p1)
}
  0x24   :  { %s532_s18 = smov 128   ;;  %s533_s19 = smov 8  }
  0x25   :  { %59 = dma.hbm_to_vmem [thread:$0]  %s670_s3, 1024, %s54_s8, [#allocation9], %s532_s18, %s532_s18, %s533_s19  }
  0x26   :  { %s431_s24 = scalar_lea.hbm %s667_s0, 1024 }
  0x27   :  { %p432_p2 = scmp.ne.s32.totalorder %s667_s0, %s431_s24  ;;  %p435_p3 = scmp.lt.u32.totalorder %s431_s24, %s667_s0 }
  0x29   :  { %p437_p4 = pnand %p435_p3, %p432_p2 }
  0x2b   :  { %440 = shalt.err (!%p437_p4)
}
  0x2c   :  { %s441_s29 = scalar_lea.vmem %s20_s10, 1024  ;;  %p446_p6 = scmp.lt.s32.totalorder %s20_s10, %s20_s10 }
  0x2d   :  { %p442_p5 = scmp.ne.s32.totalorder %s20_s10, %s441_s29  ;;  %p447_p7 = scmp.lt.s32.totalorder %s441_s29, %s441_s29 }
  0x2f   :  { %p448_p8 = por %p447_p7, %p446_p6 }
  0x31   :  { %p449_p9 = pnand %p448_p8, %p442_p5 }
  0x33   :  { %452 = shalt.err (!%p449_p9)
}
  0x34   :  { %25 = dma.hbm_to_vmem [thread:$0]  %s667_s0, 1024, %s20_s10, [#allocation3], %s532_s18, %s532_s18, %s533_s19  }
  0x35   :  { %s534_s6 = smov [#allocation7]   ;;  %s535_s8 = smov [#allocation10]  }
  0x36   :  { %s44_s7 = sshll.u32 %s534_s6, 4  ;;  %s65_s9 = sshll.u32 %s535_s8, 4  ;;  %s45_s7 = int_to_ptr.vmem [resolvable:$true] %s44_s7  ;;  %s66_s9 = int_to_ptr.vmem [resolvable:$true] %s65_s9 }
  0x37   :  { %s453_s13 = scalar_lea.hbm %s669_s2, 16 }
  0x38   :  { %p454_p10 = scmp.ne.s32.totalorder %s669_s2, %s453_s13  ;;  %p457_p11 = scmp.lt.u32.totalorder %s453_s13, %s669_s2 }
  0x3a   :  { %p459_p12 = pnand %p457_p11, %p454_p10 }
  0x3c   :  { %462 = shalt.err (!%p459_p12)
}
  0x3d   :  { %s463_s0 = scalar_lea.vmem %s45_s7, 16  ;;  %s467_s10 = scalar_lea.vmem %s45_s7, 32 }
  0x3e   :  { %p464_p13 = scmp.ne.s32.totalorder %s45_s7, %s463_s0  ;;  %p468_p0 = scmp.lt.s32.totalorder %s45_s7, %s45_s7 }
  0x3f   :  { %p469_p1 = scmp.lt.s32.totalorder %s467_s10, %s463_s0 }
  0x41   :  { %p470_p2 = por %p469_p1, %p468_p0 }
  0x43   :  { %p471_p3 = pnand %p470_p2, %p464_p13 }
  0x45   :  { %474 = shalt.err (!%p471_p3)
}
  0x46   :  { %47 = dma.hbm_to_vmem [thread:$0]  %s669_s2, 16, %s45_s7, [#allocation6]  }
  0x47   :  { %s475_s23 = scalar_lea.hbm %s671_s4, 1024 }
  0x48   :  { %p476_p4 = scmp.ne.s32.totalorder %s671_s4, %s475_s23  ;;  %p479_p5 = scmp.lt.u32.totalorder %s475_s23, %s671_s4 }
  0x4a   :  { %p481_p6 = pnand %p479_p5, %p476_p4 }
  0x4c   :  { %484 = shalt.err (!%p481_p6)
}
  0x4d   :  { %s485_s28 = scalar_lea.vmem %s66_s9, 1024  ;;  %p490_p8 = scmp.lt.s32.totalorder %s66_s9, %s66_s9 }
  0x4e   :  { %p486_p7 = scmp.ne.s32.totalorder %s66_s9, %s485_s28  ;;  %p491_p9 = scmp.lt.s32.totalorder %s485_s28, %s485_s28 }
  0x50   :  { %p492_p10 = por %p491_p9, %p490_p8 }
  0x52   :  { %p493_p11 = pnand %p492_p10, %p486_p7 }
  0x54   :  { %496 = shalt.err (!%p493_p11)
}
  0x55   :  { %71 = dma.hbm_to_vmem [thread:$0]  %s671_s4, 1024, %s66_s9, [#allocation9], %s532_s18, %s532_s18, %s533_s19  }
  0x56   :  { %519 = dma.done.wait [#allocation3], 1024  }
  0x57   :  { %520 = vsyncadd [#allocation3], 4294966272 }
  0x58   :  { %521 = dma.done.wait [#allocation6], 208  }
  0x59   :  { %522 = vsyncadd [#allocation6], 4294967088 }
  0x5a   :  { %523 = dma.done.wait [#allocation9], 2048  }
  0x5b   :  { %524 = vsyncadd [#allocation9], 4294965248  ;;  %v536_v0 = vmov 0   ;;  %v385_v1 = vld [vmem:[#allocation5] sm:$0xff]   ;;  %vm132_vm0 = vcmask 1040384   ;;  %v89_v4 = vld [vmem:[#allocation2 + $0x8] sm:$0xff] }
  0x5c   :  { %384 = vset.pattern.permute.xlu1 %v536_v0  ;;  %383 = vset.pattern.permute.xlu0 %v536_v0  ;;  %v386_v2 = vld [vmem:[#allocation5 + $0x8] ss:$0 sps:$4 sm:$0x11]   ;;  %v88_v3 = vld [vmem:[#allocation2] sm:$0xff]  ;;  %vm119_vm1 = vcmask 146432   ;;  %v90_v9 = vld [vmem:[#allocation2 + $0x10] sm:$0xff] }
  0x5d   :  { %354 = vmatprep.subr.bf16.mxu0 %v385_v1  ;;  %366 = vmatprep.subr.bf16.mxu1 %v385_v1  ;;  %v92_v5 = vld [vmem:[#allocation2 + $0x20] sm:$0xff]  ;;  %v93_v6 = vld [vmem:[#allocation2 + $0x28] sm:$0xff]  ;;  %v96_v7 = vpack.c.bf16 %v89_v4, %v88_v3  ;;  %v91_v10 = vld [vmem:[#allocation2 + $0x18] sm:$0xff]  ;;  %v134_v12 = vsel %vm132_vm0, %v386_v2, 0  ;;  %vm313_vm2 = vcmask 48128   ;;  %s537_s4 = smov [#allocation11]  }
  0x5e   :  { %355 = vmatpush3.bf16.msra.mxu0 %v385_v1  ;;  %368 = vmatpush3.bf16.msra.mxu1 %v385_v1  ;;  %v98_v8 = vpack.c.bf16 %v93_v6, %v92_v5  ;;  %v94_v11 = vld [vmem:[#allocation2 + $0x30] sm:$0xff]  ;;  %v95_v13 = vld [vmem:[#allocation2 + $0x38] sm:$0xff]  ;;  %v97_v16 = vpack.c.bf16 %v91_v10, %v90_v9  ;;  %v204_v18 = vld [vmem:[#allocation8 + $0x18] sm:$0xff]  ;;  %s327_s3 = sshll.u32 %s537_s4, 4  ;;  %s328_s3 = int_to_ptr.vmem [resolvable:$true] %s327_s3 }
  0x5f   :  { %370 = vmatprep.subr.msk.bf16.mxu0 %vm132_vm0, %v386_v2  ;;  %371 = vmatprep.subr.msk.bf16.mxu1 %vm132_vm0, %v386_v2  ;;  %v203_v14 = vld [vmem:[#allocation8 + $0x10] sm:$0xff]  ;;  %v201_v15 = vld [vmem:[#allocation8] sm:$0xff]  ;;  %v99_v17 = vpack.c.bf16 %v95_v13, %v94_v11  ;;  %v202_v19 = vld [vmem:[#allocation8 + $0x8] sm:$0xff]  ;;  %s497_s30 = scalar_lea.vmem %s328_s3, 1024  ;;  %p502_p13 = scmp.lt.s32.totalorder %s328_s3, %s328_s3 }
  0x60   :  { %358 = vmatprep.mubr.msk.bf16.mxu0 %vm119_vm1, %v96_v7  ;;  %362 = vmatprep.mubr.msk.bf16.mxu1 %vm119_vm1, %v98_v8  ;;  %v206_v20 = vld [vmem:[#allocation8 + $0x28] sm:$0xff]  ;;  %v205_v21 = vld [vmem:[#allocation8 + $0x20] sm:$0xff]  ;;  %v208_v22 = vld [vmem:[#allocation8 + $0x38] sm:$0xff]  ;;  %p498_p12 = scmp.ne.s32.totalorder %s328_s3, %s497_s30  ;;  %p503_p0 = scmp.lt.s32.totalorder %s497_s30, %s497_s30 }
  0x61   :  { %221 = vperm.xlu1 %384, %v203_v14   ;;  %211 = vperm.xlu0 %383, %v201_v15   ;;  %v207_v23 = vld [vmem:[#allocation8 + $0x30] sm:$0xff]  ;;  %v258_v24 = vld [vmem:[#allocation10 + $0x8] sm:$0xff]  ;;  %v257_v25 = vld [vmem:[#allocation10] sm:$0xff] }
  0x62   :  { %357 = vmatpush3.bf16.msra.mxu0 %v134_v12  ;;  %369 = vmatpush3.bf16.msra.mxu1 %v134_v12  ;;  %v260_v26 = vld [vmem:[#allocation10 + $0x18] sm:$0xff]  ;;  %v259_v27 = vld [vmem:[#allocation10 + $0x10] sm:$0xff]  ;;  %v262_v28 = vld [vmem:[#allocation10 + $0x28] sm:$0xff]  ;;  %p504_p1 = por %p503_p0, %p502_p13 }
  0x63   :  { %v261_v29 = vld [vmem:[#allocation10 + $0x20] sm:$0xff]  ;;  %v264_v30 = vld [vmem:[#allocation10 + $0x38] sm:$0xff]  ;;  %v263_v31 = vld [vmem:[#allocation10 + $0x30] sm:$0xff] }
  0x64   :  { %v341_v45 = vld [vmem:[#allocation7] ss:$0 sm:$0xff]  ;;  %p505_p2 = pnand %p504_p1, %p498_p12 }
  0x65   :  { %359 = vmatmul.mubr.msk.bf16.vlgmr.msra.gmra.mrb[0].mxu0 %vm119_vm1, %v97_v16  ;;  %363 = vmatmul.mubr.msk.bf16.vlgmr.msra.gmra.mrb[0].mxu1 %vm119_vm1, %v99_v17 }
  0x66   :  { %226 = vperm.xlu1 %384, %v204_v18   ;;  %216 = vperm.xlu0 %383, %v202_v19  }
  0x6a   :  { %236 = vperm.xlu1 %384, %v206_v20   ;;  %231 = vperm.xlu0 %383, %v205_v21  }
  0x6e   :  { %246 = vperm.xlu1 %384, %v208_v22   ;;  %241 = vperm.xlu0 %383, %v207_v23  }
  0x72   :  { %272 = vperm.xlu1 %384, %v258_v24   ;;  %267 = vperm.xlu0 %383, %v257_v25  }
  0x76   :  { %282 = vperm.xlu1 %384, %v260_v26   ;;  %277 = vperm.xlu0 %383, %v259_v27  }
  0x7a   :  { %292 = vperm.xlu1 %384, %v262_v28   ;;  %287 = vperm.xlu0 %383, %v261_v29  }
  0x7e   :  { %302 = vperm.xlu1 %384, %v264_v30   ;;  %297 = vperm.xlu0 %383, %v263_v31  }
  0xe0   :  { %v212_v32 = vpop.permute.xlu0 %211  ;;  %v222_v33 = vpop.permute.xlu1 %221 }
  0xe5   :  { %v217_v34 = vpop.permute.xlu0 %216  ;;  %v227_v35 = vpop.permute.xlu1 %226 }
  0xe9   :  { %v232_v36 = vpop.permute.xlu0 %231  ;;  %v237_v37 = vpop.permute.xlu1 %236 }
  0xed   :  { %v242_v38 = vpop.permute.xlu0 %241  ;;  %v247_v39 = vpop.permute.xlu1 %246 }
  0xf1   :  { %v268_v40 = vpop.permute.xlu0 %267  ;;  %v273_v41 = vpop.permute.xlu1 %272 }
  0xf5   :  { %v278_v42 = vpop.permute.xlu0 %277  ;;  %v283_v43 = vpop.permute.xlu1 %282 }
  0xf9   :  { %v288_v44 = vpop.permute.xlu0 %287  ;;  %v293_v46 = vpop.permute.xlu1 %292 }
  0xfd   :  { %v298_v63 = vpop.permute.xlu0 %297  ;;  %v303_v8 = vpop.permute.xlu1 %302 }
 0x138   :  { %v360_v47 = vpop.f32.mrb[0].mxu0  ;;  %v364_v48 = vpop.f32.mrb[0].mxu1 }
 0x139   :  { %v179_v49 = vadd.f32 %v360_v47, %v341_v45  ;;  %v195_v50 = vadd.f32 %v364_v48, %v341_v45  ;;  %v170_v51 = vpop.f32.mrb[1].mxu0  ;;  %v186_v52 = vpop.f32.mrb[1].mxu1 }
 0x13a   :  { %v171_v53 = vadd.f32 %v341_v45, %v170_v51  ;;  %v187_v54 = vadd.f32 %v341_v45, %v186_v52  ;;  %v361_v55 = vpop.f32.mrb[2].mxu0  ;;  %v365_v56 = vpop.f32.mrb[2].mxu1 }
 0x13b   :  { %v251_v57 = vmul.f32 %v222_v33, %v179_v49  ;;  %v255_v58 = vmul.f32 %v242_v38, %v195_v50  ;;  %v182_v59 = vadd.f32 %v361_v55, %v341_v45  ;;  %v198_v60 = vadd.f32 %v365_v56, %v341_v45  ;;  %v173_v61 = vpop.f32.mrb[3].mxu0  ;;  %v189_v62 = vpop.f32.mrb[3].mxu1 }
 0x13c   :  { %v249_v0 = vmul.f32 %v212_v32, %v171_v53  ;;  %v253_v1 = vmul.f32 %v232_v36, %v187_v54  ;;  %v174_v2 = vadd.f32 %v341_v45, %v173_v61  ;;  %v190_v3 = vadd.f32 %v341_v45, %v189_v62 }
 0x13d   :  { %v307_v4 = vadd.f32 %v278_v42, %v251_v57  ;;  %v311_v5 = vadd.f32 %v298_v63, %v255_v58  ;;  %v252_v6 = vmul.f32 %v227_v35, %v182_v59  ;;  %v256_v7 = vmul.f32 %v247_v39, %v198_v60 }
 0x13e   :  { %v305_v9 = vadd.f32 %v268_v40, %v249_v0  ;;  %v309_v10 = vadd.f32 %v288_v44, %v253_v1  ;;  %v250_v11 = vmul.f32 %v217_v34, %v174_v2  ;;  %v254_v12 = vmul.f32 %v237_v37, %v190_v3 }
 0x13f   :  { %316 = vst.msk [vmem:[#allocation11 + $0x10] sm:$0xff] %vm313_vm2, %v307_v4  ;;  %320 = vst.msk [vmem:[#allocation11 + $0x30] sm:$0xff] %vm313_vm2, %v311_v5  ;;  %v308_v13 = vadd.f32 %v283_v43, %v252_v6  ;;  %v312_v14 = vadd.f32 %v303_v8, %v256_v7 }
 0x140   :  { %314 = vst.msk [vmem:[#allocation11] sm:$0xff] %vm313_vm2, %v305_v9  ;;  %318 = vst.msk [vmem:[#allocation11 + $0x20] sm:$0xff] %vm313_vm2, %v309_v10  ;;  %v306_v15 = vadd.f32 %v273_v41, %v250_v11  ;;  %v310_v16 = vadd.f32 %v293_v46, %v254_v12 }
 0x141   :  { %317 = vst.msk [vmem:[#allocation11 + $0x18] sm:$0xff] %vm313_vm2, %v308_v13  ;;  %321 = vst.msk [vmem:[#allocation11 + $0x38] sm:$0xff] %vm313_vm2, %v312_v14 }
 0x142   :  { %315 = vst.msk [vmem:[#allocation11 + $0x8] sm:$0xff] %vm313_vm2, %v306_v15  ;;  %319 = vst.msk [vmem:[#allocation11 + $0x28] sm:$0xff] %vm313_vm2, %v310_v16 }
 0x143   :  { %508 = shalt.err (!%p505_p2)
}
 0x144   :  { %s509_s8 = scalar_lea.hbm %s672_s5, 1024 }
 0x145   :  { %p510_p3 = scmp.ne.s32.totalorder %s672_s5, %s509_s8  ;;  %p513_p4 = scmp.lt.u32.totalorder %s509_s8, %s672_s5 }
 0x147   :  { %p515_p5 = pnand %p513_p4, %p510_p3 }
 0x149   :  { %518 = shalt.err (!%p515_p5)
}
 0x14a   :  { %333 = dma.vmem_to_hbm [thread:$0]  %s328_s3, 1024, %s672_s5, [#allocation4], %s532_s18, %s532_s18, %s533_s19  }
 0x14b   :  { %525 = dma.done.wait [#allocation4], 1024  }
 0x14c   :  { %526 = vsyncadd [#allocation4], 4294966272 }
 0x14d   :  { %337 = vsyncpa [#allocation3], 1 }
 0x14e   :  { %338 = vsyncpa [#allocation6], 1 }
 0x14f   :  { %339 = vsyncpa [#allocation9], 1 }
 0x150   :  { %340 = vsyncpa [#allocation4], 1 }

// kernel: smlpnet_forward.43
= control target key start
LH: loop header
LB: loop body
LE: loop exit
PB: predicated region body
PF: predicated region fallthrough
CT: control target
= control target key end

     0   :  { %8 = vsyncpa [#allocation3], 0  ;;  %s378_s0 = inlined_call_operand.hbm [shape: f32[16,54], index: 0, kind: input, shape index: {}]   ;;  %s379_s1 = inlined_call_operand.hbm [shape: bf16[54,4], index: 1, kind: input, shape index: {}]   ;;  %s380_s2 = inlined_call_operand.hbm [shape: f32[1,4], index: 2, kind: input, shape index: {}]   ;;  %s381_s3 = inlined_call_operand.hbm [shape: f32[16,4], index: 3, kind: output, shape index: {}]  }
   0x1   :  { %9 = vsyncpa [#allocation6], 0 }
   0x2   :  { %10 = vsyncpa [#allocation4], 0  ;;  %s294_s12 = smov [#allocation5]   ;;  %s200_s16 = scalar_lea.hbm %s379_s1, 448 }
   0x3   :  { %s28_s13 = sshll.u32 %s294_s12, 4  ;;  %p201_p0 = scmp.ne.s32.totalorder %s379_s1, %s200_s16  ;;  %s29_s13 = int_to_ptr.vmem [resolvable:$true] %s28_s13 }
   0x4   :  { %p204_p1 = scmp.lt.u32.totalorder %s200_s16, %s379_s1 }
   0x6   :  { %p206_p2 = pnand %p204_p1, %p201_p0 }
   0x8   :  { %209 = shalt.err (!%p206_p2)
}
   0x9   :  { %s210_s21 = scalar_lea.vmem %s29_s13, 448  ;;  %p215_p4 = scmp.lt.s32.totalorder %s29_s13, %s29_s13 }
   0xa   :  { %p211_p3 = scmp.ne.s32.totalorder %s29_s13, %s210_s21  ;;  %p216_p5 = scmp.lt.s32.totalorder %s210_s21, %s210_s21 }
   0xc   :  { %p217_p6 = por %p216_p5, %p215_p4 }
   0xe   :  { %p218_p7 = pnand %p217_p6, %p211_p3 }
  0x10   :  { %221 = shalt.err (!%p218_p7)
}
  0x11   :  { %s295_s22 = smov 64   ;;  %s296_s23 = smov 4  }
  0x12   :  { %34 = dma.hbm_to_vmem [thread:$0]  %s379_s1, 448, %s29_s13, [#allocation6], %s295_s22, %s295_s22, %s296_s23  }
  0x13   :  { %s297_s26 = smov [#allocation2]   ;;  %s222_s30 = scalar_lea.hbm %s378_s0, 256 }
  0x14   :  { %s16_s27 = sshll.u32 %s297_s26, 4  ;;  %p223_p8 = scmp.ne.s32.totalorder %s378_s0, %s222_s30  ;;  %s17_s27 = int_to_ptr.vmem [resolvable:$true] %s16_s27 }
  0x15   :  { %p226_p9 = scmp.lt.u32.totalorder %s222_s30, %s378_s0 }
  0x17   :  { %p228_p10 = pnand %p226_p9, %p223_p8 }
  0x19   :  { %231 = shalt.err (!%p228_p10)
}
  0x1a   :  { %s232_s8 = scalar_lea.vmem %s17_s27, 256  ;;  %p237_p12 = scmp.lt.s32.totalorder %s17_s27, %s17_s27 }
  0x1b   :  { %p233_p11 = scmp.ne.s32.totalorder %s17_s27, %s232_s8  ;;  %p238_p13 = scmp.lt.s32.totalorder %s232_s8, %s232_s8 }
  0x1d   :  { %p239_p0 = por %p238_p13, %p237_p12 }
  0x1f   :  { %p240_p1 = pnand %p239_p0, %p233_p11 }
  0x21   :  { %243 = shalt.err (!%p240_p1)
}
  0x22   :  { %s298_s1 = smov 128   ;;  %s299_s9 = smov 8  }
  0x23   :  { %22 = dma.hbm_to_vmem [thread:$0]  %s378_s0, 256, %s17_s27, [#allocation3], %s298_s1, %s298_s1, %s299_s9  }
  0x24   :  { %s300_s12 = smov [#allocation7]   ;;  %s244_s16 = scalar_lea.hbm %s380_s2, 16 }
  0x25   :  { %s41_s13 = sshll.u32 %s300_s12, 4  ;;  %p245_p2 = scmp.ne.s32.totalorder %s380_s2, %s244_s16  ;;  %s42_s13 = int_to_ptr.vmem [resolvable:$true] %s41_s13 }
  0x26   :  { %p248_p3 = scmp.lt.u32.totalorder %s244_s16, %s380_s2 }
  0x28   :  { %p250_p4 = pnand %p248_p3, %p245_p2 }
  0x2a   :  { %253 = shalt.err (!%p250_p4)
}
  0x2b   :  { %s254_s21 = scalar_lea.vmem %s42_s13, 16  ;;  %s258_s0 = scalar_lea.vmem %s42_s13, 32 }
  0x2c   :  { %p255_p5 = scmp.ne.s32.totalorder %s42_s13, %s254_s21  ;;  %p259_p6 = scmp.lt.s32.totalorder %s42_s13, %s42_s13 }
  0x2d   :  { %p260_p7 = scmp.lt.s32.totalorder %s258_s0, %s254_s21 }
  0x2f   :  { %p261_p8 = por %p260_p7, %p259_p6 }
  0x31   :  { %p262_p9 = pnand %p261_p8, %p255_p5 }
  0x33   :  { %265 = shalt.err (!%p262_p9)
}
  0x34   :  { %44 = dma.hbm_to_vmem [thread:$0]  %s380_s2, 16, %s42_s13, [#allocation6]  }
  0x35   :  { %288 = dma.done.wait [#allocation3], 256  }
  0x36   :  { %289 = vsyncadd [#allocation3], 4294967040 }
  0x37   :  { %290 = dma.done.wait [#allocation6], 464  }
  0x38   :  { %291 = vsyncadd [#allocation6], 4294966832  ;;  %v301_v0 = vmov 0.0   ;;  %vm302_vm0 = vmmov 0   ;;  %v196_v1 = vld [vmem:[#allocation5] sm:$0xff]   ;;  %v197_v2 = vld [vmem:[#allocation5 + $0x8] sm:$0xff]  }
  0x39   :  { %174 = vmatprep.subr.bf16.mxu0 %v301_v0  ;;  %182 = vmatprep.mubr.msk.bf16.mxu0 %vm302_vm0, %v301_v0  ;;  %v198_v3 = vld [vmem:[#allocation5 + $0x10] sm:$0xff]   ;;  %v199_v4 = vld [vmem:[#allocation5 + $0x18] ss:$0 sps:$4 sm:$0x77]   ;;  %vm97_vm1 = vcmask 1042432   ;;  %vm93_vm2 = vcmask 441344  }
  0x3a   :  { %175 = vmatpush3.bf16.msra.mxu0 %v196_v1  ;;  %v55_v5 = vld [vmem:[#allocation2] sm:$0xff]  ;;  %v56_v6 = vld [vmem:[#allocation2 + $0x8] sm:$0xff]  ;;  %v99_v7 = vsel %vm97_vm1, %v199_v4, 0  ;;  %vm142_vm3 = vcmask 31744   ;;  %s303_s2 = smov [#allocation8]  }
  0x3b   :  { %176 = vmatprep.subr.bf16.mxu0 %v301_v0  ;;  %v57_v8 = vpack.c.bf16 %v56_v6, %v55_v5  ;;  %v163_v9 = vld [vmem:[#allocation7] ss:$0 sm:$0xff]  ;;  %s150_s24 = sshll.u32 %s303_s2, 4  ;;  %s151_s24 = int_to_ptr.vmem [resolvable:$true] %s150_s24 }
  0x3c   :  { %s266_s25 = scalar_lea.vmem %s151_s24, 256  ;;  %p271_p11 = scmp.lt.s32.totalorder %s151_s24, %s151_s24 }
  0x3d   :  { %p267_p10 = scmp.ne.s32.totalorder %s151_s24, %s266_s25  ;;  %p272_p12 = scmp.lt.s32.totalorder %s266_s25, %s266_s25 }
  0x3e   :  { %177 = vmatpush3.bf16.msra.mxu0 %v197_v2 }
  0x3f   :  { %178 = vmatprep.subr.bf16.mxu0 %v301_v0  ;;  %p273_p13 = por %p272_p12, %p271_p11 }
  0x41   :  { %p274_p0 = pnand %p273_p13, %p267_p10 }
  0x42   :  { %179 = vmatpush3.bf16.msra.mxu0 %v198_v3 }
  0x43   :  { %180 = vmatprep.subr.bf16.mxu0 %v301_v0 }
  0x46   :  { %181 = vmatpush3.bf16.msra.mxu0 %v99_v7 }
  0x49   :  { %183 = vmatmul.mubr.msk.bf16.vlgmr.msra.gmra.mrb[0].mxu0 %vm93_vm2, %v57_v8 }
 0x11c   :  { %v135_v10 = vpop.f32.mrb[0].mxu0 }
 0x11d   :  { %v136_v11 = vadd.f32 %v163_v9, %v135_v10  ;;  %v184_v12 = vpop.f32.mrb[1].mxu0 }
 0x11e   :  { %v138_v13 = vpop.f32.mrb[2].mxu0 }
 0x11f   :  { %v139_v14 = vadd.f32 %v163_v9, %v138_v13  ;;  %v185_v15 = vpop.f32.mrb[3].mxu0  ;;  %143 = vst.msk [vmem:[#allocation8] sm:$0xff] %vm142_vm3, %v136_v11 }
 0x121   :  { %144 = vst.msk [vmem:[#allocation8 + $0x8] sm:$0xff] %vm142_vm3, %v139_v14 }
 0x122   :  { %277 = shalt.err (!%p274_p0)
}
 0x123   :  { %s278_s28 = scalar_lea.hbm %s381_s3, 256 }
 0x124   :  { %p279_p1 = scmp.ne.s32.totalorder %s381_s3, %s278_s28  ;;  %p282_p2 = scmp.lt.u32.totalorder %s278_s28, %s381_s3 }
 0x126   :  { %p284_p3 = pnand %p282_p2, %p279_p1 }
 0x128   :  { %287 = shalt.err (!%p284_p3)
}
 0x129   :  { %156 = dma.vmem_to_hbm [thread:$0]  %s151_s24, 256, %s381_s3, [#allocation4], %s298_s1, %s298_s1, %s299_s9  }
 0x12a   :  { %292 = dma.done.wait [#allocation4], 256  }
 0x12b   :  { %293 = vsyncadd [#allocation4], 4294967040 }
 0x12c   :  { %160 = vsyncpa [#allocation3], 1 }
 0x12d   :  { %161 = vsyncpa [#allocation6], 1 }
 0x12e   :  { %162 = vsyncpa [#allocation4], 1 }

// kernel: smlpnet_forward.47
= control target key start
LH: loop header
LB: loop body
LE: loop exit
PB: predicated region body
PF: predicated region fallthrough
CT: control target
= control target key end

     0   :  { %8 = vsyncpa [#allocation3], 0  ;;  %s365_s0 = inlined_call_operand.hbm [shape: f32[16,36], index: 0, kind: input, shape index: {}]   ;;  %s366_s1 = inlined_call_operand.hbm [shape: bf16[36,4], index: 1, kind: input, shape index: {}]   ;;  %s367_s2 = inlined_call_operand.hbm [shape: f32[1,4], index: 2, kind: input, shape index: {}]   ;;  %s368_s3 = inlined_call_operand.hbm [shape: f32[16,4], index: 3, kind: output, shape index: {}]  }
   0x1   :  { %9 = vsyncpa [#allocation6], 0 }
   0x2   :  { %10 = vsyncpa [#allocation4], 0  ;;  %s281_s12 = smov [#allocation5]   ;;  %s187_s16 = scalar_lea.hbm %s366_s1, 320 }
   0x3   :  { %s28_s13 = sshll.u32 %s281_s12, 4  ;;  %p188_p0 = scmp.ne.s32.totalorder %s366_s1, %s187_s16  ;;  %s29_s13 = int_to_ptr.vmem [resolvable:$true] %s28_s13 }
   0x4   :  { %p191_p1 = scmp.lt.u32.totalorder %s187_s16, %s366_s1 }
   0x6   :  { %p193_p2 = pnand %p191_p1, %p188_p0 }
   0x8   :  { %196 = shalt.err (!%p193_p2)
}
   0x9   :  { %s197_s21 = scalar_lea.vmem %s29_s13, 320  ;;  %p202_p4 = scmp.lt.s32.totalorder %s29_s13, %s29_s13 }
   0xa   :  { %p198_p3 = scmp.ne.s32.totalorder %s29_s13, %s197_s21  ;;  %p203_p5 = scmp.lt.s32.totalorder %s197_s21, %s197_s21 }
   0xc   :  { %p204_p6 = por %p203_p5, %p202_p4 }
   0xe   :  { %p205_p7 = pnand %p204_p6, %p198_p3 }
  0x10   :  { %208 = shalt.err (!%p205_p7)
}
  0x11   :  { %s282_s22 = smov 64   ;;  %s283_s23 = smov 4  }
  0x12   :  { %34 = dma.hbm_to_vmem [thread:$0]  %s366_s1, 320, %s29_s13, [#allocation6], %s282_s22, %s282_s22, %s283_s23  }
  0x13   :  { %s284_s26 = smov [#allocation2]   ;;  %s209_s30 = scalar_lea.hbm %s365_s0, 256 }
  0x14   :  { %s16_s27 = sshll.u32 %s284_s26, 4  ;;  %p210_p8 = scmp.ne.s32.totalorder %s365_s0, %s209_s30  ;;  %s17_s27 = int_to_ptr.vmem [resolvable:$true] %s16_s27 }
  0x15   :  { %p213_p9 = scmp.lt.u32.totalorder %s209_s30, %s365_s0 }
  0x17   :  { %p215_p10 = pnand %p213_p9, %p210_p8 }
  0x19   :  { %218 = shalt.err (!%p215_p10)
}
  0x1a   :  { %s219_s8 = scalar_lea.vmem %s17_s27, 256  ;;  %p224_p12 = scmp.lt.s32.totalorder %s17_s27, %s17_s27 }
  0x1b   :  { %p220_p11 = scmp.ne.s32.totalorder %s17_s27, %s219_s8  ;;  %p225_p13 = scmp.lt.s32.totalorder %s219_s8, %s219_s8 }
  0x1d   :  { %p226_p0 = por %p225_p13, %p224_p12 }
  0x1f   :  { %p227_p1 = pnand %p226_p0, %p220_p11 }
  0x21   :  { %230 = shalt.err (!%p227_p1)
}
  0x22   :  { %s285_s1 = smov 128   ;;  %s286_s9 = smov 8  }
  0x23   :  { %22 = dma.hbm_to_vmem [thread:$0]  %s365_s0, 256, %s17_s27, [#allocation3], %s285_s1, %s285_s1, %s286_s9  }
  0x24   :  { %s287_s12 = smov [#allocation7]   ;;  %s231_s16 = scalar_lea.hbm %s367_s2, 16 }
  0x25   :  { %s41_s13 = sshll.u32 %s287_s12, 4  ;;  %p232_p2 = scmp.ne.s32.totalorder %s367_s2, %s231_s16  ;;  %s42_s13 = int_to_ptr.vmem [resolvable:$true] %s41_s13 }
  0x26   :  { %p235_p3 = scmp.lt.u32.totalorder %s231_s16, %s367_s2 }
  0x28   :  { %p237_p4 = pnand %p235_p3, %p232_p2 }
  0x2a   :  { %240 = shalt.err (!%p237_p4)
}
  0x2b   :  { %s241_s21 = scalar_lea.vmem %s42_s13, 16  ;;  %s245_s0 = scalar_lea.vmem %s42_s13, 32 }
  0x2c   :  { %p242_p5 = scmp.ne.s32.totalorder %s42_s13, %s241_s21  ;;  %p246_p6 = scmp.lt.s32.totalorder %s42_s13, %s42_s13 }
  0x2d   :  { %p247_p7 = scmp.lt.s32.totalorder %s245_s0, %s241_s21 }
  0x2f   :  { %p248_p8 = por %p247_p7, %p246_p6 }
  0x31   :  { %p249_p9 = pnand %p248_p8, %p242_p5 }
  0x33   :  { %252 = shalt.err (!%p249_p9)
}
  0x34   :  { %44 = dma.hbm_to_vmem [thread:$0]  %s367_s2, 16, %s42_s13, [#allocation6]  }
  0x35   :  { %275 = dma.done.wait [#allocation3], 256  }
  0x36   :  { %276 = vsyncadd [#allocation3], 4294967040 }
  0x37   :  { %277 = dma.done.wait [#allocation6], 336  }
  0x38   :  { %278 = vsyncadd [#allocation6], 4294966960  ;;  %v288_v0 = vmov 0.0   ;;  %vm289_vm0 = vmmov 0   ;;  %v184_v1 = vld [vmem:[#allocation5] sm:$0xff]   ;;  %v185_v2 = vld [vmem:[#allocation5 + $0x8] sm:$0xff]  }
  0x39   :  { %164 = vmatprep.subr.bf16.mxu0 %v288_v0  ;;  %170 = vmatprep.mubr.msk.bf16.mxu0 %vm289_vm0, %v288_v0  ;;  %v186_v3 = vld [vmem:[#allocation5 + $0x10] ss:$0 sps:$4 sm:$0x33]   ;;  %vm89_vm1 = vcmask 1041408   ;;  %v56_v5 = vld [vmem:[#allocation2 + $0x8] sm:$0xff]  ;;  %vm85_vm2 = vcmask 293888  }
  0x3a   :  { %165 = vmatpush3.bf16.msra.mxu0 %v184_v1  ;;  %v55_v4 = vld [vmem:[#allocation2] sm:$0xff]  ;;  %v91_v6 = vsel %vm89_vm1, %v186_v3, 0  ;;  %vm134_vm3 = vcmask 31744   ;;  %s290_s2 = smov [#allocation8]  }
  0x3b   :  { %166 = vmatprep.subr.bf16.mxu0 %v288_v0  ;;  %v57_v7 = vpack.c.bf16 %v56_v5, %v55_v4  ;;  %v155_v8 = vld [vmem:[#allocation7] ss:$0 sm:$0xff]  ;;  %s142_s24 = sshll.u32 %s290_s2, 4  ;;  %s143_s24 = int_to_ptr.vmem [resolvable:$true] %s142_s24 }
  0x3c   :  { %s253_s25 = scalar_lea.vmem %s143_s24, 256  ;;  %p258_p11 = scmp.lt.s32.totalorder %s143_s24, %s143_s24 }
  0x3d   :  { %p254_p10 = scmp.ne.s32.totalorder %s143_s24, %s253_s25  ;;  %p259_p12 = scmp.lt.s32.totalorder %s253_s25, %s253_s25 }
  0x3e   :  { %167 = vmatpush3.bf16.msra.mxu0 %v185_v2 }
  0x3f   :  { %168 = vmatprep.subr.bf16.mxu0 %v288_v0  ;;  %p260_p13 = por %p259_p12, %p258_p11 }
  0x41   :  { %p261_p0 = pnand %p260_p13, %p254_p10 }
  0x42   :  { %169 = vmatpush3.bf16.msra.mxu0 %v91_v6 }
  0x45   :  { %171 = vmatmul.mubr.msk.bf16.vlgmr.msra.gmra.mrb[0].mxu0 %vm85_vm2, %v57_v7 }
 0x118   :  { %v127_v9 = vpop.f32.mrb[0].mxu0 }
 0x119   :  { %v128_v10 = vadd.f32 %v155_v8, %v127_v9  ;;  %v172_v11 = vpop.f32.mrb[1].mxu0 }
 0x11a   :  { %v130_v12 = vpop.f32.mrb[2].mxu0 }
 0x11b   :  { %v131_v13 = vadd.f32 %v155_v8, %v130_v12  ;;  %v173_v14 = vpop.f32.mrb[3].mxu0  ;;  %135 = vst.msk [vmem:[#allocation8] sm:$0xff] %vm134_vm3, %v128_v10 }
 0x11d   :  { %136 = vst.msk [vmem:[#allocation8 + $0x8] sm:$0xff] %vm134_vm3, %v131_v13 }
 0x11e   :  { %264 = shalt.err (!%p261_p0)
}
 0x11f   :  { %s265_s28 = scalar_lea.hbm %s368_s3, 256 }
 0x120   :  { %p266_p1 = scmp.ne.s32.totalorder %s368_s3, %s265_s28  ;;  %p269_p2 = scmp.lt.u32.totalorder %s265_s28, %s368_s3 }
 0x122   :  { %p271_p3 = pnand %p269_p2, %p266_p1 }
 0x124   :  { %274 = shalt.err (!%p271_p3)
}
 0x125   :  { %148 = dma.vmem_to_hbm [thread:$0]  %s143_s24, 256, %s368_s3, [#allocation4], %s285_s1, %s285_s1, %s286_s9  }
 0x126   :  { %279 = dma.done.wait [#allocation4], 256  }
 0x127   :  { %280 = vsyncadd [#allocation4], 4294967040 }
 0x128   :  { %152 = vsyncpa [#allocation3], 1 }
 0x129   :  { %153 = vsyncpa [#allocation6], 1 }
 0x12a   :  { %154 = vsyncpa [#allocation4], 1 }

// kernel: smlpnet_forward.51
= control target key start
LH: loop header
LB: loop body
LE: loop exit
PB: predicated region body
PF: predicated region fallthrough
CT: control target
= control target key end

     0   :  { %8 = vsyncpa [#allocation3], 0  ;;  %s450_s0 = inlined_call_operand.hbm [shape: f32[96,2], index: 0, kind: input, shape index: {}]   ;;  %s451_s1 = inlined_call_operand.hbm [shape: bf16[2,2], index: 1, kind: input, shape index: {}]   ;;  %s452_s2 = inlined_call_operand.hbm [shape: f32[1,2], index: 2, kind: input, shape index: {}]   ;;  %s453_s3 = inlined_call_operand.hbm [shape: f32[96,2], index: 3, kind: output, shape index: {}]  }
   0x1   :  { %9 = vsyncpa [#allocation6], 0 }
   0x2   :  { %10 = vsyncpa [#allocation4], 0  ;;  %s345_s12 = smov [#allocation5]   ;;  %s346_s14 = smov [#allocation2]  }
   0x3   :  { %s29_s13 = sshll.u32 %s345_s12, 4  ;;  %s16_s15 = sshll.u32 %s346_s14, 4  ;;  %s30_s13 = int_to_ptr.vmem [resolvable:$true] %s29_s13  ;;  %s371_s15 = int_to_ptr.vmem [resolvable:$true] %s16_s15 }
   0x4   :  { %s251_s18 = scalar_lea.hbm %s451_s1, 16 }
   0x5   :  { %p252_p0 = scmp.ne.s32.totalorder %s451_s1, %s251_s18  ;;  %p255_p1 = scmp.lt.u32.totalorder %s251_s18, %s451_s1 }
   0x7   :  { %p257_p2 = pnand %p255_p1, %p252_p0 }
   0x9   :  { %260 = shalt.err (!%p257_p2)
}
   0xa   :  { %s261_s23 = scalar_lea.vmem %s30_s13, 16  ;;  %s265_s24 = scalar_lea.vmem %s30_s13, 32 }
   0xb   :  { %p262_p3 = scmp.ne.s32.totalorder %s30_s13, %s261_s23  ;;  %p266_p4 = scmp.lt.s32.totalorder %s30_s13, %s30_s13 }
   0xc   :  { %p267_p5 = scmp.lt.s32.totalorder %s265_s24, %s261_s23 }
   0xe   :  { %p268_p6 = por %p267_p5, %p266_p4 }
  0x10   :  { %p269_p7 = pnand %p268_p6, %p262_p3 }
  0x12   :  { %272 = shalt.err (!%p269_p7)
}
  0x13   :  { %32 = dma.hbm_to_vmem [thread:$0]  %s451_s1, 16, %s30_s13, [#allocation6]  }
  0x14   :  { %s273_s29 = scalar_lea.hbm %s450_s0, 1536 }
  0x15   :  { %p274_p8 = scmp.ne.s32.totalorder %s450_s0, %s273_s29  ;;  %p277_p9 = scmp.lt.u32.totalorder %s273_s29, %s450_s0 }
  0x17   :  { %p279_p10 = pnand %p277_p9, %p274_p8 }
  0x19   :  { %282 = shalt.err (!%p279_p10)
}
  0x1a   :  { %s283_s7 = scalar_lea.vmem %s371_s15, 1536  ;;  %p288_p12 = scmp.lt.s32.totalorder %s371_s15, %s371_s15 }
  0x1b   :  { %p284_p11 = scmp.ne.s32.totalorder %s371_s15, %s283_s7  ;;  %p289_p13 = scmp.lt.s32.totalorder %s283_s7, %s283_s7 }
  0x1d   :  { %p290_p0 = por %p289_p13, %p288_p12 }
  0x1f   :  { %p291_p1 = pnand %p290_p0, %p284_p11 }
  0x21   :  { %294 = shalt.err (!%p291_p1)
}
  0x22   :  { %s347_s1 = smov 128   ;;  %s348_s8 = smov 8  }
  0x23   :  { %22 = dma.hbm_to_vmem [thread:$0]  %s450_s0, 1536, %s371_s15, [#allocation3], %s347_s1, %s347_s1, %s348_s8  }
  0x24   :  { %s349_s11 = smov [#allocation7]   ;;  %s295_s16 = scalar_lea.hbm %s452_s2, 16 }
  0x25   :  { %s39_s12 = sshll.u32 %s349_s11, 4  ;;  %p296_p2 = scmp.ne.s32.totalorder %s452_s2, %s295_s16  ;;  %s40_s12 = int_to_ptr.vmem [resolvable:$true] %s39_s12 }
  0x26   :  { %p299_p3 = scmp.lt.u32.totalorder %s295_s16, %s452_s2 }
  0x28   :  { %p301_p4 = pnand %p299_p3, %p296_p2 }
  0x2a   :  { %304 = shalt.err (!%p301_p4)
}
  0x2b   :  { %s305_s21 = scalar_lea.vmem %s40_s12, 16  ;;  %s309_s0 = scalar_lea.vmem %s40_s12, 32 }
  0x2c   :  { %p306_p5 = scmp.ne.s32.totalorder %s40_s12, %s305_s21  ;;  %p310_p6 = scmp.lt.s32.totalorder %s40_s12, %s40_s12 }
  0x2d   :  { %p311_p7 = scmp.lt.s32.totalorder %s309_s0, %s305_s21 }
  0x2f   :  { %p312_p8 = por %p311_p7, %p310_p6 }
  0x31   :  { %p313_p9 = pnand %p312_p8, %p306_p5 }
  0x33   :  { %316 = shalt.err (!%p313_p9)
}
  0x34   :  { %42 = dma.hbm_to_vmem [thread:$0]  %s452_s2, 16, %s40_s12, [#allocation6]  }
  0x35   :  { %339 = dma.done.wait [#allocation3], 1536  }
  0x36   :  { %340 = vsyncadd [#allocation3], 4294965760 }
  0x37   :  { %341 = dma.done.wait [#allocation6], 32  }
  0x38   :  { %342 = vsyncadd [#allocation6], 4294967264  ;;  %vm98_vm0 = vcmask 1040384   ;;  %v71_v0 = vld [vmem:[#allocation5] sm:$0x1]  ;;  %v58_v2 = vld [vmem:[#allocation2 + $0x28] sm:$0xff] }
  0x39   :  { %v57_v1 = vld [vmem:[#allocation2 + $0x20] sm:$0xff]  ;;  %vm79_vm1 = vcmask 15360   ;;  %244 = vmatprep.subr.msk.bf16.mxu1 %vm98_vm0, %v71_v0  ;;  %v100_v3 = vsel %vm98_vm0, %v71_v0, 0  ;;  %v59_v5 = vld [vmem:[#allocation2 + $0x30] sm:$0xff]  ;;  %v60_v6 = vld [vmem:[#allocation2 + $0x38] sm:$0xff]  ;;  %243 = vmatprep.subr.msk.bf16.mxu0 %vm98_vm0, %v71_v0  ;;  %s350_s2 = smov [#allocation8]  }
  0x3a   :  { %v67_v4 = vpack.c.bf16 %v58_v2, %v57_v1  ;;  %v53_v7 = vld [vmem:[#allocation2] sm:$0xff]  ;;  %242 = vmatpush3.bf16.msra.mxu1 %v100_v3  ;;  %v68_v8 = vpack.c.bf16 %v60_v6, %v59_v5  ;;  %228 = vmatpush3.bf16.msra.mxu0 %v100_v3  ;;  %v54_v9 = vld [vmem:[#allocation2 + $0x8] sm:$0xff]  ;;  %v55_v10 = vld [vmem:[#allocation2 + $0x10] sm:$0xff]  ;;  %s200_s23 = sshll.u32 %s350_s2, 4  ;;  %s201_s23 = int_to_ptr.vmem [resolvable:$true] %s200_s23 }
  0x3b   :  { %v56_v11 = vld [vmem:[#allocation2 + $0x18] sm:$0xff]  ;;  %v65_v12 = vpack.c.bf16 %v54_v9, %v53_v7  ;;  %v61_v14 = vld [vmem:[#allocation2 + $0x40] sm:$0xff]  ;;  %v62_v15 = vld [vmem:[#allocation2 + $0x48] sm:$0xff]  ;;  %s317_s24 = scalar_lea.vmem %s201_s23, 1536  ;;  %p322_p11 = scmp.lt.s32.totalorder %s201_s23, %s201_s23 }
  0x3c   :  { %233 = vmatprep.mubr.msk.bf16.mxu1 %vm79_vm1, %v67_v4  ;;  %v66_v13 = vpack.c.bf16 %v56_v11, %v55_v10  ;;  %v69_v16 = vpack.c.bf16 %v62_v15, %v61_v14  ;;  %v63_v17 = vld [vmem:[#allocation2 + $0x50] sm:$0xff]  ;;  %v64_v18 = vld [vmem:[#allocation2 + $0x58] sm:$0xff]  ;;  %v213_v20 = vld [vmem:[#allocation7] ss:$0 sm:$0xff]  ;;  %p318_p10 = scmp.ne.s32.totalorder %s201_s23, %s317_s24  ;;  %p323_p12 = scmp.lt.s32.totalorder %s317_s24, %s317_s24 }
  0x3d   :  { %234 = vmatmul.mubr.msk.bf16.vlgmr.msra.gmra.mrb[0].mxu1 %vm79_vm1, %v68_v8  ;;  %229 = vmatprep.mubr.msk.bf16.mxu0 %vm79_vm1, %v65_v12  ;;  %v70_v19 = vpack.c.bf16 %v64_v18, %v63_v17 }
  0x3e   :  { %230 = vmatmul.mubr.msk.bf16.vlgmr.msra.gmra.mrb[0].mxu0 %vm79_vm1, %v66_v13  ;;  %237 = vmatprep.mubr.msk.bf16.mxu1 %vm79_vm1, %v69_v16  ;;  %p324_p13 = por %p323_p12, %p322_p11 }
  0x40   :  { %p325_p0 = pnand %p324_p13, %p318_p10 }
  0x45   :  { %238 = vmatmul.mubr.msk.bf16.gmra.mrb[4].mxu1 %vm79_vm1, %v70_v19 }
 0x110   :  { %v235_v21 = vpop.f32.mrb[0].mxu1 }
 0x111   :  { %v161_v22 = vadd.f32 %v235_v21, %v213_v20  ;;  %v152_v23 = vpop.f32.mrb[1].mxu1  ;;  %v231_v24 = vpop.f32.mrb[0].mxu0 }
 0x112   :  { %v153_v25 = vadd.f32 %v213_v20, %v152_v23  ;;  %v236_v26 = vpop.f32.mrb[2].mxu1  ;;  %v145_v27 = vadd.f32 %v231_v24, %v213_v20  ;;  %v136_v28 = vpop.f32.mrb[1].mxu0 }
 0x113   :  { %189 = vst.msk [vmem:[#allocation8 + $0x30] sm:$0xff] %vm79_vm1, %v161_v22  ;;  %v164_v29 = vadd.f32 %v236_v26, %v213_v20  ;;  %v155_v30 = vpop.f32.mrb[3].mxu1  ;;  %v137_v31 = vadd.f32 %v213_v20, %v136_v28  ;;  %v232_v32 = vpop.f32.mrb[2].mxu0 }
 0x114   :  { %187 = vst.msk [vmem:[#allocation8 + $0x20] sm:$0xff] %vm79_vm1, %v153_v25  ;;  %v156_v33 = vadd.f32 %v213_v20, %v155_v30  ;;  %185 = vst.msk [vmem:[#allocation8 + $0x10] sm:$0xff] %vm79_vm1, %v145_v27  ;;  %v148_v34 = vadd.f32 %v232_v32, %v213_v20  ;;  %v139_v35 = vpop.f32.mrb[3].mxu0 }
 0x115   :  { %190 = vst.msk [vmem:[#allocation8 + $0x38] sm:$0xff] %vm79_vm1, %v164_v29  ;;  %183 = vst.msk [vmem:[#allocation8] sm:$0xff] %vm79_vm1, %v137_v31  ;;  %v140_v36 = vadd.f32 %v213_v20, %v139_v35 }
 0x116   :  { %188 = vst.msk [vmem:[#allocation8 + $0x28] sm:$0xff] %vm79_vm1, %v156_v33  ;;  %186 = vst.msk [vmem:[#allocation8 + $0x18] sm:$0xff] %vm79_vm1, %v148_v34 }
 0x117   :  { %184 = vst.msk [vmem:[#allocation8 + $0x8] sm:$0xff] %vm79_vm1, %v140_v36 }
 0x118   :  { %v239_v37 = vpop.f32.mrb[4].mxu1 }
 0x119   :  { %v177_v38 = vadd.f32 %v239_v37, %v213_v20  ;;  %v168_v39 = vpop.f32.mrb[5].mxu1 }
 0x11a   :  { %v169_v40 = vadd.f32 %v213_v20, %v168_v39  ;;  %v240_v41 = vpop.f32.mrb[6].mxu1 }
 0x11b   :  { %193 = vst.msk [vmem:[#allocation8 + $0x50] sm:$0xff] %vm79_vm1, %v177_v38  ;;  %v180_v42 = vadd.f32 %v240_v41, %v213_v20  ;;  %v171_v43 = vpop.f32.mrb[7].mxu1 }
 0x11c   :  { %191 = vst.msk [vmem:[#allocation8 + $0x40] sm:$0xff] %vm79_vm1, %v169_v40  ;;  %v172_v44 = vadd.f32 %v213_v20, %v171_v43 }
 0x11d   :  { %194 = vst.msk [vmem:[#allocation8 + $0x58] sm:$0xff] %vm79_vm1, %v180_v42 }
 0x11e   :  { %192 = vst.msk [vmem:[#allocation8 + $0x48] sm:$0xff] %vm79_vm1, %v172_v44 }
 0x11f   :  { %328 = shalt.err (!%p325_p0)
}
 0x120   :  { %s329_s27 = scalar_lea.hbm %s453_s3, 1536 }
 0x121   :  { %p330_p1 = scmp.ne.s32.totalorder %s453_s3, %s329_s27  ;;  %p333_p2 = scmp.lt.u32.totalorder %s329_s27, %s453_s3 }
 0x123   :  { %p335_p3 = pnand %p333_p2, %p330_p1 }
 0x125   :  { %338 = shalt.err (!%p335_p3)
}
 0x126   :  { %206 = dma.vmem_to_hbm [thread:$0]  %s201_s23, 1536, %s453_s3, [#allocation4], %s347_s1, %s347_s1, %s348_s8  }
 0x127   :  { %343 = dma.done.wait [#allocation4], 1536  }
 0x128   :  { %344 = vsyncadd [#allocation4], 4294965760 }
 0x129   :  { %210 = vsyncpa [#allocation3], 1 }
 0x12a   :  { %211 = vsyncpa [#allocation6], 1 }
 0x12b   :  { %212 = vsyncpa [#allocation4], 1 }

// kernel: tile.50
= control target key start
LH: loop header
LB: loop body
LE: loop exit
PB: predicated region body
PF: predicated region fallthrough
CT: control target
= control target key end

     0   :  { %s22_s0 = inlined_call_operand.vmem [shape: f32[4], index: 0, kind: input, shape index: {}]   ;;  %s23_s1 = inlined_call_operand.vmem [shape: f32[4,4], index: 1, kind: output, shape index: {}]  }
   0x1   :  { %v4_v0 = vld [vmem:[%s22_s0] ss:$0 sm:$0xff] }
   0x2   :  { %5 = vst [vmem:[%s23_s1] sm:$0xf] %v4_v0 }

// kernel: tile.4
= control target key start
LH: loop header
LB: loop body
LE: loop exit
PB: predicated region body
PF: predicated region fallthrough
CT: control target
= control target key end

     0   :  { %s95_s0 = inlined_call_operand.vmem [shape: f32[4,4], index: 0, kind: input, shape index: {}]   ;;  %s96_s1 = inlined_call_operand.hbm [shape: f32[16,1], index: 1, kind: output, shape index: {}]  }
   0x1   :  { %v5_v0 = vld [vmem:[%s95_s0] sm:$0xf] }
   0x2   :  { %6 = vst [vmem:[#allocation2] sm:$0xf] %v5_v0 }
   0x3   :  { %2 = vsyncpa [#allocation1], 0  ;;  %s66_s0 = smov 127   ;;  %s67_s8 = smov 125   ;;  %vm8_vm0 = vcmask 7168  }
   0x4   :  { %s68_s9 = smov 126   ;;  %s69_s10 = smov [#allocation0]  }
   0x5   :  { %s32_s11 = sshll.u32 %s69_s10, 4  ;;  %s33_s11 = int_to_ptr.vmem [resolvable:$true] %s32_s11 }
   0x6   :  { %s42_s12 = scalar_lea.vmem %s33_s11, 256  ;;  %p47_p1 = scmp.lt.s32.totalorder %s33_s11, %s33_s11 }
   0x7   :  { %p43_p0 = scmp.ne.s32.totalorder %s33_s11, %s42_s12  ;;  %p48_p2 = scmp.lt.s32.totalorder %s42_s12, %s42_s12 }
   0x9   :  { %v10_v1 = vld [vmem:[#allocation2] sm:$0xf]   ;;  %p49_p3 = por %p48_p2, %p47_p1 }
   0xa   :  { %v22_v2 = vld [vmem:[#allocation2] sm:$0xf]   ;;  %11 = vrot.lane.b32.xlu0 %v10_v1, %s66_s0 }
   0xb   :  { %23 = vrot.lane.b32.xlu1 %v22_v2, %s67_s8  ;;  %v7_v3 = vld [vmem:[#allocation2] sm:$0xf]   ;;  %p50_p4 = pnand %p49_p3, %p43_p0 }
   0xc   :  { %v16_v4 = vld [vmem:[#allocation2] sm:$0xf]   ;;  %9 = vst.msk [vmem:[#allocation0] ss:$4 sm:$0xf] %vm8_vm0, %v7_v3  }
   0xe   :  { %17 = vrot.lane.b32.xlu0 %v16_v4, %s68_s9 }
  0x7c   :  { %v12_v5 = vpop.permute.xlu0 %11  }
  0x7d   :  { %v24_v6 = vpop.permute.xlu1 %23   ;;  %15 = vst.msk [vmem:[#allocation0 + $0x1] ss:$4 sm:$0xf] %vm8_vm0, %v12_v5  }
  0x7e   :  { %27 = vst.msk [vmem:[#allocation0 + $0x3] ss:$4 sm:$0xf] %vm8_vm0, %v24_v6  }
  0x80   :  { %v18_v7 = vpop.permute.xlu0 %17  }
  0x81   :  { %21 = vst.msk [vmem:[#allocation0 + $0x2] ss:$4 sm:$0xf] %vm8_vm0, %v18_v7  }
  0x82   :  { %53 = shalt.err (!%p50_p4)
}
  0x83   :  { %s54_s15 = scalar_lea.hbm %s96_s1, 256 }
  0x84   :  { %p55_p5 = scmp.ne.s32.totalorder %s96_s1, %s54_s15  ;;  %p58_p6 = scmp.lt.u32.totalorder %s54_s15, %s96_s1 }
  0x86   :  { %p60_p7 = pnand %p58_p6, %p55_p5 }
  0x88   :  { %63 = shalt.err (!%p60_p7)
}
  0x89   :  { %35 = dma.vmem_to_hbm [thread:$0]  %s33_s11, 256, %s96_s1, [#allocation1]  }
  0x8a   :  { %64 = dma.done.wait [#allocation1], 256  }
  0x8b   :  { %65 = vsyncadd [#allocation1], 4294967040 }
  0x8c   :  { %37 = vsyncpa [#allocation1], 1 }

// kernel: smlpnet_forward.57
= control target key start
LH: loop header
LB: loop body
LE: loop exit
PB: predicated region body
PF: predicated region fallthrough
CT: control target
= control target key end

     0   :  { %10 = vsyncpa [#allocation3], 0  ;;  %s498_s0 = inlined_call_operand.hbm [shape: f32[16,12], index: 0, kind: input, shape index: {}]   ;;  %s499_s1 = inlined_call_operand.hbm [shape: bf16[12,36], index: 1, kind: input, shape index: {}]   ;;  %s500_s2 = inlined_call_operand.hbm [shape: f32[1,36], index: 2, kind: input, shape index: {}]   ;;  %s501_s3 = inlined_call_operand.hbm [shape: f32[16,1], index: 3, kind: input, shape index: {}]   ;;  %s502_s4 = inlined_call_operand.hbm [shape: f32[16,1], index: 4, kind: input, shape index: {}]   ;;  %s503_s5 = inlined_call_operand.hbm [shape: f32[16,36], index: 5, kind: output, shape index: {}]  }
   0x1   :  { %11 = vsyncpa [#allocation6], 0 }
   0x2   :  { %12 = vsyncpa [#allocation9], 0 }
   0x3   :  { %13 = vsyncpa [#allocation4], 0  ;;  %s371_s18 = smov [#allocation5]   ;;  %s231_s22 = scalar_lea.hbm %s499_s1, 128 }
   0x4   :  { %s31_s19 = sshll.u32 %s371_s18, 4  ;;  %p232_p0 = scmp.ne.s32.totalorder %s499_s1, %s231_s22  ;;  %s32_s19 = int_to_ptr.vmem [resolvable:$true] %s31_s19 }
   0x5   :  { %p235_p1 = scmp.lt.u32.totalorder %s231_s22, %s499_s1 }
   0x7   :  { %p237_p2 = pnand %p235_p1, %p232_p0 }
   0x9   :  { %240 = shalt.err (!%p237_p2)
}
   0xa   :  { %s241_s27 = scalar_lea.vmem %s32_s19, 128  ;;  %p246_p4 = scmp.lt.s32.totalorder %s32_s19, %s32_s19 }
   0xb   :  { %p242_p3 = scmp.ne.s32.totalorder %s32_s19, %s241_s27  ;;  %p247_p5 = scmp.lt.s32.totalorder %s241_s27, %s241_s27 }
   0xd   :  { %p248_p6 = por %p247_p5, %p246_p4 }
   0xf   :  { %p249_p7 = pnand %p248_p6, %p242_p3 }
  0x11   :  { %252 = shalt.err (!%p249_p7)
}
  0x12   :  { %s372_s28 = smov 64   ;;  %s373_s29 = smov 4  }
  0x13   :  { %37 = dma.hbm_to_vmem [thread:$0]  %s499_s1, 128, %s32_s19, [#allocation6], %s372_s28, %s372_s28, %s373_s29  }
  0x14   :  { %s374_s7 = smov [#allocation8]   ;;  %s375_s9 = smov [#allocation2]  }
  0x15   :  { %s53_s8 = sshll.u32 %s374_s7, 4  ;;  %s19_s10 = sshll.u32 %s375_s9, 4  ;;  %s54_s8 = int_to_ptr.vmem [resolvable:$true] %s53_s8  ;;  %s20_s10 = int_to_ptr.vmem [resolvable:$true] %s19_s10 }
  0x16   :  { %s253_s13 = scalar_lea.hbm %s501_s3, 256 }
  0x17   :  { %p254_p8 = scmp.ne.s32.totalorder %s501_s3, %s253_s13  ;;  %p257_p9 = scmp.lt.u32.totalorder %s253_s13, %s501_s3 }
  0x19   :  { %p259_p10 = pnand %p257_p9, %p254_p8 }
  0x1b   :  { %262 = shalt.err (!%p259_p10)
}
  0x1c   :  { %s263_s1 = scalar_lea.vmem %s54_s8, 256  ;;  %p268_p12 = scmp.lt.s32.totalorder %s54_s8, %s54_s8 }
  0x1d   :  { %p264_p11 = scmp.ne.s32.totalorder %s54_s8, %s263_s1  ;;  %p269_p13 = scmp.lt.s32.totalorder %s263_s1, %s263_s1 }
  0x1f   :  { %p270_p0 = por %p269_p13, %p268_p12 }
  0x21   :  { %p271_p1 = pnand %p270_p0, %p264_p11 }
  0x23   :  { %274 = shalt.err (!%p271_p1)
}
  0x24   :  { %s376_s18 = smov 128   ;;  %s377_s19 = smov 8  }
  0x25   :  { %59 = dma.hbm_to_vmem [thread:$0]  %s501_s3, 256, %s54_s8, [#allocation9], %s376_s18, %s376_s18, %s377_s19  }
  0x26   :  { %s275_s24 = scalar_lea.hbm %s498_s0, 256 }
  0x27   :  { %p276_p2 = scmp.ne.s32.totalorder %s498_s0, %s275_s24  ;;  %p279_p3 = scmp.lt.u32.totalorder %s275_s24, %s498_s0 }
  0x29   :  { %p281_p4 = pnand %p279_p3, %p276_p2 }
  0x2b   :  { %284 = shalt.err (!%p281_p4)
}
  0x2c   :  { %s285_s29 = scalar_lea.vmem %s20_s10, 256  ;;  %p290_p6 = scmp.lt.s32.totalorder %s20_s10, %s20_s10 }
  0x2d   :  { %p286_p5 = scmp.ne.s32.totalorder %s20_s10, %s285_s29  ;;  %p291_p7 = scmp.lt.s32.totalorder %s285_s29, %s285_s29 }
  0x2f   :  { %p292_p8 = por %p291_p7, %p290_p6 }
  0x31   :  { %p293_p9 = pnand %p292_p8, %p286_p5 }
  0x33   :  { %296 = shalt.err (!%p293_p9)
}
  0x34   :  { %25 = dma.hbm_to_vmem [thread:$0]  %s498_s0, 256, %s20_s10, [#allocation3], %s376_s18, %s376_s18, %s377_s19  }
  0x35   :  { %s378_s6 = smov [#allocation7]   ;;  %s379_s8 = smov [#allocation10]  }
  0x36   :  { %s44_s7 = sshll.u32 %s378_s6, 4  ;;  %s65_s9 = sshll.u32 %s379_s8, 4  ;;  %s45_s7 = int_to_ptr.vmem [resolvable:$true] %s44_s7  ;;  %s66_s9 = int_to_ptr.vmem [resolvable:$true] %s65_s9 }
  0x37   :  { %s297_s13 = scalar_lea.hbm %s500_s2, 16 }
  0x38   :  { %p298_p10 = scmp.ne.s32.totalorder %s500_s2, %s297_s13  ;;  %p301_p11 = scmp.lt.u32.totalorder %s297_s13, %s500_s2 }
  0x3a   :  { %p303_p12 = pnand %p301_p11, %p298_p10 }
  0x3c   :  { %306 = shalt.err (!%p303_p12)
}
  0x3d   :  { %s307_s0 = scalar_lea.vmem %s45_s7, 16  ;;  %s311_s10 = scalar_lea.vmem %s45_s7, 32 }
  0x3e   :  { %p308_p13 = scmp.ne.s32.totalorder %s45_s7, %s307_s0  ;;  %p312_p0 = scmp.lt.s32.totalorder %s45_s7, %s45_s7 }
  0x3f   :  { %p313_p1 = scmp.lt.s32.totalorder %s311_s10, %s307_s0 }
  0x41   :  { %p314_p2 = por %p313_p1, %p312_p0 }
  0x43   :  { %p315_p3 = pnand %p314_p2, %p308_p13 }
  0x45   :  { %318 = shalt.err (!%p315_p3)
}
  0x46   :  { %47 = dma.hbm_to_vmem [thread:$0]  %s500_s2, 16, %s45_s7, [#allocation6]  }
  0x47   :  { %s319_s23 = scalar_lea.hbm %s502_s4, 256 }
  0x48   :  { %p320_p4 = scmp.ne.s32.totalorder %s502_s4, %s319_s23  ;;  %p323_p5 = scmp.lt.u32.totalorder %s319_s23, %s502_s4 }
  0x4a   :  { %p325_p6 = pnand %p323_p5, %p320_p4 }
  0x4c   :  { %328 = shalt.err (!%p325_p6)
}
  0x4d   :  { %s329_s28 = scalar_lea.vmem %s66_s9, 256  ;;  %p334_p8 = scmp.lt.s32.totalorder %s66_s9, %s66_s9 }
  0x4e   :  { %p330_p7 = scmp.ne.s32.totalorder %s66_s9, %s329_s28  ;;  %p335_p9 = scmp.lt.s32.totalorder %s329_s28, %s329_s28 }
  0x50   :  { %p336_p10 = por %p335_p9, %p334_p8 }
  0x52   :  { %p337_p11 = pnand %p336_p10, %p330_p7 }
  0x54   :  { %340 = shalt.err (!%p337_p11)
}
  0x55   :  { %71 = dma.hbm_to_vmem [thread:$0]  %s502_s4, 256, %s66_s9, [#allocation9], %s376_s18, %s376_s18, %s377_s19  }
  0x56   :  { %363 = dma.done.wait [#allocation3], 256  }
  0x57   :  { %364 = vsyncadd [#allocation3], 4294967040 }
  0x58   :  { %365 = dma.done.wait [#allocation6], 144  }
  0x59   :  { %366 = vsyncadd [#allocation6], 4294967152 }
  0x5a   :  { %367 = dma.done.wait [#allocation9], 512  }
  0x5b   :  { %368 = vsyncadd [#allocation9], 4294966784  ;;  %v380_v0 = vmov 0.0   ;;  %vm381_vm0 = vmmov 0   ;;  %v382_v1 = vmov 0   ;;  %vm109_vm1 = vcmask 1045504  }
  0x5c   :  { %209 = vmatprep.subr.bf16.mxu0 %v380_v0  ;;  %211 = vmatprep.mubr.msk.bf16.mxu0 %vm381_vm0, %v380_v0  ;;  %v230_v2 = vld [vmem:[#allocation5] sm:$0x3f]   ;;  %v88_v3 = vld [vmem:[#allocation2] sm:$0xff]  ;;  %v89_v4 = vld [vmem:[#allocation2 + $0x8] sm:$0xff]  ;;  %vm105_vm2 = vcmask 97280   ;;  %vm182_vm3 = vcmask 293888  }
  0x5d   :  { %228 = vset.pattern.permute.xlu0 %v382_v1  ;;  %229 = vset.pattern.permute.xlu1 %v382_v1  ;;  %v154_v5 = vld [vmem:[#allocation8] sm:$0xff]  ;;  %v111_v6 = vsel %vm109_vm1, %v230_v2, 0  ;;  %v90_v7 = vpack.c.bf16 %v89_v4, %v88_v3  ;;  %v168_v8 = vld [vmem:[#allocation10] sm:$0xff]  ;;  %v155_v9 = vld [vmem:[#allocation8 + $0x8] sm:$0xff]  ;;  %s383_s4 = smov [#allocation11]  }
  0x5e   :  { %158 = vperm.xlu0 %228, %v154_v5   ;;  %210 = vmatpush3.bf16.msra.mxu0 %v111_v6  ;;  %v169_v10 = vld [vmem:[#allocation10 + $0x8] sm:$0xff]  ;;  %s190_s3 = sshll.u32 %s383_s4, 4  ;;  %s191_s3 = int_to_ptr.vmem [resolvable:$true] %s190_s3 }
  0x5f   :  { %172 = vperm.xlu1 %229, %v168_v8   ;;  %v204_v12 = vld [vmem:[#allocation7] ss:$0 sm:$0xff]  ;;  %s341_s30 = scalar_lea.vmem %s191_s3, 256  ;;  %p346_p13 = scmp.lt.s32.totalorder %s191_s3, %s191_s3 }
  0x60   :  { %p342_p12 = scmp.ne.s32.totalorder %s191_s3, %s341_s30  ;;  %p347_p0 = scmp.lt.s32.totalorder %s341_s30, %s341_s30 }
  0x61   :  { %212 = vmatmul.mubr.msk.bf16.vlgmr.msra.gmra.mrb[0].mxu0 %vm105_vm2, %v90_v7 }
  0x62   :  { %163 = vperm.xlu0 %228, %v155_v9   ;;  %p348_p1 = por %p347_p0, %p346_p13 }
  0x63   :  { %177 = vperm.xlu1 %229, %v169_v10  }
  0x64   :  { %p349_p2 = pnand %p348_p1, %p342_p12 }
  0xdd   :  { %v159_v11 = vpop.permute.xlu0 %158 }
  0xde   :  { %v173_v13 = vpop.permute.xlu1 %172 }
  0xe1   :  { %v164_v21 = vpop.permute.xlu0 %163 }
  0xe2   :  { %v178_v24 = vpop.permute.xlu1 %177 }
 0x134   :  { %v147_v14 = vpop.f32.mrb[0].mxu0 }
 0x135   :  { %v148_v15 = vadd.f32 %v204_v12, %v147_v14  ;;  %v213_v16 = vpop.f32.mrb[1].mxu0 }
 0x136   :  { %v150_v17 = vpop.f32.mrb[2].mxu0 }
 0x137   :  { %v166_v18 = vmul.f32 %v159_v11, %v148_v15  ;;  %v151_v19 = vadd.f32 %v204_v12, %v150_v17  ;;  %v214_v20 = vpop.f32.mrb[3].mxu0 }
 0x139   :  { %v180_v22 = vadd.f32 %v173_v13, %v166_v18  ;;  %v167_v23 = vmul.f32 %v164_v21, %v151_v19 }
 0x13b   :  { %v181_v25 = vadd.f32 %v178_v24, %v167_v23  ;;  %183 = vst.msk [vmem:[#allocation11] sm:$0xff] %vm182_vm3, %v180_v22 }
 0x13d   :  { %184 = vst.msk [vmem:[#allocation11 + $0x8] sm:$0xff] %vm182_vm3, %v181_v25 }
 0x13e   :  { %352 = shalt.err (!%p349_p2)
}
 0x13f   :  { %s353_s8 = scalar_lea.hbm %s503_s5, 256 }
 0x140   :  { %p354_p3 = scmp.ne.s32.totalorder %s503_s5, %s353_s8  ;;  %p357_p4 = scmp.lt.u32.totalorder %s353_s8, %s503_s5 }
 0x142   :  { %p359_p5 = pnand %p357_p4, %p354_p3 }
 0x144   :  { %362 = shalt.err (!%p359_p5)
}
 0x145   :  { %196 = dma.vmem_to_hbm [thread:$0]  %s191_s3, 256, %s503_s5, [#allocation4], %s376_s18, %s376_s18, %s377_s19  }
 0x146   :  { %369 = dma.done.wait [#allocation4], 256  }
 0x147   :  { %370 = vsyncadd [#allocation4], 4294967040 }
 0x148   :  { %200 = vsyncpa [#allocation3], 1 }
 0x149   :  { %201 = vsyncpa [#allocation6], 1 }
 0x14a   :  { %202 = vsyncpa [#allocation9], 1 }
 0x14b   :  { %203 = vsyncpa [#allocation4], 1 }

// kernel: smlpnet_forward.55
= control target key start
LH: loop header
LB: loop body
LE: loop exit
PB: predicated region body
PF: predicated region fallthrough
CT: control target
= control target key end

     0   :  { %8 = vsyncpa [#allocation3], 0  ;;  %s365_s0 = inlined_call_operand.hbm [shape: f32[16,36], index: 0, kind: input, shape index: {}]   ;;  %s366_s1 = inlined_call_operand.hbm [shape: bf16[36,12], index: 1, kind: input, shape index: {}]   ;;  %s367_s2 = inlined_call_operand.hbm [shape: f32[1,12], index: 2, kind: input, shape index: {}]   ;;  %s368_s3 = inlined_call_operand.hbm [shape: f32[16,12], index: 3, kind: output, shape index: {}]  }
   0x1   :  { %9 = vsyncpa [#allocation6], 0 }
   0x2   :  { %10 = vsyncpa [#allocation4], 0  ;;  %s281_s12 = smov [#allocation5]   ;;  %s187_s16 = scalar_lea.hbm %s366_s1, 320 }
   0x3   :  { %s28_s13 = sshll.u32 %s281_s12, 4  ;;  %p188_p0 = scmp.ne.s32.totalorder %s366_s1, %s187_s16  ;;  %s29_s13 = int_to_ptr.vmem [resolvable:$true] %s28_s13 }
   0x4   :  { %p191_p1 = scmp.lt.u32.totalorder %s187_s16, %s366_s1 }
   0x6   :  { %p193_p2 = pnand %p191_p1, %p188_p0 }
   0x8   :  { %196 = shalt.err (!%p193_p2)
}
   0x9   :  { %s197_s21 = scalar_lea.vmem %s29_s13, 320  ;;  %p202_p4 = scmp.lt.s32.totalorder %s29_s13, %s29_s13 }
   0xa   :  { %p198_p3 = scmp.ne.s32.totalorder %s29_s13, %s197_s21  ;;  %p203_p5 = scmp.lt.s32.totalorder %s197_s21, %s197_s21 }
   0xc   :  { %p204_p6 = por %p203_p5, %p202_p4 }
   0xe   :  { %p205_p7 = pnand %p204_p6, %p198_p3 }
  0x10   :  { %208 = shalt.err (!%p205_p7)
}
  0x11   :  { %s282_s22 = smov 64   ;;  %s283_s23 = smov 4  }
  0x12   :  { %34 = dma.hbm_to_vmem [thread:$0]  %s366_s1, 320, %s29_s13, [#allocation6], %s282_s22, %s282_s22, %s283_s23  }
  0x13   :  { %s284_s26 = smov [#allocation2]   ;;  %s209_s30 = scalar_lea.hbm %s365_s0, 256 }
  0x14   :  { %s16_s27 = sshll.u32 %s284_s26, 4  ;;  %p210_p8 = scmp.ne.s32.totalorder %s365_s0, %s209_s30  ;;  %s17_s27 = int_to_ptr.vmem [resolvable:$true] %s16_s27 }
  0x15   :  { %p213_p9 = scmp.lt.u32.totalorder %s209_s30, %s365_s0 }
  0x17   :  { %p215_p10 = pnand %p213_p9, %p210_p8 }
  0x19   :  { %218 = shalt.err (!%p215_p10)
}
  0x1a   :  { %s219_s8 = scalar_lea.vmem %s17_s27, 256  ;;  %p224_p12 = scmp.lt.s32.totalorder %s17_s27, %s17_s27 }
  0x1b   :  { %p220_p11 = scmp.ne.s32.totalorder %s17_s27, %s219_s8  ;;  %p225_p13 = scmp.lt.s32.totalorder %s219_s8, %s219_s8 }
  0x1d   :  { %p226_p0 = por %p225_p13, %p224_p12 }
  0x1f   :  { %p227_p1 = pnand %p226_p0, %p220_p11 }
  0x21   :  { %230 = shalt.err (!%p227_p1)
}
  0x22   :  { %s285_s1 = smov 128   ;;  %s286_s9 = smov 8  }
  0x23   :  { %22 = dma.hbm_to_vmem [thread:$0]  %s365_s0, 256, %s17_s27, [#allocation3], %s285_s1, %s285_s1, %s286_s9  }
  0x24   :  { %s287_s12 = smov [#allocation7]   ;;  %s231_s16 = scalar_lea.hbm %s367_s2, 16 }
  0x25   :  { %s41_s13 = sshll.u32 %s287_s12, 4  ;;  %p232_p2 = scmp.ne.s32.totalorder %s367_s2, %s231_s16  ;;  %s42_s13 = int_to_ptr.vmem [resolvable:$true] %s41_s13 }
  0x26   :  { %p235_p3 = scmp.lt.u32.totalorder %s231_s16, %s367_s2 }
  0x28   :  { %p237_p4 = pnand %p235_p3, %p232_p2 }
  0x2a   :  { %240 = shalt.err (!%p237_p4)
}
  0x2b   :  { %s241_s21 = scalar_lea.vmem %s42_s13, 16  ;;  %s245_s0 = scalar_lea.vmem %s42_s13, 32 }
  0x2c   :  { %p242_p5 = scmp.ne.s32.totalorder %s42_s13, %s241_s21  ;;  %p246_p6 = scmp.lt.s32.totalorder %s42_s13, %s42_s13 }
  0x2d   :  { %p247_p7 = scmp.lt.s32.totalorder %s245_s0, %s241_s21 }
  0x2f   :  { %p248_p8 = por %p247_p7, %p246_p6 }
  0x31   :  { %p249_p9 = pnand %p248_p8, %p242_p5 }
  0x33   :  { %252 = shalt.err (!%p249_p9)
}
  0x34   :  { %44 = dma.hbm_to_vmem [thread:$0]  %s367_s2, 16, %s42_s13, [#allocation6]  }
  0x35   :  { %275 = dma.done.wait [#allocation3], 256  }
  0x36   :  { %276 = vsyncadd [#allocation3], 4294967040 }
  0x37   :  { %277 = dma.done.wait [#allocation6], 336  }
  0x38   :  { %278 = vsyncadd [#allocation6], 4294966960  ;;  %v288_v0 = vmov 0.0   ;;  %vm289_vm0 = vmmov 0   ;;  %v184_v1 = vld [vmem:[#allocation5] sm:$0xff]   ;;  %v185_v2 = vld [vmem:[#allocation5 + $0x8] sm:$0xff]  }
  0x39   :  { %164 = vmatprep.subr.bf16.mxu0 %v288_v0  ;;  %170 = vmatprep.mubr.msk.bf16.mxu0 %vm289_vm0, %v288_v0  ;;  %v186_v3 = vld [vmem:[#allocation5 + $0x10] ss:$0 sps:$4 sm:$0x33]   ;;  %vm89_vm1 = vcmask 1041408   ;;  %v56_v5 = vld [vmem:[#allocation2 + $0x8] sm:$0xff]  ;;  %vm85_vm2 = vcmask 293888  }
  0x3a   :  { %165 = vmatpush3.bf16.msra.mxu0 %v184_v1  ;;  %v55_v4 = vld [vmem:[#allocation2] sm:$0xff]  ;;  %v91_v6 = vsel %vm89_vm1, %v186_v3, 0  ;;  %vm134_vm3 = vcmask 97280   ;;  %s290_s2 = smov [#allocation8]  }
  0x3b   :  { %166 = vmatprep.subr.bf16.mxu0 %v288_v0  ;;  %v57_v7 = vpack.c.bf16 %v56_v5, %v55_v4  ;;  %v155_v8 = vld [vmem:[#allocation7] ss:$0 sm:$0xff]  ;;  %s142_s24 = sshll.u32 %s290_s2, 4  ;;  %s143_s24 = int_to_ptr.vmem [resolvable:$true] %s142_s24 }
  0x3c   :  { %s253_s25 = scalar_lea.vmem %s143_s24, 256  ;;  %p258_p11 = scmp.lt.s32.totalorder %s143_s24, %s143_s24 }
  0x3d   :  { %p254_p10 = scmp.ne.s32.totalorder %s143_s24, %s253_s25  ;;  %p259_p12 = scmp.lt.s32.totalorder %s253_s25, %s253_s25 }
  0x3e   :  { %167 = vmatpush3.bf16.msra.mxu0 %v185_v2 }
  0x3f   :  { %168 = vmatprep.subr.bf16.mxu0 %v288_v0  ;;  %p260_p13 = por %p259_p12, %p258_p11 }
  0x41   :  { %p261_p0 = pnand %p260_p13, %p254_p10 }
  0x42   :  { %169 = vmatpush3.bf16.msra.mxu0 %v91_v6 }
  0x45   :  { %171 = vmatmul.mubr.msk.bf16.vlgmr.msra.gmra.mrb[0].mxu0 %vm85_vm2, %v57_v7 }
 0x118   :  { %v127_v9 = vpop.f32.mrb[0].mxu0 }
 0x119   :  { %v128_v10 = vadd.f32 %v155_v8, %v127_v9  ;;  %v172_v11 = vpop.f32.mrb[1].mxu0 }
 0x11a   :  { %v130_v12 = vpop.f32.mrb[2].mxu0 }
 0x11b   :  { %v131_v13 = vadd.f32 %v155_v8, %v130_v12  ;;  %v173_v14 = vpop.f32.mrb[3].mxu0  ;;  %135 = vst.msk [vmem:[#allocation8] sm:$0xff] %vm134_vm3, %v128_v10 }
 0x11d   :  { %136 = vst.msk [vmem:[#allocation8 + $0x8] sm:$0xff] %vm134_vm3, %v131_v13 }
 0x11e   :  { %264 = shalt.err (!%p261_p0)
}
 0x11f   :  { %s265_s28 = scalar_lea.hbm %s368_s3, 256 }
 0x120   :  { %p266_p1 = scmp.ne.s32.totalorder %s368_s3, %s265_s28  ;;  %p269_p2 = scmp.lt.u32.totalorder %s265_s28, %s368_s3 }
 0x122   :  { %p271_p3 = pnand %p269_p2, %p266_p1 }
 0x124   :  { %274 = shalt.err (!%p271_p3)
}
 0x125   :  { %148 = dma.vmem_to_hbm [thread:$0]  %s143_s24, 256, %s368_s3, [#allocation4], %s285_s1, %s285_s1, %s286_s9  }
 0x126   :  { %279 = dma.done.wait [#allocation4], 256  }
 0x127   :  { %280 = vsyncadd [#allocation4], 4294967040 }
 0x128   :  { %152 = vsyncpa [#allocation3], 1 }
 0x129   :  { %153 = vsyncpa [#allocation6], 1 }
 0x12a   :  { %154 = vsyncpa [#allocation4], 1 }

// kernel: smlpnet_forward.59
= control target key start
LH: loop header
LB: loop body
LE: loop exit
PB: predicated region body
PF: predicated region fallthrough
CT: control target
= control target key end

     0   :  { %10 = vsyncpa [#allocation3], 0  ;;  %s521_s0 = inlined_call_operand.hbm [shape: f32[16,36], index: 0, kind: input, shape index: {}]   ;;  %s522_s1 = inlined_call_operand.hbm [shape: bf16[36,12], index: 1, kind: input, shape index: {}]   ;;  %s523_s2 = inlined_call_operand.hbm [shape: f32[1,12], index: 2, kind: input, shape index: {}]   ;;  %s524_s3 = inlined_call_operand.hbm [shape: f32[16,1], index: 3, kind: input, shape index: {}]   ;;  %s525_s4 = inlined_call_operand.hbm [shape: f32[16,1], index: 4, kind: input, shape index: {}]   ;;  %s526_s5 = inlined_call_operand.hbm [shape: f32[16,12], index: 5, kind: output, shape index: {}]  }
   0x1   :  { %11 = vsyncpa [#allocation6], 0 }
   0x2   :  { %12 = vsyncpa [#allocation9], 0 }
   0x3   :  { %13 = vsyncpa [#allocation4], 0  ;;  %s394_s18 = smov [#allocation5]   ;;  %s254_s22 = scalar_lea.hbm %s522_s1, 320 }
   0x4   :  { %s31_s19 = sshll.u32 %s394_s18, 4  ;;  %p255_p0 = scmp.ne.s32.totalorder %s522_s1, %s254_s22  ;;  %s32_s19 = int_to_ptr.vmem [resolvable:$true] %s31_s19 }
   0x5   :  { %p258_p1 = scmp.lt.u32.totalorder %s254_s22, %s522_s1 }
   0x7   :  { %p260_p2 = pnand %p258_p1, %p255_p0 }
   0x9   :  { %263 = shalt.err (!%p260_p2)
}
   0xa   :  { %s264_s27 = scalar_lea.vmem %s32_s19, 320  ;;  %p269_p4 = scmp.lt.s32.totalorder %s32_s19, %s32_s19 }
   0xb   :  { %p265_p3 = scmp.ne.s32.totalorder %s32_s19, %s264_s27  ;;  %p270_p5 = scmp.lt.s32.totalorder %s264_s27, %s264_s27 }
   0xd   :  { %p271_p6 = por %p270_p5, %p269_p4 }
   0xf   :  { %p272_p7 = pnand %p271_p6, %p265_p3 }
  0x11   :  { %275 = shalt.err (!%p272_p7)
}
  0x12   :  { %s395_s28 = smov 64   ;;  %s396_s29 = smov 4  }
  0x13   :  { %37 = dma.hbm_to_vmem [thread:$0]  %s522_s1, 320, %s32_s19, [#allocation6], %s395_s28, %s395_s28, %s396_s29  }
  0x14   :  { %s397_s7 = smov [#allocation8]   ;;  %s398_s9 = smov [#allocation2]  }
  0x15   :  { %s53_s8 = sshll.u32 %s397_s7, 4  ;;  %s19_s10 = sshll.u32 %s398_s9, 4  ;;  %s54_s8 = int_to_ptr.vmem [resolvable:$true] %s53_s8  ;;  %s20_s10 = int_to_ptr.vmem [resolvable:$true] %s19_s10 }
  0x16   :  { %s276_s13 = scalar_lea.hbm %s524_s3, 256 }
  0x17   :  { %p277_p8 = scmp.ne.s32.totalorder %s524_s3, %s276_s13  ;;  %p280_p9 = scmp.lt.u32.totalorder %s276_s13, %s524_s3 }
  0x19   :  { %p282_p10 = pnand %p280_p9, %p277_p8 }
  0x1b   :  { %285 = shalt.err (!%p282_p10)
}
  0x1c   :  { %s286_s1 = scalar_lea.vmem %s54_s8, 256  ;;  %p291_p12 = scmp.lt.s32.totalorder %s54_s8, %s54_s8 }
  0x1d   :  { %p287_p11 = scmp.ne.s32.totalorder %s54_s8, %s286_s1  ;;  %p292_p13 = scmp.lt.s32.totalorder %s286_s1, %s286_s1 }
  0x1f   :  { %p293_p0 = por %p292_p13, %p291_p12 }
  0x21   :  { %p294_p1 = pnand %p293_p0, %p287_p11 }
  0x23   :  { %297 = shalt.err (!%p294_p1)
}
  0x24   :  { %s399_s18 = smov 128   ;;  %s400_s19 = smov 8  }
  0x25   :  { %59 = dma.hbm_to_vmem [thread:$0]  %s524_s3, 256, %s54_s8, [#allocation9], %s399_s18, %s399_s18, %s400_s19  }
  0x26   :  { %s298_s24 = scalar_lea.hbm %s521_s0, 256 }
  0x27   :  { %p299_p2 = scmp.ne.s32.totalorder %s521_s0, %s298_s24  ;;  %p302_p3 = scmp.lt.u32.totalorder %s298_s24, %s521_s0 }
  0x29   :  { %p304_p4 = pnand %p302_p3, %p299_p2 }
  0x2b   :  { %307 = shalt.err (!%p304_p4)
}
  0x2c   :  { %s308_s29 = scalar_lea.vmem %s20_s10, 256  ;;  %p313_p6 = scmp.lt.s32.totalorder %s20_s10, %s20_s10 }
  0x2d   :  { %p309_p5 = scmp.ne.s32.totalorder %s20_s10, %s308_s29  ;;  %p314_p7 = scmp.lt.s32.totalorder %s308_s29, %s308_s29 }
  0x2f   :  { %p315_p8 = por %p314_p7, %p313_p6 }
  0x31   :  { %p316_p9 = pnand %p315_p8, %p309_p5 }
  0x33   :  { %319 = shalt.err (!%p316_p9)
}
  0x34   :  { %25 = dma.hbm_to_vmem [thread:$0]  %s521_s0, 256, %s20_s10, [#allocation3], %s399_s18, %s399_s18, %s400_s19  }
  0x35   :  { %s401_s6 = smov [#allocation7]   ;;  %s402_s8 = smov [#allocation10]  }
  0x36   :  { %s44_s7 = sshll.u32 %s401_s6, 4  ;;  %s65_s9 = sshll.u32 %s402_s8, 4  ;;  %s45_s7 = int_to_ptr.vmem [resolvable:$true] %s44_s7  ;;  %s66_s9 = int_to_ptr.vmem [resolvable:$true] %s65_s9 }
  0x37   :  { %s320_s13 = scalar_lea.hbm %s523_s2, 16 }
  0x38   :  { %p321_p10 = scmp.ne.s32.totalorder %s523_s2, %s320_s13  ;;  %p324_p11 = scmp.lt.u32.totalorder %s320_s13, %s523_s2 }
  0x3a   :  { %p326_p12 = pnand %p324_p11, %p321_p10 }
  0x3c   :  { %329 = shalt.err (!%p326_p12)
}
  0x3d   :  { %s330_s0 = scalar_lea.vmem %s45_s7, 16  ;;  %s334_s10 = scalar_lea.vmem %s45_s7, 32 }
  0x3e   :  { %p331_p13 = scmp.ne.s32.totalorder %s45_s7, %s330_s0  ;;  %p335_p0 = scmp.lt.s32.totalorder %s45_s7, %s45_s7 }
  0x3f   :  { %p336_p1 = scmp.lt.s32.totalorder %s334_s10, %s330_s0 }
  0x41   :  { %p337_p2 = por %p336_p1, %p335_p0 }
  0x43   :  { %p338_p3 = pnand %p337_p2, %p331_p13 }
  0x45   :  { %341 = shalt.err (!%p338_p3)
}
  0x46   :  { %47 = dma.hbm_to_vmem [thread:$0]  %s523_s2, 16, %s45_s7, [#allocation6]  }
  0x47   :  { %s342_s23 = scalar_lea.hbm %s525_s4, 256 }
  0x48   :  { %p343_p4 = scmp.ne.s32.totalorder %s525_s4, %s342_s23  ;;  %p346_p5 = scmp.lt.u32.totalorder %s342_s23, %s525_s4 }
  0x4a   :  { %p348_p6 = pnand %p346_p5, %p343_p4 }
  0x4c   :  { %351 = shalt.err (!%p348_p6)
}
  0x4d   :  { %s352_s28 = scalar_lea.vmem %s66_s9, 256  ;;  %p357_p8 = scmp.lt.s32.totalorder %s66_s9, %s66_s9 }
  0x4e   :  { %p353_p7 = scmp.ne.s32.totalorder %s66_s9, %s352_s28  ;;  %p358_p9 = scmp.lt.s32.totalorder %s352_s28, %s352_s28 }
  0x50   :  { %p359_p10 = por %p358_p9, %p357_p8 }
  0x52   :  { %p360_p11 = pnand %p359_p10, %p353_p7 }
  0x54   :  { %363 = shalt.err (!%p360_p11)
}
  0x55   :  { %71 = dma.hbm_to_vmem [thread:$0]  %s525_s4, 256, %s66_s9, [#allocation9], %s399_s18, %s399_s18, %s400_s19  }
  0x56   :  { %386 = dma.done.wait [#allocation3], 256  }
  0x57   :  { %387 = vsyncadd [#allocation3], 4294967040 }
  0x58   :  { %388 = dma.done.wait [#allocation6], 336  }
  0x59   :  { %389 = vsyncadd [#allocation6], 4294966960 }
  0x5a   :  { %390 = dma.done.wait [#allocation9], 512  }
  0x5b   :  { %391 = vsyncadd [#allocation9], 4294966784  ;;  %v403_v0 = vmov 0.0   ;;  %vm404_vm0 = vmmov 0   ;;  %v405_v1 = vmov 0   ;;  %v251_v2 = vld [vmem:[#allocation5] sm:$0xff]  }
  0x5c   :  { %226 = vmatprep.subr.bf16.mxu0 %v403_v0  ;;  %232 = vmatprep.mubr.msk.bf16.mxu0 %vm404_vm0, %v403_v0  ;;  %v252_v3 = vld [vmem:[#allocation5 + $0x8] sm:$0xff]   ;;  %v253_v4 = vld [vmem:[#allocation5 + $0x10] ss:$0 sps:$4 sm:$0x33]   ;;  %v167_v5 = vld [vmem:[#allocation8] sm:$0xff]  ;;  %vm122_vm1 = vcmask 1041408  }
  0x5d   :  { %249 = vset.pattern.permute.xlu0 %v405_v1  ;;  %250 = vset.pattern.permute.xlu1 %v405_v1  ;;  %v181_v6 = vld [vmem:[#allocation10] sm:$0xff]  ;;  %v168_v7 = vld [vmem:[#allocation8 + $0x8] sm:$0xff]  ;;  %v182_v8 = vld [vmem:[#allocation10 + $0x8] sm:$0xff]  ;;  %v124_v11 = vsel %vm122_vm1, %v253_v4, 0  ;;  %vm118_vm2 = vcmask 293888   ;;  %vm195_vm3 = vcmask 97280  }
  0x5e   :  { %227 = vmatpush3.bf16.msra.mxu0 %v251_v2  ;;  %171 = vperm.xlu0 %249, %v167_v5   ;;  %v88_v9 = vld [vmem:[#allocation2] sm:$0xff]  ;;  %v89_v10 = vld [vmem:[#allocation2 + $0x8] sm:$0xff]  ;;  %s406_s4 = smov [#allocation11]  }
  0x5f   :  { %228 = vmatprep.subr.bf16.mxu0 %v403_v0  ;;  %185 = vperm.xlu1 %250, %v181_v6   ;;  %v90_v12 = vpack.c.bf16 %v89_v10, %v88_v9  ;;  %v217_v14 = vld [vmem:[#allocation7] ss:$0 sm:$0xff]  ;;  %s203_s3 = sshll.u32 %s406_s4, 4  ;;  %s204_s3 = int_to_ptr.vmem [resolvable:$true] %s203_s3 }
  0x60   :  { %s364_s30 = scalar_lea.vmem %s204_s3, 256  ;;  %p369_p13 = scmp.lt.s32.totalorder %s204_s3, %s204_s3 }
  0x61   :  { %p365_p12 = scmp.ne.s32.totalorder %s204_s3, %s364_s30  ;;  %p370_p0 = scmp.lt.s32.totalorder %s364_s30, %s364_s30 }
  0x62   :  { %229 = vmatpush3.bf16.msra.mxu0 %v252_v3  ;;  %176 = vperm.xlu0 %249, %v168_v7  }
  0x63   :  { %230 = vmatprep.subr.bf16.mxu0 %v403_v0  ;;  %190 = vperm.xlu1 %250, %v182_v8   ;;  %p371_p1 = por %p370_p0, %p369_p13 }
  0x65   :  { %p372_p2 = pnand %p371_p1, %p365_p12 }
  0x66   :  { %231 = vmatpush3.bf16.msra.mxu0 %v124_v11 }
  0x69   :  { %233 = vmatmul.mubr.msk.bf16.vlgmr.msra.gmra.mrb[0].mxu0 %vm118_vm2, %v90_v12 }
  0xdd   :  { %v172_v13 = vpop.permute.xlu0 %171 }
  0xde   :  { %v186_v15 = vpop.permute.xlu1 %185 }
  0xe1   :  { %v177_v23 = vpop.permute.xlu0 %176 }
  0xe2   :  { %v191_v26 = vpop.permute.xlu1 %190 }
 0x13c   :  { %v160_v16 = vpop.f32.mrb[0].mxu0 }
 0x13d   :  { %v161_v17 = vadd.f32 %v217_v14, %v160_v16  ;;  %v234_v18 = vpop.f32.mrb[1].mxu0 }
 0x13e   :  { %v163_v19 = vpop.f32.mrb[2].mxu0 }
 0x13f   :  { %v179_v20 = vmul.f32 %v172_v13, %v161_v17  ;;  %v164_v21 = vadd.f32 %v217_v14, %v163_v19  ;;  %v235_v22 = vpop.f32.mrb[3].mxu0 }
 0x141   :  { %v193_v24 = vadd.f32 %v186_v15, %v179_v20  ;;  %v180_v25 = vmul.f32 %v177_v23, %v164_v21 }
 0x143   :  { %v194_v27 = vadd.f32 %v191_v26, %v180_v25  ;;  %196 = vst.msk [vmem:[#allocation11] sm:$0xff] %vm195_vm3, %v193_v24 }
 0x145   :  { %197 = vst.msk [vmem:[#allocation11 + $0x8] sm:$0xff] %vm195_vm3, %v194_v27 }
 0x146   :  { %375 = shalt.err (!%p372_p2)
}
 0x147   :  { %s376_s8 = scalar_lea.hbm %s526_s5, 256 }
 0x148   :  { %p377_p3 = scmp.ne.s32.totalorder %s526_s5, %s376_s8  ;;  %p380_p4 = scmp.lt.u32.totalorder %s376_s8, %s526_s5 }
 0x14a   :  { %p382_p5 = pnand %p380_p4, %p377_p3 }
 0x14c   :  { %385 = shalt.err (!%p382_p5)
}
 0x14d   :  { %209 = dma.vmem_to_hbm [thread:$0]  %s204_s3, 256, %s526_s5, [#allocation4], %s399_s18, %s399_s18, %s400_s19  }
 0x14e   :  { %392 = dma.done.wait [#allocation4], 256  }
 0x14f   :  { %393 = vsyncadd [#allocation4], 4294967040 }
 0x150   :  { %213 = vsyncpa [#allocation3], 1 }
 0x151   :  { %214 = vsyncpa [#allocation6], 1 }
 0x152   :  { %215 = vsyncpa [#allocation9], 1 }
 0x153   :  { %216 = vsyncpa [#allocation4], 1 }

// kernel: smlpnet_forward.61
= control target key start
LH: loop header
LB: loop body
LE: loop exit
PB: predicated region body
PF: predicated region fallthrough
CT: control target
= control target key end

     0   :  { %8 = vsyncpa [#allocation3], 0  ;;  %s348_s0 = inlined_call_operand.hbm [shape: f32[8,48], index: 0, kind: input, shape index: {}]   ;;  %s349_s1 = inlined_call_operand.hbm [shape: bf16[48,10], index: 1, kind: input, shape index: {}]   ;;  %s350_s2 = inlined_call_operand.hbm [shape: f32[1,10], index: 2, kind: input, shape index: {}]   ;;  %s351_s3 = inlined_call_operand.hbm [shape: f32[8,10], index: 3, kind: output, shape index: {}]  }
   0x1   :  { %9 = vsyncpa [#allocation6], 0 }
   0x2   :  { %10 = vsyncpa [#allocation4], 0  ;;  %s272_s12 = smov [#allocation5]   ;;  %s178_s16 = scalar_lea.hbm %s349_s1, 384 }
   0x3   :  { %s26_s13 = sshll.u32 %s272_s12, 4  ;;  %p179_p0 = scmp.ne.s32.totalorder %s349_s1, %s178_s16  ;;  %s27_s13 = int_to_ptr.vmem [resolvable:$true] %s26_s13 }
   0x4   :  { %p182_p1 = scmp.lt.u32.totalorder %s178_s16, %s349_s1 }
   0x6   :  { %p184_p2 = pnand %p182_p1, %p179_p0 }
   0x8   :  { %187 = shalt.err (!%p184_p2)
}
   0x9   :  { %s188_s21 = scalar_lea.vmem %s27_s13, 384  ;;  %p193_p4 = scmp.lt.s32.totalorder %s27_s13, %s27_s13 }
   0xa   :  { %p189_p3 = scmp.ne.s32.totalorder %s27_s13, %s188_s21  ;;  %p194_p5 = scmp.lt.s32.totalorder %s188_s21, %s188_s21 }
   0xc   :  { %p195_p6 = por %p194_p5, %p193_p4 }
   0xe   :  { %p196_p7 = pnand %p195_p6, %p189_p3 }
  0x10   :  { %199 = shalt.err (!%p196_p7)
}
  0x11   :  { %s273_s22 = smov 64   ;;  %s274_s23 = smov 4  }
  0x12   :  { %32 = dma.hbm_to_vmem [thread:$0]  %s349_s1, 384, %s27_s13, [#allocation6], %s273_s22, %s273_s22, %s274_s23  }
  0x13   :  { %s275_s26 = smov [#allocation2]   ;;  %s276_s28 = smov [#allocation7]  }
  0x14   :  { %s17_s27 = sshll.u32 %s275_s26, 4  ;;  %s39_s29 = sshll.u32 %s276_s28, 4  ;;  %s18_s27 = int_to_ptr.vmem [resolvable:$true] %s17_s27  ;;  %s40_s29 = int_to_ptr.vmem [resolvable:$true] %s39_s29 }
  0x15   :  { %s200_s5 = scalar_lea.hbm %s348_s0, 128 }
  0x16   :  { %p201_p8 = scmp.ne.s32.totalorder %s348_s0, %s200_s5  ;;  %p204_p9 = scmp.lt.u32.totalorder %s200_s5, %s348_s0 }
  0x18   :  { %p206_p10 = pnand %p204_p9, %p201_p8 }
  0x1a   :  { %209 = shalt.err (!%p206_p10)
}
  0x1b   :  { %s210_s1 = scalar_lea.vmem %s18_s27, 128  ;;  %p215_p12 = scmp.lt.s32.totalorder %s18_s27, %s18_s27 }
  0x1c   :  { %p211_p11 = scmp.ne.s32.totalorder %s18_s27, %s210_s1  ;;  %p216_p13 = scmp.lt.s32.totalorder %s210_s1, %s210_s1 }
  0x1e   :  { %p217_p0 = por %p216_p13, %p215_p12 }
  0x20   :  { %p218_p1 = pnand %p217_p0, %p211_p11 }
  0x22   :  { %221 = shalt.err (!%p218_p1)
}
  0x23   :  { %20 = dma.hbm_to_vmem [thread:$0]  %s348_s0, 128, %s18_s27, [#allocation3]  }
  0x24   :  { %s222_s14 = scalar_lea.hbm %s350_s2, 16 }
  0x25   :  { %p223_p2 = scmp.ne.s32.totalorder %s350_s2, %s222_s14  ;;  %p226_p3 = scmp.lt.u32.totalorder %s222_s14, %s350_s2 }
  0x27   :  { %p228_p4 = pnand %p226_p3, %p223_p2 }
  0x29   :  { %231 = shalt.err (!%p228_p4)
}
  0x2a   :  { %s232_s19 = scalar_lea.vmem %s40_s29, 16  ;;  %s236_s20 = scalar_lea.vmem %s40_s29, 32 }
  0x2b   :  { %p233_p5 = scmp.ne.s32.totalorder %s40_s29, %s232_s19  ;;  %p237_p6 = scmp.lt.s32.totalorder %s40_s29, %s40_s29 }
  0x2c   :  { %p238_p7 = scmp.lt.s32.totalorder %s236_s20, %s232_s19 }
  0x2e   :  { %p239_p8 = por %p238_p7, %p237_p6 }
  0x30   :  { %p240_p9 = pnand %p239_p8, %p233_p5 }
  0x32   :  { %243 = shalt.err (!%p240_p9)
}
  0x33   :  { %42 = dma.hbm_to_vmem [thread:$0]  %s350_s2, 16, %s40_s29, [#allocation6]  }
  0x34   :  { %266 = dma.done.wait [#allocation3], 128  }
  0x35   :  { %267 = vsyncadd [#allocation3], 4294967168 }
  0x36   :  { %268 = dma.done.wait [#allocation6], 400  }
  0x37   :  { %269 = vsyncadd [#allocation6], 4294966896  ;;  %v277_v0 = vmov 0.0   ;;  %vm278_vm0 = vmmov 0   ;;  %v175_v1 = vld [vmem:[#allocation5] sm:$0xff]   ;;  %v176_v2 = vld [vmem:[#allocation5 + $0x8] sm:$0xff]  }
  0x38   :  { %157 = vmatprep.subr.bf16.mxu0 %v277_v0  ;;  %163 = vmatprep.mubr.msk.bf16.mxu0 %vm278_vm0, %v277_v0  ;;  %v177_v3 = vld [vmem:[#allocation5 + $0x10] sm:$0xff]   ;;  %v53_v4 = vld [vmem:[#allocation2] sm:$0xff]  ;;  %vm86_vm1 = vcmask 392192   ;;  %s279_s2 = smov [#allocation8]   ;;  %vm130_vm2 = vcmask 80896  }
  0x39   :  { %158 = vmatpush3.bf16.msra.mxu0 %v175_v1  ;;  %v54_v5 = vpack.c.bf16 %v53_v4, %v53_v4  ;;  %v148_v6 = vld [vmem:[#allocation7] ss:$0 sm:$0xff]  ;;  %s138_s22 = sshll.u32 %s279_s2, 4  ;;  %s139_s22 = int_to_ptr.vmem [resolvable:$true] %s138_s22 }
  0x3a   :  { %159 = vmatprep.subr.bf16.mxu0 %v277_v0  ;;  %s244_s23 = scalar_lea.vmem %s139_s22, 128  ;;  %p249_p11 = scmp.lt.s32.totalorder %s139_s22, %s139_s22 }
  0x3b   :  { %p245_p10 = scmp.ne.s32.totalorder %s139_s22, %s244_s23  ;;  %p250_p12 = scmp.lt.s32.totalorder %s244_s23, %s244_s23 }
  0x3d   :  { %160 = vmatpush3.bf16.msra.mxu0 %v176_v2  ;;  %p251_p13 = por %p250_p12, %p249_p11 }
  0x3e   :  { %161 = vmatprep.subr.bf16.mxu0 %v277_v0 }
  0x3f   :  { %p252_p0 = pnand %p251_p13, %p245_p10 }
  0x41   :  { %162 = vmatpush3.bf16.msra.mxu0 %v177_v3 }
  0x44   :  { %164 = vmatmul.mubr.msk.bf16.vlgmr.msra.gmra.mrb[0].mxu0 %vm86_vm1, %v54_v5 }
 0x117   :  { %v124_v7 = vpop.f32.mrb[0].mxu0 }
 0x118   :  { %v125_v8 = vadd.f32 %v148_v6, %v124_v7  ;;  %v165_v9 = vpop.f32.mrb[1].mxu0 }
 0x119   :  { %v127_v10 = vpop.f32.mrb[2].mxu0 }
 0x11a   :  { %v166_v11 = vpop.f32.mrb[3].mxu0  ;;  %131 = vst.msk [vmem:[#allocation8] sm:$0xff] %vm130_vm2, %v125_v8 }
 0x11b   :  { %255 = shalt.err (!%p252_p0)
}
 0x11c   :  { %s256_s26 = scalar_lea.hbm %s351_s3, 128 }
 0x11d   :  { %p257_p1 = scmp.ne.s32.totalorder %s351_s3, %s256_s26  ;;  %p260_p2 = scmp.lt.u32.totalorder %s256_s26, %s351_s3 }
 0x11f   :  { %p262_p3 = pnand %p260_p2, %p257_p1 }
 0x121   :  { %265 = shalt.err (!%p262_p3)
}
 0x122   :  { %141 = dma.vmem_to_hbm [thread:$0]  %s139_s22, 128, %s351_s3, [#allocation4]  }
 0x123   :  { %270 = dma.done.wait [#allocation4], 128  }
 0x124   :  { %271 = vsyncadd [#allocation4], 4294967168 }
 0x125   :  { %145 = vsyncpa [#allocation3], 1 }
 0x126   :  { %146 = vsyncpa [#allocation6], 1 }
 0x127   :  { %147 = vsyncpa [#allocation4], 1 }

</bundles_post_ra>
